<compile_context>
chip_gen: v6e
topology: v6e:2x2x1
jax: 0.10.0
libtpu: 0.0.40
codegen_flags: <defaults>
</compile_context>

<pallas_src>
import functools

import jax
import jax.numpy as jnp
from jax.experimental import pallas as pl
from jax.experimental.pallas import tpu as pltpu

_VMEM_LIMIT = 40 * 1024 * 1024   # < 64 MiB physical on v7x, ample on v5e/v6e


# --------------------------------------------------------------------------
# helpers
# --------------------------------------------------------------------------

def _round_up(n, m):
    return ((n + m - 1) // m) * m


def _pick_row_block(n_rows, target, min_val=8):
    """Largest divisor of n_rows that is a multiple of 8, >= min_val and
    <= target (falling back to the smallest valid divisor above target)."""
    target = max(target, min_val)
    best_below, best_above = None, None
    for t in range(8, n_rows + 1, 8):
        if n_rows % t or t < min_val:
            continue
        if t <= target:
            best_below = t
        elif best_above is None:
            best_above = t
    if best_below is not None:
        return best_below
    if best_above is not None:
        return best_above
    return n_rows


# --------------------------------------------------------------------------
# Pallas kernels
# --------------------------------------------------------------------------

def _flow_net_kernel(a9_ref, w1_ref, b1_ref, w2_ref, b2_ref, w3_ref, ring_ref,
                     y9_ref):
    """conv1 (im2col'd 3x3) + ReLU + conv2 (1x1) + ReLU + conv3 per-pixel part.

    Three back-to-back MXU matmuls on one row block; h1 / h2 stay in VMEM.
    y9[:, tap*2C + c] = W3[c, :, tap] @ h2[row]; conv3's spatial sum happens in
    kernel 2.  `ring` zeroes padding rows so kernel 2 sees true zero padding.
    """
    h1 = jnp.dot(a9_ref[...], w1_ref[...], preferred_element_type=jnp.float32)
    h1 = jnp.maximum(h1 + b1_ref[...], 0.0)
    h2 = jnp.dot(h1.astype(w2_ref.dtype), w2_ref[...],
                 preferred_element_type=jnp.float32)
    h2 = jnp.maximum(h2 + b2_ref[...], 0.0)
    y9 = jnp.dot(h2.astype(w3_ref.dtype), w3_ref[...],
                 preferred_element_type=jnp.float32)
    y9_ref[...] = (y9 * ring_ref[...]).astype(y9_ref.dtype)


def _tapsum_coupling_kernel(prev_ref, cur_ref, next_ref, x_ref, b3_ref,
                            omm_ref, sc_ref, out_ref, *, rb, wp, c, invert):
    """9-tap shifted row-sum of y9 (conv3 spatial part) + coupling epilogue."""
    # window of rows [i*rb - rb, i*rb + 2*rb) around the current output block
    win = jnp.concatenate([prev_ref[...], cur_ref[...], next_ref[...]], axis=0)
    acc = jnp.zeros((rb, 2 * c), jnp.float32)
    for tap in range(9):
        kh, kw = divmod(tap, 3)
        off = (kh - 1) * wp + (kw - 1)
        acc = acc + win[rb + off:rb + off + rb, tap * 2 * c:(tap + 1) * 2 * c]
    raw = acc + b3_ref[...]                  # (rb, 2C): [log_scale | t]
    omm = omm_ref[...]                       # (1, C) == 1 - mask
    scale = sc_ref[0]
    shift = sc_ref[1]
    log_scale = (scale * jnp.tanh(raw[:, :c]) + shift) * omm
    t = raw[:, c:] * omm
    x = x_ref[...]
    if invert:
        z = (x - t) * jnp.exp(-log_scale)
        ld = -log_scale
    else:
        z = x * jnp.exp(log_scale) + t
        ld = log_scale
    out_ref[...] = jnp.concatenate([z, ld], axis=1)


# --------------------------------------------------------------------------
# pallas_call wrappers
# --------------------------------------------------------------------------

def flow_net_y9(a9, w1f, b1, w2m, b2, w3f, ring, *, tm):
    """Fused flow_net (minus conv3's spatial sum): (n_rows, 9C) -> (n_rows, 18C)."""
    n_rows, c9 = a9.shape
    f = w1f.shape[1]
    c18 = w3f.shape[1]
    return pl.pallas_call(
        _flow_net_kernel,
        out_shape=jax.ShapeDtypeStruct((n_rows, c18), jnp.float32),
        grid=(n_rows // tm,),
        in_specs=[
            pl.BlockSpec((tm, c9), lambda i: (i, 0)),
            pl.BlockSpec((c9, f), lambda i: (0, 0)),      # weights: constant
            pl.BlockSpec((1, f), lambda i: (0, 0)),       # index maps -> one
            pl.BlockSpec((f, f), lambda i: (0, 0)),       # DMA, VMEM-resident
            pl.BlockSpec((1, f), lambda i: (0, 0)),
            pl.BlockSpec((f, c18), lambda i: (0, 0)),
            pl.BlockSpec((tm, 1), lambda i: (i, 0)),
        ],
        out_specs=pl.BlockSpec((tm, c18), lambda i: (i, 0)),
        compiler_params=pltpu.CompilerParams(
            dimension_semantics=("parallel",),
            vmem_limit_bytes=_VMEM_LIMIT),
    )(a9, w1f, b1.reshape(1, f).astype(jnp.float32), w2m,
      b2.reshape(1, f).astype(jnp.float32), w3f, ring)


def tapsum_coupling(y9, x_flat, b3, omm, sc, *, rb, wp, c, invert):
    """conv3's 3x3 spatial sum over y9 fused with the affine-coupling math."""
    n_rows, c18 = y9.shape
    nb = n_rows // rb
    kernel = functools.partial(_tapsum_coupling_kernel, rb=rb, wp=wp, c=c,
                               invert=invert)
    return pl.pallas_call(
        kernel,
        out_shape=jax.ShapeDtypeStruct((n_rows, 2 * c), jnp.float32),
        grid=(nb,),
        in_specs=[
            # prev / cur / next row blocks of y9 (clamped at the array ends;
            # the affected rows are discarded ring rows and stay finite).
            pl.BlockSpec((rb, c18), lambda i: (jnp.maximum(i - 1, 0), 0)),
            pl.BlockSpec((rb, c18), lambda i: (i, 0)),
            pl.BlockSpec((rb, c18), lambda i: (jnp.minimum(i + 1, nb - 1), 0)),
            pl.BlockSpec((rb, c), lambda i: (i, 0)),
            pl.BlockSpec((1, 2 * c), lambda i: (0, 0)),
            pl.BlockSpec((1, c), lambda i: (0, 0)),
            pl.BlockSpec(memory_space=pltpu.MemorySpace.SMEM),
        ],
        out_specs=pl.BlockSpec((rb, 2 * c), lambda i: (i, 0)),
        compiler_params=pltpu.CompilerParams(
            dimension_semantics=("parallel",),
            vmem_limit_bytes=_VMEM_LIMIT),
    )(y9, y9, y9, x_flat, b3.reshape(1, 2 * c).astype(jnp.float32),
      omm.astype(jnp.float32), sc.astype(jnp.float32))


# --------------------------------------------------------------------------
# GlowAffineCoupling forward (host-side glue around the kernels)
# --------------------------------------------------------------------------

def glow_affine_coupling_forward(params, x, invert=False):
    """x: (B, C, H, W) float32.  Returns (z, log_det_jacobian), both NCHW."""
    x = x.astype(jnp.float32)
    B, C, H, W = x.shape
    F = params["w1"].shape[0]
    Hp = H + 2
    Wp = _round_up(W + 2, 8)                 # padded row width (>= W + 2)
    n_rows = B * Hp * Wp
    bf16 = jnp.bfloat16

    mask = params["mask"].reshape(C)         # 0 on the first C//2 channels
    omm = (1.0 - mask).reshape(1, C).astype(jnp.float32)

    # ---- NCHW -> zero-ring-padded channels-last grid, flattened to 2-D ----
    x_nhwc = jnp.transpose(x, (0, 2, 3, 1))
    pad = ((0, 0), (1, 1), (1, Wp - W - 1), (0, 0))
    x_flat = jnp.pad(x_nhwc, pad).reshape(n_rows, C)
    # 1 inside the valid HxW image, 0 on the padding ring / width padding
    ring = jnp.pad(jnp.ones((B, H, W, 1), jnp.float32), pad).reshape(n_rows, 1)

    # ---- host im2col of x (bf16 first): 9 taps folded into channels ----
    xp = jnp.pad(x_flat.astype(bf16), ((Wp + 1, Wp + 1), (0, 0)))
    a9 = jnp.concatenate(
        [xp[kh * Wp + kw:kh * Wp + kw + n_rows]
         for kh in range(3) for kw in range(3)], axis=1)         # (n_rows, 9C)

    # ---- weight folding: coupling mask into W1, conv taps into channels ----
    w1_eff = params["w1"] * mask.reshape(1, C, 1, 1)             # (F, C, 3, 3)
    w1f = jnp.transpose(w1_eff, (2, 3, 1, 0)).reshape(9 * C, F).astype(bf16)
    w2m = jnp.transpose(params["w2"]).astype(bf16)               # (Fin, Fout)
    w3f = jnp.transpose(params["w3"], (1, 2, 3, 0)).reshape(F, 18 * C)
    w3f = w3f.astype(bf16)                                       # (F, 9*2C)
    # NOTE: W2 is kept fully VMEM-resident; for extremely large filter_size
    # (>~2048) an N/K-tiled conv2 would be needed instead.

    # ---- row-block sizes (>=4 blocks kept for megacore sharding) ----
    tm_cap = max(64, (12 * 1024 * 1024) // max(1, 8 * F))   # h1/h2 VMEM bound
    tm = _pick_row_block(n_rows, min(1024, tm_cap, max(8, n_rows // 4)))
    rb = _pick_row_block(n_rows, min(1024, max(Wp + 8, n_rows // 4)),
                         min_val=Wp + 8)                    # halo must fit

    # ---- kernel 1: whole flow_net except conv3's spatial sum ----
    y9 = flow_net_y9(a9, w1f, params["b1"], w2m, params["b2"], w3f, ring,
                     tm=tm)

    # ---- kernel 2: conv3 spatial 9-tap sum + affine-coupling epilogue ----
    sc = jnp.concatenate([jnp.reshape(params["scale"], (1,)),
                          jnp.reshape(params["scale_shift"], (1,))]
                         ).astype(jnp.float32)
    zld = tapsum_coupling(y9, x_flat, params["b3"], omm, sc,
                          rb=rb, wp=Wp, c=C, invert=invert)

    zld = zld.reshape(B, Hp, Wp, 2 * C)[:, 1:H + 1, 1:W + 1, :]
    z = jnp.transpose(zld[..., :C], (0, 3, 1, 2))
    log_det = jnp.transpose(zld[..., C:], (0, 3, 1, 2))
    return z, log_det


# --------------------------------------------------------------------------
# plain-JAX reference (same math as the PyTorch module) for verification
# --------------------------------------------------------------------------

def reference_forward(params, x, invert=False):
    B, C, H, W = x.shape
    mask = params["mask"].reshape(1, C, 1, 1)
    dn = ("NCHW", "OIHW", "NCHW")
    hp = jax.lax.Precision.HIGHEST
    x_ = x * mask
    h = jax.lax.conv_general_dilated(x_, params["w1"], (1, 1), "SAME",
                                     dimension_numbers=dn, precision=hp)
    h = jax.nn.relu(h + params["b1"].reshape(1, -1, 1, 1))
    h = jax.lax.conv_general_dilated(h, params["w2"][:, :, None, None], (1, 1),
                                     "SAME", dimension_numbers=dn, precision=hp)
    h = jax.nn.relu(h + params["b2"].reshape(1, -1, 1, 1))
    out = jax.lax.conv_general_dilated(h, params["w3"], (1, 1), "SAME",
                                       dimension_numbers=dn, precision=hp)
    out = out + params["b3"].reshape(1, -1, 1, 1)
    log_scale, t = out[:, :C], out[:, C:]
    log_scale = (params["scale"] * jnp.tanh(log_scale) + params["scale_shift"])
    log_scale = log_scale * (1.0 - mask)
    t = t * (1.0 - mask)
    if invert:
        return (x - t) / jnp.exp(log_scale), -log_scale
    return x * jnp.exp(log_scale) + t, log_scale


# --------------------------------------------------------------------------
# main
# --------------------------------------------------------------------------

if __name__ == "__main__":
    key = jax.random.PRNGKey(0)
    B, C, H, W = 2, 4, 16, 16
    F = 64   # filter_size (module default is 512; reduced for a fast smoke test)
    ks = jax.random.split(key, 8)

    params = dict(
        w1=0.05 * jax.random.normal(ks[0], (F, C, 3, 3), jnp.float32),
        b1=0.05 * jax.random.normal(ks[1], (F,), jnp.float32),
        w2=0.05 * jax.random.normal(ks[2], (F, F), jnp.float32),
        b2=0.05 * jax.random.normal(ks[3], (F,), jnp.float32),
        # NOTE: the PyTorch module zero-inits the last conv (so z == x at init);
        # random values are used here so the numerical check exercises the
        # whole data path.  Forward semantics hold for arbitrary parameters.
        w3=0.05 * jax.random.normal(ks[4], (2 * C, F, 3, 3), jnp.float32),
        b3=0.05 * jax.random.normal(ks[5], (2 * C,), jnp.float32),
        mask=jnp.concatenate([jnp.zeros((C // 2,), jnp.float32),
                              jnp.ones((C - C // 2,), jnp.float32)]),
        scale=jnp.full((1,), 0.7, jnp.float32),
        scale_shift=jnp.full((1,), 0.1, jnp.float32),
    )
    x = jax.random.normal(ks[6], (B, C, H, W), jnp.float32)

    fwd = jax.jit(glow_affine_coupling_forward, static_argnames=("invert",))
    z, log_det = fwd(params, x)
    jax.block_until_ready(z)
    jax.block_until_ready(log_det)

    # numerical check against the plain-JAX reference of the PyTorch module
    z_ref, ld_ref = reference_forward(params, x)

    def _close(a, b, tol=3e-2):
        return bool(jnp.all(jnp.abs(a - b) <= tol * (1.0 + jnp.abs(b))))

    assert _close(z, z_ref), "z mismatch vs reference"
    assert _close(log_det, ld_ref), "log_det mismatch vs reference"

    print("KERNEL_OK")
</pallas_src>

<mosaic_0001>
module attributes {stable_mosaic.version = 11 : i64} {
  func.func @_flow_net_kernel(%arg0: i32, %arg1: memref<216x36xbf16, #tpu.memory_space<vmem>>, %arg2: memref<36x64xbf16, #tpu.memory_space<vmem>>, %arg3: memref<1x64xf32, #tpu.memory_space<vmem>>, %arg4: memref<64x64xbf16, #tpu.memory_space<vmem>>, %arg5: memref<1x64xf32, #tpu.memory_space<vmem>>, %arg6: memref<64x72xbf16, #tpu.memory_space<vmem>>, %arg7: memref<216x1xf32, #tpu.memory_space<vmem>>, %arg8: memref<216x72xf32, #tpu.memory_space<vmem>>) attributes {dimension_semantics = [#tpu.dimension_semantics<parallel>], iteration_bounds = array<i64: 4>, scalar_prefetch = 0 : i64, scratch_operands = 0 : i64, tpu.core_type = #tpu.core_type<tc>, window_params = [{transform_indices = @transform_0, window_bounds = array<i64: 216, 36>}, {pipeline_mode = #tpu.pipeline_mode<synchronous>, transform_indices = @transform_1, window_bounds = array<i64: 36, 64>}, {pipeline_mode = #tpu.pipeline_mode<synchronous>, transform_indices = @transform_2, window_bounds = array<i64: 1, 64>}, {pipeline_mode = #tpu.pipeline_mode<synchronous>, transform_indices = @transform_3, window_bounds = array<i64: 64, 64>}, {pipeline_mode = #tpu.pipeline_mode<synchronous>, transform_indices = @transform_4, window_bounds = array<i64: 1, 64>}, {pipeline_mode = #tpu.pipeline_mode<synchronous>, transform_indices = @transform_5, window_bounds = array<i64: 64, 72>}, {transform_indices = @transform_6, window_bounds = array<i64: 216, 1>}, {transform_indices = @transform_7, window_bounds = array<i64: 216, 72>}]} {
    %c0 = arith.constant 0 : index
    %c0_0 = arith.constant 0 : index
    %0 = vector.load %arg1[%c0, %c0_0] : memref<216x36xbf16, #tpu.memory_space<vmem>>, vector<216x36xbf16>
    %c0_1 = arith.constant 0 : index
    %c0_2 = arith.constant 0 : index
    %1 = vector.load %arg2[%c0_1, %c0_2] : memref<36x64xbf16, #tpu.memory_space<vmem>>, vector<36x64xbf16>
    %cst = arith.constant dense<0.000000e+00> : vector<216x64xf32>
    %2 = tpu.matmul %0, %1, %cst {dimension_numbers = #tpu.dot_dimension_numbers<[1], [0], [0], [1], [0, 0, 1, 1], [], []>} : vector<216x36xbf16>, vector<36x64xbf16>, vector<216x64xf32> -> vector<216x64xf32>
    %c0_3 = arith.constant 0 : index
    %c0_4 = arith.constant 0 : index
    %3 = vector.load %arg3[%c0_3, %c0_4] : memref<1x64xf32, #tpu.memory_space<vmem>>, vector<1x64xf32>
    %4 = vector.broadcast %3 : vector<1x64xf32> to vector<216x64xf32>
    %5 = arith.addf %2, %4 : vector<216x64xf32>
    %cst_5 = arith.constant 0.000000e+00 : f32
    %6 = vector.broadcast %cst_5 : f32 to vector<216x64xf32>
    %7 = arith.maximumf %5, %6 : vector<216x64xf32>
    %8 = arith.truncf %7 : vector<216x64xf32> to vector<216x64xbf16>
    %c0_6 = arith.constant 0 : index
    %c0_7 = arith.constant 0 : index
    %9 = vector.load %arg4[%c0_6, %c0_7] : memref<64x64xbf16, #tpu.memory_space<vmem>>, vector<64x64xbf16>
    %cst_8 = arith.constant dense<0.000000e+00> : vector<216x64xf32>
    %10 = tpu.matmul %8, %9, %cst_8 {dimension_numbers = #tpu.dot_dimension_numbers<[1], [0], [0], [1], [0, 0, 1, 1], [], []>} : vector<216x64xbf16>, vector<64x64xbf16>, vector<216x64xf32> -> vector<216x64xf32>
    %c0_9 = arith.constant 0 : index
    %c0_10 = arith.constant 0 : index
    %11 = vector.load %arg5[%c0_9, %c0_10] : memref<1x64xf32, #tpu.memory_space<vmem>>, vector<1x64xf32>
    %12 = vector.broadcast %11 : vector<1x64xf32> to vector<216x64xf32>
    %13 = arith.addf %10, %12 : vector<216x64xf32>
    %cst_11 = arith.constant 0.000000e+00 : f32
    %14 = vector.broadcast %cst_11 : f32 to vector<216x64xf32>
    %15 = arith.maximumf %13, %14 : vector<216x64xf32>
    %16 = arith.truncf %15 : vector<216x64xf32> to vector<216x64xbf16>
    %c0_12 = arith.constant 0 : index
    %c0_13 = arith.constant 0 : index
    %17 = vector.load %arg6[%c0_12, %c0_13] : memref<64x72xbf16, #tpu.memory_space<vmem>>, vector<64x72xbf16>
    %cst_14 = arith.constant dense<0.000000e+00> : vector<216x72xf32>
    %18 = tpu.matmul %16, %17, %cst_14 {dimension_numbers = #tpu.dot_dimension_numbers<[1], [0], [0], [1], [0, 0, 1, 1], [], []>} : vector<216x64xbf16>, vector<64x72xbf16>, vector<216x72xf32> -> vector<216x72xf32>
    %c0_15 = arith.constant 0 : index
    %c0_16 = arith.constant 0 : index
    %19 = vector.load %arg7[%c0_15, %c0_16] : memref<216x1xf32, #tpu.memory_space<vmem>>, vector<216x1xf32>
    %20 = vector.broadcast %19 : vector<216x1xf32> to vector<216x72xf32>
    %21 = arith.mulf %18, %20 : vector<216x72xf32>
    %c0_17 = arith.constant 0 : index
    %c0_18 = arith.constant 0 : index
    %22 = vector.load %arg8[%c0_17, %c0_18] : memref<216x72xf32, #tpu.memory_space<vmem>>, vector<216x72xf32>
    tpu.vector_store %arg8[%c0_17, %c0_18], %21 {strides = array<i32>} : memref<216x72xf32, #tpu.memory_space<vmem>>, vector<216x72xf32>,
    return
  }
  func.func @transform_0(%arg0: i32) -> (i32, i32) {
    %c0_i32 = arith.constant 0 : i32
    %c0_i32_0 = arith.constant 0 : i32
    return %arg0, %c0_i32 : i32, i32
  }
  func.func @transform_1(%arg0: i32) -> (i32, i32) {
    %c0_i32 = arith.constant 0 : i32
    %c0_i32_0 = arith.constant 0 : i32
    %c0_i32_1 = arith.constant 0 : i32
    return %c0_i32, %c0_i32_0 : i32, i32
  }
  func.func @transform_2(%arg0: i32) -> (i32, i32) {
    %c0_i32 = arith.constant 0 : i32
    %c0_i32_0 = arith.constant 0 : i32
    %c0_i32_1 = arith.constant 0 : i32
    return %c0_i32, %c0_i32_0 : i32, i32
  }
  func.func @transform_3(%arg0: i32) -> (i32, i32) {
    %c0_i32 = arith.constant 0 : i32
    %c0_i32_0 = arith.constant 0 : i32
    %c0_i32_1 = arith.constant 0 : i32
    return %c0_i32, %c0_i32_0 : i32, i32
  }
  func.func @transform_4(%arg0: i32) -> (i32, i32) {
    %c0_i32 = arith.constant 0 : i32
    %c0_i32_0 = arith.constant 0 : i32
    %c0_i32_1 = arith.constant 0 : i32
    return %c0_i32, %c0_i32_0 : i32, i32
  }
  func.func @transform_5(%arg0: i32) -> (i32, i32) {
    %c0_i32 = arith.constant 0 : i32
    %c0_i32_0 = arith.constant 0 : i32
    %c0_i32_1 = arith.constant 0 : i32
    return %c0_i32, %c0_i32_0 : i32, i32
  }
  func.func @transform_6(%arg0: i32) -> (i32, i32) {
    %c0_i32 = arith.constant 0 : i32
    %c0_i32_0 = arith.constant 0 : i32
    return %arg0, %c0_i32 : i32, i32
  }
  func.func @transform_7(%arg0: i32) -> (i32, i32) {
    %c0_i32 = arith.constant 0 : i32
    %c0_i32_0 = arith.constant 0 : i32
    return %arg0, %c0_i32 : i32, i32
  }
}

module attributes {stable_mosaic.version = 11 : i64} {
  func.func @_tapsum_coupling_kernel(%arg0: i32, %arg1: memref<216x72xf32, #tpu.memory_space<vmem>>, %arg2: memref<216x72xf32, #tpu.memory_space<vmem>>, %arg3: memref<216x72xf32, #tpu.memory_space<vmem>>, %arg4: memref<216x4xf32, #tpu.memory_space<vmem>>, %arg5: memref<1x8xf32, #tpu.memory_space<vmem>>, %arg6: memref<1x4xf32, #tpu.memory_space<vmem>>, %arg7: memref<2xf32, #tpu.memory_space<smem>>, %arg8: memref<216x8xf32, #tpu.memory_space<vmem>>) attributes {dimension_semantics = [#tpu.dimension_semantics<parallel>], iteration_bounds = array<i64: 4>, scalar_prefetch = 0 : i64, scratch_operands = 0 : i64, tpu.core_type = #tpu.core_type<tc>, window_params = [{transform_indices = @transform_0, window_bounds = array<i64: 216, 72>}, {transform_indices = @transform_1, window_bounds = array<i64: 216, 72>}, {transform_indices = @transform_2, window_bounds = array<i64: 216, 72>}, {transform_indices = @transform_3, window_bounds = array<i64: 216, 4>}, {pipeline_mode = #tpu.pipeline_mode<synchronous>, transform_indices = @transform_4, window_bounds = array<i64: 1, 8>}, {pipeline_mode = #tpu.pipeline_mode<synchronous>, transform_indices = @transform_5, window_bounds = array<i64: 1, 4>}, {transform_indices = @transform_6, window_bounds = array<i64: 2>}, {transform_indices = @transform_7, window_bounds = array<i64: 216, 8>}]} {
    %c0 = arith.constant 0 : index
    %c0_0 = arith.constant 0 : index
    %0 = vector.load %arg1[%c0, %c0_0] : memref<216x72xf32, #tpu.memory_space<vmem>>, vector<216x72xf32>
    %c0_1 = arith.constant 0 : index
    %c0_2 = arith.constant 0 : index
    %1 = vector.load %arg2[%c0_1, %c0_2] : memref<216x72xf32, #tpu.memory_space<vmem>>, vector<216x72xf32>
    %c0_3 = arith.constant 0 : index
    %c0_4 = arith.constant 0 : index
    %2 = vector.load %arg3[%c0_3, %c0_4] : memref<216x72xf32, #tpu.memory_space<vmem>>, vector<216x72xf32>
    %3 = tpu.concatenate %0, %1, %2 in 0 : vector<216x72xf32>, vector<216x72xf32>, vector<216x72xf32> -> vector<648x72xf32>
    %cst = arith.constant 0.000000e+00 : f32
    %4 = vector.broadcast %cst : f32 to vector<216x8xf32>
    %5 = vector.extract_strided_slice %3 {offsets = [191, 0], sizes = [216, 8], strides = [1, 1]} : vector<648x72xf32> to vector<216x8xf32>
    %6 = arith.addf %4, %5 : vector<216x8xf32>
    %7 = vector.extract_strided_slice %3 {offsets = [192, 8], sizes = [216, 8], strides = [1, 1]} : vector<648x72xf32> to vector<216x8xf32>
    %8 = arith.addf %6, %7 : vector<216x8xf32>
    %9 = vector.extract_strided_slice %3 {offsets = [193, 16], sizes = [216, 8], strides = [1, 1]} : vector<648x72xf32> to vector<216x8xf32>
    %10 = arith.addf %8, %9 : vector<216x8xf32>
    %11 = vector.extract_strided_slice %3 {offsets = [215, 24], sizes = [216, 8], strides = [1, 1]} : vector<648x72xf32> to vector<216x8xf32>
    %12 = arith.addf %10, %11 : vector<216x8xf32>
    %13 = vector.extract_strided_slice %3 {offsets = [216, 32], sizes = [216, 8], strides = [1, 1]} : vector<648x72xf32> to vector<216x8xf32>
    %14 = arith.addf %12, %13 : vector<216x8xf32>
    %15 = vector.extract_strided_slice %3 {offsets = [217, 40], sizes = [216, 8], strides = [1, 1]} : vector<648x72xf32> to vector<216x8xf32>
    %16 = arith.addf %14, %15 : vector<216x8xf32>
    %17 = vector.extract_strided_slice %3 {offsets = [239, 48], sizes = [216, 8], strides = [1, 1]} : vector<648x72xf32> to vector<216x8xf32>
    %18 = arith.addf %16, %17 : vector<216x8xf32>
    %19 = vector.extract_strided_slice %3 {offsets = [240, 56], sizes = [216, 8], strides = [1, 1]} : vector<648x72xf32> to vector<216x8xf32>
    %20 = arith.addf %18, %19 : vector<216x8xf32>
    %21 = vector.extract_strided_slice %3 {offsets = [241, 64], sizes = [216, 8], strides = [1, 1]} : vector<648x72xf32> to vector<216x8xf32>
    %22 = arith.addf %20, %21 : vector<216x8xf32>
    %c0_5 = arith.constant 0 : index
    %c0_6 = arith.constant 0 : index
    %23 = vector.load %arg5[%c0_5, %c0_6] : memref<1x8xf32, #tpu.memory_space<vmem>>, vector<1x8xf32>
    %24 = vector.broadcast %23 : vector<1x8xf32> to vector<216x8xf32>
    %25 = arith.addf %22, %24 : vector<216x8xf32>
    %c0_7 = arith.constant 0 : index
    %c0_8 = arith.constant 0 : index
    %26 = vector.load %arg6[%c0_7, %c0_8] : memref<1x4xf32, #tpu.memory_space<vmem>>, vector<1x4xf32>
    %c0_9 = arith.constant 0 : index
    %27 = memref.load %arg7[%c0_9] : memref<2xf32, #tpu.memory_space<smem>>
    %c1 = arith.constant 1 : index
    %28 = memref.load %arg7[%c1] : memref<2xf32, #tpu.memory_space<smem>>
    %29 = vector.extract_strided_slice %25 {offsets = [0, 0], sizes = [216, 4], strides = [1, 1]} : vector<216x8xf32> to vector<216x4xf32>
    %30 = math.tanh %29 : vector<216x4xf32>
    %31 = vector.broadcast %27 : f32 to vector<216x4xf32>
    %32 = arith.mulf %31, %30 : vector<216x4xf32>
    %33 = vector.broadcast %28 : f32 to vector<216x4xf32>
    %34 = arith.addf %32, %33 : vector<216x4xf32>
    %35 = vector.broadcast %26 : vector<1x4xf32> to vector<216x4xf32>
    %36 = arith.mulf %34, %35 : vector<216x4xf32>
    %37 = vector.extract_strided_slice %25 {offsets = [0, 4], sizes = [216, 4], strides = [1, 1]} : vector<216x8xf32> to vector<216x4xf32>
    %38 = vector.broadcast %26 : vector<1x4xf32> to vector<216x4xf32>
    %39 = arith.mulf %37, %38 : vector<216x4xf32>
    %c0_10 = arith.constant 0 : index
    %c0_11 = arith.constant 0 : index
    %40 = vector.load %arg4[%c0_10, %c0_11] : memref<216x4xf32, #tpu.memory_space<vmem>>, vector<216x4xf32>
    %41 = math.exp %36 : vector<216x4xf32>
    %42 = arith.mulf %40, %41 : vector<216x4xf32>
    %43 = arith.addf %42, %39 : vector<216x4xf32>
    %44 = tpu.concatenate %43, %36 in 1 : vector<216x4xf32>, vector<216x4xf32> -> vector<216x8xf32>
    %c0_12 = arith.constant 0 : index
    %c0_13 = arith.constant 0 : index
    %45 = vector.load %arg8[%c0_12, %c0_13] : memref<216x8xf32, #tpu.memory_space<vmem>>, vector<216x8xf32>
    tpu.vector_store %arg8[%c0_12, %c0_13], %44 {strides = array<i32>} : memref<216x8xf32, #tpu.memory_space<vmem>>, vector<216x8xf32>,
    return
  }
  func.func @transform_0(%arg0: i32) -> (i32, i32) {
    %c1_i32 = arith.constant 1 : i32
    %0 = arith.subi %arg0, %c1_i32 : i32
    %c0_i32 = arith.constant 0 : i32
    %1 = arith.maxsi %0, %c0_i32 : i32
    %c0_i32_0 = arith.constant 0 : i32
    %c0_i32_1 = arith.constant 0 : i32
    return %1, %c0_i32_0 : i32, i32
  }
  func.func @transform_1(%arg0: i32) -> (i32, i32) {
    %c0_i32 = arith.constant 0 : i32
    %c0_i32_0 = arith.constant 0 : i32
    return %arg0, %c0_i32 : i32, i32
  }
  func.func @transform_2(%arg0: i32) -> (i32, i32) {
    %c1_i32 = arith.constant 1 : i32
    %0 = arith.addi %arg0, %c1_i32 : i32
    %c3_i32 = arith.constant 3 : i32
    %1 = arith.minsi %0, %c3_i32 : i32
    %c0_i32 = arith.constant 0 : i32
    %c0_i32_0 = arith.constant 0 : i32
    return %1, %c0_i32 : i32, i32
  }
  func.func @transform_3(%arg0: i32) -> (i32, i32) {
    %c0_i32 = arith.constant 0 : i32
    %c0_i32_0 = arith.constant 0 : i32
    return %arg0, %c0_i32 : i32, i32
  }
  func.func @transform_4(%arg0: i32) -> (i32, i32) {
    %c0_i32 = arith.constant 0 : i32
    %c0_i32_0 = arith.constant 0 : i32
    %c0_i32_1 = arith.constant 0 : i32
    return %c0_i32, %c0_i32_0 : i32, i32
  }
  func.func @transform_5(%arg0: i32) -> (i32, i32) {
    %c0_i32 = arith.constant 0 : i32
    %c0_i32_0 = arith.constant 0 : i32
    %c0_i32_1 = arith.constant 0 : i32
    return %c0_i32, %c0_i32_0 : i32, i32
  }
  func.func @transform_6(%arg0: i32) -> i32 {
    %c0_i32 = arith.constant 0 : i32
    %c0_i32_0 = arith.constant 0 : i32
    return %c0_i32 : i32
  }
  func.func @transform_7(%arg0: i32) -> (i32, i32) {
    %c0_i32 = arith.constant 0 : i32
    %c0_i32_0 = arith.constant 0 : i32
    return %arg0, %c0_i32 : i32, i32
  }
}

</mosaic_0001>

<bundles_post_ra>
// kernel: glow_affine_coupling_forward.2
= control target key start
LH: loop header
LB: loop body
LE: loop exit
PB: predicated region body
PF: predicated region fallthrough
CT: control target
= control target key end

     0   :  { %s1760_s24 = smov 0   ;;  %s2037_s0 = inlined_call_operand.vmem [shape: bf16[864,36], index: 0, kind: input, shape index: {}]   ;;  %s2038_s1 = inlined_call_operand.vmem [shape: bf16[36,64], index: 1, kind: input, shape index: {}]   ;;  %s2039_s2 = inlined_call_operand.vmem [shape: f32[1,64], index: 2, kind: input, shape index: {}]   ;;  %s2040_s3 = inlined_call_operand.vmem [shape: bf16[64,64], index: 3, kind: input, shape index: {}]   ;;  %s2041_s4 = inlined_call_operand.vmem [shape: f32[1,64], index: 4, kind: input, shape index: {}]   ;;  %s2042_s5 = inlined_call_operand.vmem [shape: bf16[64,72], index: 5, kind: input, shape index: {}]   ;;  %s2043_s6 = inlined_call_operand.vmem [shape: f32[864,1], index: 6, kind: input, shape index: {}]   ;;  %s2044_s7 = inlined_call_operand.vmem [shape: f32[864,72], index: 7, kind: output, shape index: {}]  }
   0x1 LB: > { %s1429_s25 = sadd.s32 4294967295, %s1717_s24   ;;  %p1433_p0 = scmp.ge.s32.totalorder %s1717_s24, 1  ;;  %s1717_s24 = sphi %s1760_s24, %s17_s24  }
   0x2   : > { %p249_p1 = scmp.lt.s32.totalorder %s1717_s24, 5 }
   0x4   : > { %p250_p2 = pnand %p1433_p0, %p249_p1 }
   0x5   : > { %s286_s30 = smul.u32 (!%p250_p2), 27, %s1429_s25 }
   0x6   : > { %253 = sbr.rel (%p250_p2) target bundleno = 686 (0x2ae), region = 48 }
   0x7   : > { %p287_p3 = scmp.lt.s32.totalorder (!%p250_p2), %s286_s30, 107 }
   0xb   : > { %v1686_v0 = vld [vmem:[%s2038_s1 + $0x10] ss:$0 sps:$4 sm:$0x33]   ;;  %vm470_vm0 = vcmask 1041408   ;;  %v1687_v1 = vld [vmem:[%s2038_s1 + $0x8] sm:$0xff]   ;;  %v1688_v3 = vld [vmem:[%s2038_s1] sm:$0xff]  }
   0xc   : > { %1673 = vmatprep.subr.msk.bf16.mxu0 %vm470_vm0, %v1686_v0  ;;  %v472_v2 = vsel %vm470_vm0, %v1686_v0, 0  ;;  %1674 = vmatprep.subr.msk.bf16.mxu1 %vm470_vm0, %v1686_v0  ;;  %s2046_s30 = smov (!%p287_p3, %s286_s30), 107  ;;  %vm427_vm1 = vcmask 293888   ;;  %v1703_v4 = vld [vmem:[%s2040_s3 + $0x18] sm:$0xff]   ;;  %v1704_v9 = vld [vmem:[%s2040_s3 + $0x10] sm:$0xff]   ;;  %v1705_v20 = vld [vmem:[%s2040_s3 + $0x8] sm:$0xff]  }
   0xd   : > { %1562 = vmatpush3.bf16.msra.mxu0 %v472_v2  ;;  %1670 = vmatpush3.bf16.msra.mxu1 %v472_v2  ;;  %s1434_s10 = sshll.u32 %s2046_s30, 2  ;;  %v1706_v21 = vld [vmem:[%s2040_s3] sm:$0xff]   ;;  %v1707_v22 = vld [vmem:[%s2042_s5 + $0x18] sm:$0xff]   ;;  %v1708_v23 = vld [vmem:[%s2042_s5 + $0x10] sm:$0xff]   ;;  %vm698_vm2 = vcmask 523264   ;;  %s1435_s11 = sshll.u32 %s2046_s30, 3 }
   0xe   : > { %1563 = vmatprep.subr.bf16.mxu0 %v1687_v1  ;;  %1668 = vmatprep.subr.bf16.mxu1 %v1687_v1  ;;  %s1786_s15 = scalar_lea.vmem %s2037_s0, %s1434_s10  ;;  %v1709_v24 = vld [vmem:[%s2042_s5 + $0x8] sm:$0xff]   ;;  %v1837_v27 = vld [vmem:[%s2039_s2] ss:$0 sm:$0xff]  ;;  %s1898_s14 = scalar_lea.vmem %s2043_s6, %s1435_s11  ;;  %vm1333_vm3 = vcmask 588800  }
   0xf   : > { %v1689_v5 = vld [vmem:[%s1786_s15] sm:$0xff]   ;;  %v1690_v6 = vld [vmem:[%s1786_s15 + $0x8] sm:$0xff]   ;;  %v1691_v7 = vld [vmem:[%s1786_s15 + $0x10] sm:$0xff]   ;;  %s1978_s19 = scalar_lea.vmem %s2044_s7, %s1435_s11 }
  0x10   : > { %1567 = vmatprep.mubr.msk.bf16.mxu0 %vm427_vm1, %v1689_v5  ;;  %v1692_v8 = vld [vmem:[%s1786_s15 + $0x18] sm:$0xff]   ;;  %v1693_v10 = vld [vmem:[%s1786_s15 + $0x20] sm:$0xff]   ;;  %v1698_v12 = vld [vmem:[%s1786_s15 + $0x48] sm:$0xff]  }
  0x11   : > { %1564 = vmatpush3.bf16.msra.mxu0 %v1687_v1  ;;  %1671 = vmatpush3.bf16.msra.mxu1 %v1687_v1  ;;  %v1697_v11 = vld [vmem:[%s1786_s15 + $0x40] sm:$0xff]   ;;  %v1699_v13 = vld [vmem:[%s1786_s15 + $0x50] sm:$0xff]   ;;  %v1700_v14 = vld [vmem:[%s1786_s15 + $0x58] sm:$0xff]  }
  0x12   : > { %1565 = vmatprep.subr.bf16.mxu0 %v1688_v3  ;;  %1669 = vmatprep.subr.bf16.mxu1 %v1688_v3  ;;  %v1701_v15 = vld [vmem:[%s1786_s15 + $0x60] sm:$0xff]   ;;  %v1694_v16 = vld [vmem:[%s1786_s15 + $0x28] sm:$0xff]   ;;  %v1695_v17 = vld [vmem:[%s1786_s15 + $0x30] sm:$0xff]  }
  0x13   : > { %1583 = vmatprep.mubr.msk.bf16.mxu1 %vm427_vm1, %v1697_v11  ;;  %v1702_v18 = vld [vmem:[%s1786_s15 + $0x68] ss:$0 sps:$4 sm:$0xff]   ;;  %v1696_v19 = vld [vmem:[%s1786_s15 + $0x38] sm:$0xff]  }
  0x15   : > { %1566 = vmatpush3.bf16.msra.mxu0 %v1688_v3  ;;  %1672 = vmatpush3.bf16.msra.mxu1 %v1688_v3 }
  0x16   : > { %1595 = vmatprep.subr.bf16.mxu1 %v1703_v4  ;;  %1631 = vmatprep.subr.bf16.mxu0 %v1707_v22 }
  0x18   : > { %1568 = vmatmul.mubr.msk.bf16.vlgmr.msra.gmra.mxu0 %vm427_vm1, %v1690_v6  ;;  %1584 = vmatmul.mubr.msk.bf16.vlgmr.msra.gmra.mxu1 %vm427_vm1, %v1698_v12 }
  0x19   : > { %1571 = vmatprep.mubr.msk.bf16.mxu0 %vm427_vm1, %v1691_v7  ;;  %1587 = vmatprep.mubr.msk.bf16.mxu1 %vm427_vm1, %v1699_v13 }
  0x1a   : > { %1596 = vmatpush3.bf16.msra.mxu1 %v1703_v4  ;;  %1632 = vmatpush3.bf16.msra.mxu0 %v1707_v22 }
  0x1b   : > { %1597 = vmatprep.subr.bf16.mxu1 %v1704_v9  ;;  %1633 = vmatprep.subr.bf16.mxu0 %v1708_v23 }
  0x1e   : > { %1598 = vmatpush3.bf16.msra.mxu1 %v1704_v9  ;;  %1634 = vmatpush3.bf16.msra.mxu0 %v1708_v23 }
  0x1f   : > { %1599 = vmatprep.subr.bf16.mxu1 %v1705_v20  ;;  %1635 = vmatprep.subr.bf16.mxu0 %v1709_v24 }
  0x20   : > { %1572 = vmatmul.mubr.msk.bf16.gmra.mxu0 %vm427_vm1, %v1692_v8  ;;  %1588 = vmatmul.mubr.msk.bf16.gmra.mxu1 %vm427_vm1, %v1700_v14 }
  0x21   : > { %1575 = vmatprep.mubr.msk.bf16.mxu0 %vm427_vm1, %v1693_v10  ;;  %1591 = vmatprep.mubr.msk.bf16.mxu1 %vm427_vm1, %v1701_v15 }
  0x22   : > { %1600 = vmatpush3.bf16.msra.mxu1 %v1705_v20  ;;  %1636 = vmatpush3.bf16.msra.mxu0 %v1709_v24 }
  0x23   : > { %1601 = vmatprep.subr.bf16.mxu1 %v1706_v21 }
  0x26   : > { %1602 = vmatpush3.bf16.msra.mxu1 %v1706_v21 }
  0x28   : > { %1576 = vmatmul.mubr.msk.bf16.gmra.mxu0 %vm427_vm1, %v1694_v16  ;;  %1592 = vmatmul.mubr.msk.bf16.gmra.mxu1 %vm427_vm1, %v1702_v18 }
  0x29   : > { %1579 = vmatprep.mubr.msk.bf16.mxu0 %vm427_vm1, %v1695_v17 }
  0x30   : > { %1580 = vmatmul.mubr.msk.bf16.gmra.mxu0 %vm427_vm1, %v1696_v19 }
  0xd8   : > { %v1569_v25 = vpop.f32.mrf.mxu0  ;;  %v1842_v33 = vpop.f32.mrf.mxu1 }
  0xd9   : > { %v517_v31 = vadd.f32 %v1569_v25, %v1837_v27 }
  0xda   : > { %v508_v26 = vpop.f32.mrf.mxu0  ;;  %v572_v37 = vpop.f32.mrf.mxu1 }
  0xdb   : > { %v509_v29 = vadd.f32 %v1837_v27, %v508_v26  ;;  %v620_v40 = vmax.f32 %v517_v31, 0.0  ;;  %v573_v16 = vadd.f32 %v1837_v27, %v572_v37  ;;  %v581_v37 = vadd.f32 %v1842_v33, %v1837_v27 }
  0xdc   : > { %v1570_v28 = vpop.f32.mrf.mxu0  ;;  %v1845_v42 = vpop.f32.mrf.mxu1 }
  0xdd   : > { %v520_v30 = vadd.f32 %v1570_v28, %v1837_v27  ;;  %v618_v38 = vmax.f32 %v509_v29, 0.0  ;;  %v634_v24 = vmax.f32 %v573_v16, 0.0  ;;  %v1163_v16 = vld [vmem:[%s1898_s14 + $0x98] sm:$0xff] }
  0xde   : > { %v511_v32 = vpop.f32.mrf.mxu0  ;;  %v575_v46 = vpop.f32.mrf.mxu1 }
  0xdf   : > { %v512_v34 = vadd.f32 %v1837_v27, %v511_v32  ;;  %v621_v35 = vmax.f32 %v520_v30, 0.0  ;;  %v576_v17 = vadd.f32 %v1837_v27, %v575_v46 }
  0xe0   : > { %v1573_v36 = vpop.f32.mrf.mxu0  ;;  %v1852_v51 = vpop.f32.mrf.mxu1 }
  0xe1   : > { %v619_v39 = vmax.f32 %v512_v34, 0.0  ;;  %v646_v44 = vpack.c.bf16 %v621_v35, %v620_v40  ;;  %v533_v49 = vadd.f32 %v1573_v36, %v1837_v27  ;;  %v635_v26 = vmax.f32 %v576_v17, 0.0  ;;  %v1166_v17 = vld [vmem:[%s1898_s14 + $0xb0] sm:$0xff] }
  0xe2   : > { %v524_v41 = vpop.f32.mrf.mxu0  ;;  %v588_v55 = vpop.f32.mrf.mxu1 }
  0xe3   : > { %v645_v43 = vpack.c.bf16 %v619_v39, %v618_v38  ;;  %v525_v47 = vadd.f32 %v1837_v27, %v524_v41  ;;  %v624_v58 = vmax.f32 %v533_v49, 0.0  ;;  %v653_v34 = vpack.c.bf16 %v635_v26, %v634_v24 }
  0xe4   : > { %v1574_v45 = vpop.f32.mrf.mxu0  ;;  %v1590_v60 = vpop.f32.mrf.mxu1  ;;  %v589_v35 = vadd.f32 %v1837_v27, %v588_v55  ;;  %v584_v39 = vadd.f32 %v1845_v42, %v1837_v27  ;;  %v597_v42 = vadd.f32 %v1852_v51, %v1837_v27 }
  0xe5   : > { %v536_v48 = vadd.f32 %v1574_v45, %v1837_v27  ;;  %1603 = vmatprep.mubr.msk.bf16.mxu1 %vm698_vm2, %v645_v43  ;;  %v622_v56 = vmax.f32 %v525_v47, 0.0  ;;  %v636_v43 = vmax.f32 %v581_v37, 0.0  ;;  %v600_v49 = vadd.f32 %v1590_v60, %v1837_v27  ;;  %v1144_v60 = vld [vmem:[%s1898_s14] sm:$0xff] }
  0xe6   : > { %v527_v50 = vpop.f32.mrf.mxu0  ;;  %1604 = vmatmul.mubr.msk.bf16.vlgmr.msra.gmra.mxu1 %vm698_vm2, %v646_v44  ;;  %v591_v0 = vpop.f32.mrf.mxu1  ;;  %v638_v40 = vmax.f32 %v589_v35, 0.0  ;;  %v637_v44 = vmax.f32 %v584_v39, 0.0 }
  0xe7   : > { %v528_v52 = vadd.f32 %v1837_v27, %v527_v50  ;;  %v625_v53 = vmax.f32 %v536_v48, 0.0  ;;  %v592_v36 = vadd.f32 %v1837_v27, %v591_v0  ;;  %v1147_v0 = vld [vmem:[%s1898_s14 + $0x18] sm:$0xff] }
  0xe8   : > { %v1577_v54 = vpop.f32.mrf.mxu0  ;;  %v1593_v5 = vpop.f32.mrf.mxu1  ;;  %v654_v48 = vpack.c.bf16 %v637_v44, %v636_v43 }
  0xe9   : > { %v623_v57 = vmax.f32 %v528_v52, 0.0  ;;  %v648_v62 = vpack.c.bf16 %v625_v53, %v624_v58  ;;  %v549_v3 = vadd.f32 %v1577_v54, %v1837_v27  ;;  %v639_v41 = vmax.f32 %v592_v36, 0.0 }
  0xea   : > { %v540_v59 = vpop.f32.mrf.mxu0  ;;  %v604_v9 = vpop.f32.mrf.mxu1  ;;  %v640_v53 = vmax.f32 %v597_v42, 0.0  ;;  %v641_v54 = vmax.f32 %v600_v49, 0.0 }
  0xeb   : > { %v647_v61 = vpack.c.bf16 %v623_v57, %v622_v56  ;;  %v541_v1 = vadd.f32 %v1837_v27, %v540_v59  ;;  %v628_v12 = vmax.f32 %v549_v3, 0.0  ;;  %v655_v46 = vpack.c.bf16 %v639_v41, %v638_v40  ;;  %v1710_v59 = vld [vmem:[%s2042_s5] sm:$0xff]  }
  0xec   : > { %v1578_v63 = vpop.f32.mrf.mxu0  ;;  %v1594_v14 = vpop.f32.mrf.mxu1  ;;  %v605_v47 = vadd.f32 %v1837_v27, %v604_v9  ;;  %v656_v56 = vpack.c.bf16 %v641_v54, %v640_v53  ;;  %v613_v57 = vadd.f32 %v1593_v5, %v1837_v27  ;;  %1637 = vmatprep.subr.bf16.mxu0 %v1710_v59  ;;  %v1152_v3 = vld [vmem:[%s1898_s14 + $0x40] sm:$0xff]  ;;  %v1154_v5 = vld [vmem:[%s1898_s14 + $0x50] sm:$0xff] }
  0xed   : > { %v552_v2 = vadd.f32 %v1578_v63, %v1837_v27  ;;  %1607 = vmatprep.mubr.msk.bf16.mxu1 %vm698_vm2, %v647_v61  ;;  %v626_v10 = vmax.f32 %v541_v1, 0.0  ;;  %1638 = vmatpush3.bf16.msra.mxu0 %v1710_v59  ;;  %v1145_v61 = vld [vmem:[%s1898_s14 + $0x8] sm:$0xff]  ;;  %v1148_v63 = vld [vmem:[%s1898_s14 + $0x20] sm:$0xff]  ;;  %v1150_v1 = vld [vmem:[%s1898_s14 + $0x30] sm:$0xff] }
  0xee   : > { %v543_v4 = vpop.f32.mrf.mxu0  ;;  %1608 = vmatmul.mubr.msk.bf16.gmra.mxu1 %vm698_vm2, %v648_v62  ;;  %v607_v45 = vpop.f32.mrf.mxu1  ;;  %v642_v50 = vmax.f32 %v605_v47, 0.0  ;;  %v644_v51 = vmax.f32 %v613_v57, 0.0  ;;  %v1146_v62 = vld [vmem:[%s1898_s14 + $0x10] sm:$0xff]  ;;  %v1161_v14 = vld [vmem:[%s1898_s14 + $0x88] sm:$0xff] }
  0xef   : > { %v544_v6 = vadd.f32 %v1837_v27, %v543_v4  ;;  %v629_v7 = vmax.f32 %v552_v2, 0.0  ;;  %v608_v33 = vadd.f32 %v1837_v27, %v607_v45  ;;  %v1149_v2 = vld [vmem:[%s1898_s14 + $0x28] sm:$0xff]  ;;  %v1151_v4 = vld [vmem:[%s1898_s14 + $0x38] sm:$0xff]  ;;  %v1158_v9 = vld [vmem:[%s1898_s14 + $0x70] sm:$0xff] }
  0xf0   : > { %v1581_v8 = vpop.f32.mrf.mxu0  ;;  %v658_v58 = vpack.c.bf16 %v644_v51, %v644_v51 }
  0xf1   : > { %v627_v11 = vmax.f32 %v544_v6, 0.0  ;;  %v650_v18 = vpack.c.bf16 %v629_v7, %v628_v12  ;;  %v565_v22 = vadd.f32 %v1581_v8, %v1837_v27  ;;  %v643_v52 = vmax.f32 %v608_v33, 0.0  ;;  %v1153_v6 = vld [vmem:[%s1898_s14 + $0x48] sm:$0xff]  ;;  %v1156_v7 = vld [vmem:[%s1898_s14 + $0x60] sm:$0xff]  ;;  %v1155_v8 = vld [vmem:[%s1898_s14 + $0x58] sm:$0xff] }
  0xf2   : > { %v556_v13 = vpop.f32.mrf.mxu0  ;;  %v1159_v12 = vld [vmem:[%s1898_s14 + $0x78] sm:$0xff] }
  0xf3   : > { %v649_v15 = vpack.c.bf16 %v627_v11, %v626_v10  ;;  %v557_v20 = vadd.f32 %v1837_v27, %v556_v13  ;;  %v632_v31 = vmax.f32 %v565_v22, 0.0  ;;  %v657_v55 = vpack.c.bf16 %v643_v52, %v642_v50  ;;  %v1157_v10 = vld [vmem:[%s1898_s14 + $0x68] sm:$0xff]  ;;  %v1160_v11 = vld [vmem:[%s1898_s14 + $0x80] sm:$0xff]  ;;  %v1162_v13 = vld [vmem:[%s1898_s14 + $0x90] sm:$0xff] }
  0xf4   : > { %v1582_v19 = vpop.f32.mrf.mxu0  ;;  %v1169_v22 = vld [vmem:[%s1898_s14 + $0xc8] sm:$0xff] }
  0xf5   : > { %v568_v21 = vadd.f32 %v1582_v19, %v1837_v27  ;;  %1611 = vmatprep.mubr.msk.bf16.mxu1 %vm698_vm2, %v649_v15  ;;  %v630_v29 = vmax.f32 %v557_v20, 0.0  ;;  %v1164_v15 = vld [vmem:[%s1898_s14 + $0xa0] sm:$0xff]  ;;  %v1167_v20 = vld [vmem:[%s1898_s14 + $0xb8] sm:$0xff] }
  0xf6   : > { %v559_v23 = vpop.f32.mrf.mxu0  ;;  %1612 = vmatmul.mubr.msk.bf16.gmra.mxu1 %vm698_vm2, %v650_v18  ;;  %v1165_v18 = vld [vmem:[%s1898_s14 + $0xa8] sm:$0xff]  ;;  %v1168_v19 = vld [vmem:[%s1898_s14 + $0xc0] sm:$0xff] }
  0xf7   : > { %v560_v25 = vadd.f32 %v1837_v27, %v559_v23  ;;  %v633_v28 = vmax.f32 %v568_v21, 0.0  ;;  %v1719_v27 = vmov 0   ;;  %v1170_v21 = vld [vmem:[%s1898_s14 + $0xd0] sm:$0xff] }
  0xf8   : > { %1684 = vset.pattern.permute.xlu0 %v1719_v27  ;;  %1685 = vset.pattern.permute.xlu1 %v1719_v27 }
  0xf9   : > { %v631_v30 = vmax.f32 %v560_v25, 0.0  ;;  %v652_v38 = vpack.c.bf16 %v633_v28, %v632_v31  ;;  %1173 = vperm.xlu0 %1684, %v1144_v60   ;;  %1183 = vperm.xlu1 %1685, %v1146_v62   ;;  %v1930_v25 = vld [vmem:[%s2041_s4] ss:$0 sm:$0xff] }
  0xfb   : > { %v651_v32 = vpack.c.bf16 %v631_v30, %v630_v29 }
  0xfd   : > { %1615 = vmatprep.mubr.msk.bf16.mxu1 %vm698_vm2, %v651_v32  ;;  %1178 = vperm.xlu0 %1684, %v1145_v61  }
  0xfe   : > { %1616 = vmatmul.mubr.msk.bf16.gmra.mxu1 %vm698_vm2, %v652_v38  ;;  %1188 = vperm.xlu1 %1685, %v1147_v0  }
  0xff   : > { %1619 = vmatprep.mubr.msk.bf16.mxu1 %vm698_vm2, %v653_v34 }
 0x101   : > { %1193 = vperm.xlu0 %1684, %v1148_v63  }
 0x102   : > { %1198 = vperm.xlu1 %1685, %v1149_v2  }
 0x105   : > { %1203 = vperm.xlu0 %1684, %v1150_v1  }
 0x106   : > { %1620 = vmatmul.mubr.msk.bf16.gmra.mxu1 %vm698_vm2, %v654_v48  ;;  %1208 = vperm.xlu1 %1685, %v1151_v4  }
 0x107   : > { %1623 = vmatprep.mubr.msk.bf16.mxu1 %vm698_vm2, %v655_v46 }
 0x109   : > { %1213 = vperm.xlu0 %1684, %v1152_v3  }
 0x10a   : > { %1218 = vperm.xlu1 %1685, %v1153_v6  }
 0x10d   : > { %1223 = vperm.xlu0 %1684, %v1154_v5  }
 0x10e   : > { %1624 = vmatmul.mubr.msk.bf16.gmra.mxu1 %vm698_vm2, %v656_v56  ;;  %1228 = vperm.xlu1 %1685, %v1155_v8  }
 0x10f   : > { %1627 = vmatprep.mubr.msk.bf16.mxu1 %vm698_vm2, %v657_v55 }
 0x111   : > { %1233 = vperm.xlu0 %1684, %v1156_v7  }
 0x112   : > { %1238 = vperm.xlu1 %1685, %v1157_v10  }
 0x115   : > { %1243 = vperm.xlu0 %1684, %v1158_v9  }
 0x116   : > { %1628 = vmatmul.mubr.msk.bf16.gmra.mxu1 %vm698_vm2, %v658_v58  ;;  %1248 = vperm.xlu1 %1685, %v1159_v12  }
 0x119   : > { %1253 = vperm.xlu0 %1684, %v1160_v11  }
 0x11a   : > { %1258 = vperm.xlu1 %1685, %v1161_v14  }
 0x11d   : > { %1263 = vperm.xlu0 %1684, %v1162_v13  }
 0x11e   : > { %1268 = vperm.xlu1 %1685, %v1163_v16  }
 0x121   : > { %1273 = vperm.xlu0 %1684, %v1164_v15  }
 0x122   : > { %1278 = vperm.xlu1 %1685, %v1165_v18  }
 0x125   : > { %1283 = vperm.xlu0 %1684, %v1166_v17  }
 0x126   : > { %1288 = vperm.xlu1 %1685, %v1167_v20  }
 0x129   : > { %1293 = vperm.xlu0 %1684, %v1168_v19  }
 0x12a   : > { %1298 = vperm.xlu1 %1685, %v1169_v22  }
 0x12d   : > { %1303 = vperm.xlu0 %1684, %v1170_v21  }
 0x1a6   : > { %v1605_v23 = vpop.f32.mrf.mxu1 }
 0x1a7   : > { %v784_v30 = vadd.f32 %v1605_v23, %v1930_v25 }
 0x1a8   : > { %v775_v24 = vpop.f32.mrf.mxu1 }
 0x1a9   : > { %v776_v28 = vadd.f32 %v1930_v25, %v775_v24  ;;  %v887_v38 = vmax.f32 %v784_v30, 0.0 }
 0x1aa   : > { %v1606_v26 = vpop.f32.mrf.mxu1 }
 0x1ab   : > { %v787_v29 = vadd.f32 %v1606_v26, %v1930_v25  ;;  %v885_v36 = vmax.f32 %v776_v28, 0.0 }
 0x1ac   : > { %v778_v31 = vpop.f32.mrf.mxu1 }
 0x1ad   : > { %v779_v32 = vadd.f32 %v1930_v25, %v778_v31  ;;  %v888_v34 = vmax.f32 %v787_v29, 0.0 }
 0x1ae   : > { %v1609_v35 = vpop.f32.mrf.mxu1 }
 0x1af   : > { %v886_v37 = vmax.f32 %v779_v32, 0.0  ;;  %v913_v41 = vpack.c.bf16 %v888_v34, %v887_v38  ;;  %v800_v46 = vadd.f32 %v1609_v35, %v1930_v25 }
 0x1b0   : > { %v791_v39 = vpop.f32.mrf.mxu1 }
 0x1b1   : > { %v912_v40 = vpack.c.bf16 %v886_v37, %v885_v36  ;;  %v792_v44 = vadd.f32 %v1930_v25, %v791_v39  ;;  %v891_v52 = vmax.f32 %v800_v46, 0.0 }
 0x1b2   : > { %v1610_v43 = vpop.f32.mrf.mxu1 }
 0x1b3   : > { %v803_v45 = vadd.f32 %v1610_v43, %v1930_v25  ;;  %1639 = vmatprep.mubr.msk.bf16.mxu0 %vm698_vm2, %v912_v40  ;;  %v889_v49 = vmax.f32 %v792_v44, 0.0 }
 0x1b4   : > { %v794_v47 = vpop.f32.mrf.mxu1  ;;  %1640 = vmatmul.mubr.msk.bf16.vlgmr.msra.gmra.mxu0 %vm698_vm2, %v913_v41 }
 0x1b5   : > { %v795_v33 = vadd.f32 %v1930_v25, %v794_v47  ;;  %v892_v48 = vmax.f32 %v803_v45, 0.0 }
 0x1b6   : > { %v1613_v42 = vpop.f32.mrf.mxu1 }
 0x1b7   : > { %v890_v50 = vmax.f32 %v795_v33, 0.0  ;;  %v915_v55 = vpack.c.bf16 %v892_v48, %v891_v52  ;;  %v816_v58 = vadd.f32 %v1613_v42, %v1930_v25 }
 0x1b8   : > { %v807_v53 = vpop.f32.mrf.mxu1 }
 0x1b9   : > { %v914_v54 = vpack.c.bf16 %v890_v50, %v889_v49  ;;  %v808_v57 = vadd.f32 %v1930_v25, %v807_v53  ;;  %v895_v0 = vmax.f32 %v816_v58, 0.0  ;;  %v1174_v58 = vpop.permute.xlu0 %1173 }
 0x1ba   : > { %v1614_v56 = vpop.f32.mrf.mxu1 }
 0x1bb   : > { %v819_v51 = vadd.f32 %v1614_v56, %v1930_v25  ;;  %1643 = vmatprep.mubr.msk.bf16.mxu0 %vm698_vm2, %v914_v54  ;;  %v893_v62 = vmax.f32 %v808_v57, 0.0 }
 0x1bc   : > { %v810_v59 = vpop.f32.mrf.mxu1  ;;  %1644 = vmatmul.mubr.msk.bf16.gmra.mxu0 %vm698_vm2, %v915_v55 }
 0x1bd   : > { %v811_v27 = vadd.f32 %v1930_v25, %v810_v59  ;;  %v896_v60 = vmax.f32 %v819_v51, 0.0  ;;  %v1179_v59 = vpop.permute.xlu0 %1178 }
 0x1be   : > { %v1617_v61 = vpop.f32.mrf.mxu1 }
 0x1bf   : > { %v894_v63 = vmax.f32 %v811_v27, 0.0  ;;  %v917_v3 = vpack.c.bf16 %v896_v60, %v895_v0  ;;  %v832_v7 = vadd.f32 %v1617_v61, %v1930_v25  ;;  %v1184_v27 = vpop.permute.xlu1 %1183 }
 0x1c0   : > { %v823_v1 = vpop.f32.mrf.mxu1 }
 0x1c1   : > { %v916_v2 = vpack.c.bf16 %v894_v63, %v893_v62  ;;  %v824_v5 = vadd.f32 %v1930_v25, %v823_v1  ;;  %v899_v14 = vmax.f32 %v832_v7, 0.0  ;;  %v1194_v60 = vpop.permute.xlu0 %1193 }
 0x1c2   : > { %v1618_v4 = vpop.f32.mrf.mxu1 }
 0x1c3   : > { %v835_v6 = vadd.f32 %v1618_v4, %v1930_v25  ;;  %1647 = vmatprep.mubr.msk.bf16.mxu0 %vm698_vm2, %v916_v2  ;;  %v897_v12 = vmax.f32 %v824_v5, 0.0  ;;  %v1189_v61 = vpop.permute.xlu1 %1188 }
 0x1c4   : > { %v826_v8 = vpop.f32.mrf.mxu1  ;;  %1648 = vmatmul.mubr.msk.bf16.gmra.mxu0 %vm698_vm2, %v917_v3 }
 0x1c5   : > { %v827_v9 = vadd.f32 %v1930_v25, %v826_v8  ;;  %v900_v10 = vmax.f32 %v835_v6, 0.0  ;;  %v1204_v62 = vpop.permute.xlu0 %1203 }
 0x1c6   : > { %v1621_v11 = vpop.f32.mrf.mxu1 }
 0x1c7   : > { %v898_v13 = vmax.f32 %v827_v9, 0.0  ;;  %v919_v17 = vpack.c.bf16 %v900_v10, %v899_v14  ;;  %v848_v21 = vadd.f32 %v1621_v11, %v1930_v25  ;;  %v1199_v63 = vpop.permute.xlu1 %1198 }
 0x1c8   : > { %v839_v15 = vpop.f32.mrf.mxu1 }
 0x1c9   : > { %v918_v16 = vpack.c.bf16 %v898_v13, %v897_v12  ;;  %v840_v19 = vadd.f32 %v1930_v25, %v839_v15  ;;  %v903_v30 = vmax.f32 %v848_v21, 0.0  ;;  %v1214_v0 = vpop.permute.xlu0 %1213 }
 0x1ca   : > { %v1622_v18 = vpop.f32.mrf.mxu1 }
 0x1cb   : > { %v851_v20 = vadd.f32 %v1622_v18, %v1930_v25  ;;  %1651 = vmatprep.mubr.msk.bf16.mxu0 %vm698_vm2, %v918_v16  ;;  %v901_v28 = vmax.f32 %v840_v19, 0.0  ;;  %v1209_v1 = vpop.permute.xlu1 %1208 }
 0x1cc   : > { %v842_v22 = vpop.f32.mrf.mxu1  ;;  %1652 = vmatmul.mubr.msk.bf16.gmra.mxu0 %vm698_vm2, %v919_v17 }
 0x1cd   : > { %v843_v23 = vadd.f32 %v1930_v25, %v842_v22  ;;  %v904_v24 = vmax.f32 %v851_v20, 0.0 }
 0x1ce   : > { %v1625_v26 = vpop.f32.mrf.mxu1 }
 0x1cf   : > { %v902_v29 = vmax.f32 %v843_v23, 0.0  ;;  %v921_v34 = vpack.c.bf16 %v904_v24, %v903_v30  ;;  %v864_v38 = vadd.f32 %v1625_v26, %v1930_v25  ;;  %v1219_v4 = vpop.permute.xlu1 %1218 }
 0x1d0   : > { %v855_v31 = vpop.f32.mrf.mxu1 }
 0x1d1   : > { %v920_v32 = vpack.c.bf16 %v902_v29, %v901_v28  ;;  %v856_v36 = vadd.f32 %v1930_v25, %v855_v31  ;;  %v907_v46 = vmax.f32 %v864_v38, 0.0 }
 0x1d2   : > { %v1626_v35 = vpop.f32.mrf.mxu1 }
 0x1d3   : > { %v867_v37 = vadd.f32 %v1626_v35, %v1930_v25  ;;  %1655 = vmatprep.mubr.msk.bf16.mxu0 %vm698_vm2, %v920_v32  ;;  %v905_v44 = vmax.f32 %v856_v36, 0.0  ;;  %v1229_v12 = vpop.permute.xlu1 %1228 }
 0x1d4   : > { %v858_v39 = vpop.f32.mrf.mxu1  ;;  %1656 = vmatmul.mubr.msk.bf16.gmra.mxu0 %vm698_vm2, %v921_v34 }
 0x1d5   : > { %v859_v40 = vadd.f32 %v1930_v25, %v858_v39  ;;  %v908_v41 = vmax.f32 %v867_v37, 0.0 }
 0x1d6   : > { %v1629_v43 = vpop.f32.mrf.mxu1 }
 0x1d7   : > { %v906_v45 = vmax.f32 %v859_v40, 0.0  ;;  %v923_v48 = vpack.c.bf16 %v908_v41, %v907_v46  ;;  %v880_v42 = vadd.f32 %v1629_v43, %v1930_v25  ;;  %v1239_v20 = vpop.permute.xlu1 %1238 }
 0x1d8   : > { %v871_v47 = vpop.f32.mrf.mxu1 }
 0x1d9   : > { %v922_v33 = vpack.c.bf16 %v906_v45, %v905_v44  ;;  %v872_v50 = vadd.f32 %v1930_v25, %v871_v47  ;;  %v911_v54 = vmax.f32 %v880_v42, 0.0 }
 0x1da   : > { %v1630_v49 = vpop.f32.mrf.mxu1 }
 0x1db   : > { %1659 = vmatprep.mubr.msk.bf16.mxu0 %vm698_vm2, %v922_v33  ;;  %v909_v55 = vmax.f32 %v872_v50, 0.0  ;;  %v925_v51 = vpack.c.bf16 %v911_v54, %v911_v54  ;;  %v1249_v30 = vpop.permute.xlu1 %1248 }
 0x1dc   : > { %v874_v52 = vpop.f32.mrf.mxu1  ;;  %1660 = vmatmul.mubr.msk.bf16.gmra.mxu0 %vm698_vm2, %v923_v48 }
 0x1dd   : > { %v875_v53 = vadd.f32 %v1930_v25, %v874_v52  ;;  %v1224_v25 = vpop.permute.xlu0 %1223 }
 0x1df   : > { %v910_v56 = vmax.f32 %v875_v53, 0.0  ;;  %v1259_v39 = vpop.permute.xlu1 %1258 }
 0x1e1   : > { %v924_v57 = vpack.c.bf16 %v910_v56, %v909_v55  ;;  %v1234_v9 = vpop.permute.xlu0 %1233 }
 0x1e3   : > { %1663 = vmatprep.mubr.msk.bf16.mxu0 %vm698_vm2, %v924_v57  ;;  %v1269_v33 = vpop.permute.xlu1 %1268 }
 0x1e4   : > { %1664 = vmatmul.mubr.msk.bf16.gmra.mxu0 %vm698_vm2, %v925_v51 }
 0x1e5   : > { %v1244_v17 = vpop.permute.xlu0 %1243 }
 0x1e7   : > { %v1279_v55 = vpop.permute.xlu1 %1278 }
 0x1e9   : > { %v1254_v26 = vpop.permute.xlu0 %1253 }
 0x1ed   : > { %v1264_v36 = vpop.permute.xlu0 %1263 }
 0x1f1   : > { %v1274_v45 = vpop.permute.xlu0 %1273 }
 0x1f5   : > { %v1284_v52 = vpop.permute.xlu0 %1283 }
 0x274   : > { %v1641_v2 = vpop.f32.mrf.mxu0 }
 0x275   : > { %v1308_v3 = vmul.f32 %v1641_v2, %v1184_v27 }
 0x276   : > { %v1034_v5 = vpop.f32.mrf.mxu0 }
 0x277   : > { %1336 = vst.msk [vmem:[%s1978_s19 + $0x10] sm:$0xff] %vm1333_vm3, %v1308_v3  ;;  %v1306_v6 = vmul.f32 %v1174_v58, %v1034_v5 }
 0x278   : > { %v1642_v7 = vpop.f32.mrf.mxu0 }
 0x279   : > { %1334 = vst.msk [vmem:[%s1978_s19] sm:$0xff] %vm1333_vm3, %v1306_v6  ;;  %v1309_v8 = vmul.f32 %v1642_v7, %v1189_v61  ;;  %v1289_v61 = vpop.permute.xlu1 %1288 }
 0x27a   : > { %v1037_v10 = vpop.f32.mrf.mxu0 }
 0x27b   : > { %1337 = vst.msk [vmem:[%s1978_s19 + $0x18] sm:$0xff] %vm1333_vm3, %v1309_v8  ;;  %v1307_v11 = vmul.f32 %v1179_v59, %v1037_v10  ;;  %v1294_v59 = vpop.permute.xlu0 %1293 }
 0x27c   : > { %v1645_v13 = vpop.f32.mrf.mxu0 }
 0x27d   : > { %1335 = vst.msk [vmem:[%s1978_s19 + $0x8] sm:$0xff] %vm1333_vm3, %v1307_v11  ;;  %v1312_v14 = vmul.f32 %v1645_v13, %v1204_v62  ;;  %v1299_v7 = vpop.permute.xlu1 %1298 }
 0x27e   : > { %v1050_v15 = vpop.f32.mrf.mxu0 }
 0x27f   : > { %1340 = vst.msk [vmem:[%s1978_s19 + $0x30] sm:$0xff] %vm1333_vm3, %v1312_v14  ;;  %v1310_v16 = vmul.f32 %v1194_v60, %v1050_v15 }
 0x280   : > { %v1646_v18 = vpop.f32.mrf.mxu0 }
 0x281   : > { %1338 = vst.msk [vmem:[%s1978_s19 + $0x20] sm:$0xff] %vm1333_vm3, %v1310_v16  ;;  %v1313_v19 = vmul.f32 %v1646_v18, %v1209_v1 }
 0x282   : > { %v1053_v21 = vpop.f32.mrf.mxu0 }
 0x283   : > { %1341 = vst.msk [vmem:[%s1978_s19 + $0x38] sm:$0xff] %vm1333_vm3, %v1313_v19  ;;  %v1311_v22 = vmul.f32 %v1199_v63, %v1053_v21 }
 0x284   : > { %v1649_v23 = vpop.f32.mrf.mxu0 }
 0x285   : > { %1339 = vst.msk [vmem:[%s1978_s19 + $0x28] sm:$0xff] %vm1333_vm3, %v1311_v22  ;;  %v1316_v24 = vmul.f32 %v1649_v23, %v1224_v25  ;;  %v1304_v25 = vpop.permute.xlu0 %1303 }
 0x286   : > { %v1066_v28 = vpop.f32.mrf.mxu0 }
 0x287   : > { %1344 = vst.msk [vmem:[%s1978_s19 + $0x50] sm:$0xff] %vm1333_vm3, %v1316_v24  ;;  %v1314_v29 = vmul.f32 %v1214_v0, %v1066_v28 }
 0x288   : > { %v1650_v31 = vpop.f32.mrf.mxu0 }
 0x289   : > { %1342 = vst.msk [vmem:[%s1978_s19 + $0x40] sm:$0xff] %vm1333_vm3, %v1314_v29  ;;  %v1317_v32 = vmul.f32 %v1650_v31, %v1229_v12 }
 0x28a   : > { %v1069_v34 = vpop.f32.mrf.mxu0 }
 0x28b   : > { %1345 = vst.msk [vmem:[%s1978_s19 + $0x58] sm:$0xff] %vm1333_vm3, %v1317_v32  ;;  %v1315_v35 = vmul.f32 %v1219_v4, %v1069_v34 }
 0x28c   : > { %v1653_v37 = vpop.f32.mrf.mxu0 }
 0x28d   : > { %1343 = vst.msk [vmem:[%s1978_s19 + $0x48] sm:$0xff] %vm1333_vm3, %v1315_v35  ;;  %v1320_v38 = vmul.f32 %v1653_v37, %v1244_v17 }
 0x28e   : > { %v1082_v40 = vpop.f32.mrf.mxu0 }
 0x28f   : > { %1348 = vst.msk [vmem:[%s1978_s19 + $0x70] sm:$0xff] %vm1333_vm3, %v1320_v38  ;;  %v1318_v41 = vmul.f32 %v1234_v9, %v1082_v40 }
 0x290   : > { %v1654_v43 = vpop.f32.mrf.mxu0 }
 0x291   : > { %1346 = vst.msk [vmem:[%s1978_s19 + $0x60] sm:$0xff] %vm1333_vm3, %v1318_v41  ;;  %v1321_v44 = vmul.f32 %v1654_v43, %v1249_v30 }
 0x292   : > { %v1085_v46 = vpop.f32.mrf.mxu0 }
 0x293   : > { %1349 = vst.msk [vmem:[%s1978_s19 + $0x78] sm:$0xff] %vm1333_vm3, %v1321_v44  ;;  %v1319_v47 = vmul.f32 %v1239_v20, %v1085_v46 }
 0x294   : > { %v1657_v48 = vpop.f32.mrf.mxu0 }
 0x295   : > { %1347 = vst.msk [vmem:[%s1978_s19 + $0x68] sm:$0xff] %vm1333_vm3, %v1319_v47  ;;  %v1324_v42 = vmul.f32 %v1657_v48, %v1264_v36 }
 0x296   : > { %v1098_v49 = vpop.f32.mrf.mxu0 }
 0x297   : > { %1352 = vst.msk [vmem:[%s1978_s19 + $0x90] sm:$0xff] %vm1333_vm3, %v1324_v42  ;;  %v1322_v50 = vmul.f32 %v1254_v26, %v1098_v49 }
 0x298   : > { %v1658_v53 = vpop.f32.mrf.mxu0 }
 0x299   : > { %1350 = vst.msk [vmem:[%s1978_s19 + $0x80] sm:$0xff] %vm1333_vm3, %v1322_v50  ;;  %v1325_v54 = vmul.f32 %v1658_v53, %v1269_v33 }
 0x29a   : > { %v1101_v56 = vpop.f32.mrf.mxu0 }
 0x29b   : > { %1353 = vst.msk [vmem:[%s1978_s19 + $0x98] sm:$0xff] %vm1333_vm3, %v1325_v54  ;;  %v1323_v57 = vmul.f32 %v1259_v39, %v1101_v56 }
 0x29c   : > { %v1661_v51 = vpop.f32.mrf.mxu0 }
 0x29d   : > { %1351 = vst.msk [vmem:[%s1978_s19 + $0x88] sm:$0xff] %vm1333_vm3, %v1323_v57  ;;  %v1328_v58 = vmul.f32 %v1661_v51, %v1284_v52 }
 0x29e   : > { %v1114_v27 = vpop.f32.mrf.mxu0 }
 0x29f   : > { %1356 = vst.msk [vmem:[%s1978_s19 + $0xb0] sm:$0xff] %vm1333_vm3, %v1328_v58  ;;  %v1326_v60 = vmul.f32 %v1274_v45, %v1114_v27 }
 0x2a0   : > { %v1662_v62 = vpop.f32.mrf.mxu0 }
 0x2a1   : > { %1354 = vst.msk [vmem:[%s1978_s19 + $0xa0] sm:$0xff] %vm1333_vm3, %v1326_v60  ;;  %v1329_v63 = vmul.f32 %v1662_v62, %v1289_v61 }
 0x2a2   : > { %v1117_v0 = vpop.f32.mrf.mxu0 }
 0x2a3   : > { %1357 = vst.msk [vmem:[%s1978_s19 + $0xb8] sm:$0xff] %vm1333_vm3, %v1329_v63  ;;  %v1327_v1 = vmul.f32 %v1279_v55, %v1117_v0 }
 0x2a4   : > { %v1665_v2 = vpop.f32.mrf.mxu0 }
 0x2a5   : > { %1355 = vst.msk [vmem:[%s1978_s19 + $0xa8] sm:$0xff] %vm1333_vm3, %v1327_v1  ;;  %v1332_v3 = vmul.f32 %v1665_v2, %v1304_v25 }
 0x2a6   : > { %v1130_v4 = vpop.f32.mrf.mxu0 }
 0x2a7   : > { %1360 = vst.msk [vmem:[%s1978_s19 + $0xd0] sm:$0xff] %vm1333_vm3, %v1332_v3  ;;  %v1330_v5 = vmul.f32 %v1294_v59, %v1130_v4 }
 0x2a8   : > { %v1666_v6 = vpop.f32.mrf.mxu0 }
 0x2a9   : > { %1358 = vst.msk [vmem:[%s1978_s19 + $0xc0] sm:$0xff] %vm1333_vm3, %v1330_v5 }
 0x2aa   : > { %v1133_v8 = vpop.f32.mrf.mxu0 }
 0x2ab   : > { %v1331_v9 = vmul.f32 %v1299_v7, %v1133_v8 }
 0x2ad   : > { %1359 = vst.msk [vmem:[%s1978_s19 + $0xc8] sm:$0xff] %vm1333_vm3, %v1331_v9 }
 0x2ae PF: > { %s17_s24 = sadd.s32 1, %s1717_s24  }
 0x2af   : > { %p14_p4 = scmp.ge.s32.totalorder %s17_s24, 6  }
 0x2b1   :  { %16 = sbr.rel (!%p14_p4) target bundleno = 1 (0x1), region = 81 }

// kernel: glow_affine_coupling_forward.3
= control target key start
LH: loop header
LB: loop body
LE: loop exit
PB: predicated region body
PF: predicated region fallthrough
CT: control target
= control target key end

     0   :  { %12 = vsyncpa [#allocation3], 0  ;;  %s2723_s24 = smov 0   ;;  %s5134_s0 = inlined_call_operand.vmem [shape: f32[864,72], index: 0, kind: input, shape index: {}, may-alias: {0,1,2}]   ;;  %s5135_s1 = inlined_call_operand.vmem [shape: f32[864,72], index: 1, kind: input, shape index: {}, may-alias: {0,1,2}]   ;;  %s5136_s2 = inlined_call_operand.vmem [shape: f32[864,72], index: 2, kind: input, shape index: {}, may-alias: {0,1,2}]   ;;  %s5137_s3 = inlined_call_operand.vmem [shape: f32[864,4], index: 3, kind: input, shape index: {}]   ;;  %s5138_s4 = inlined_call_operand.vmem [shape: f32[1,8], index: 4, kind: input, shape index: {}]   ;;  %s5139_s5 = inlined_call_operand.vmem [shape: f32[1,4], index: 5, kind: input, shape index: {}]   ;;  %s5140_s6 = inlined_call_operand.vmem [shape: f32[2], index: 6, kind: input, shape index: {}]   ;;  %s5141_s7 = inlined_call_operand.vmem [shape: f32[864,8], index: 7, kind: output, shape index: {}]  }
   0x1 LB: > { %s2729_s25 = sadd.s32 4294967295, %s2670_s24   ;;  %p2460_p0 = scmp.ge.s32.totalorder %s2670_s24, 1  ;;  %s2670_s24 = sphi %s2723_s24, %s18_s24  }
   0x2   : > { %p228_p1 = scmp.lt.s32.totalorder %s2670_s24, 5  ;;  %s247_s28 = sshll.u32 %s5140_s6, 4  ;;  %s248_s28 = int_to_ptr.vmem [resolvable:$true] %s247_s28 }
   0x3   : > { %p2484_p3 = scmp.eq.s32.totalorder %s2729_s25, 0  ;;  %s2645_s30 = scalar_lea.vmem %s248_s28, 16 }
   0x4   : > { %p2736_p2 = pnand %p2460_p0, %p228_p1  ;;  %p2646_p6 = scmp.ne.s32.totalorder %s248_s28, %s2645_s30 }
   0x5   : > { %p2653_p10 = scmp.lt.s32.totalorder %s248_s28, %s248_s28  ;;  %p2654_p11 = scmp.lt.s32.totalorder %s2645_s30, %s2645_s30 }
   0x6   : > { %p2480_p4 = pneg %p2736_p2 }
   0x7   : > { %p2655_p12 = por %p2654_p11, %p2653_p10 }
   0x8   : > { %p2481_p5 = pnand %p2484_p3, %p2480_p4 }
   0xa   : > { %p2647_p7 = pneg %p2481_p5 }
   0xc   : > { %p2648_p8 = pnand %p2647_p7, %p2646_p6 }
   0xe   : > { %p2649_p9 = pneg %p2648_p8 }
  0x10   : > { %p2656_p13 = pnand %p2655_p12, %p2649_p9 }
  0x12   : > { %2659 = shalt.err (!%p2656_p13)
}
  0x13   : > { %s2672_s8 = smov [#allocation2]   ;;  %308 = sbr.rel (%p2736_p2) target bundleno = 830 (0x33e), region = 48 }
  0x14   : > { %2483 = dma.vmem_to_smem (!%p2481_p5), %s248_s28, 16, %s2672_s8, [#allocation3]  }
  0x18   : > { %2665 = dma.done.wait (%p2484_p3), [#allocation3], 16  }
  0x19   : > { %2667 = vsyncadd (%p2484_p3), [#allocation3], 4294967280 }
  0x1a   : > { %314 = sfence }
  0x1b   : > { %s374_s9 = smul.u32 27, %s2729_s25  ;;  %s2465_s10 = sadd.s32 4294967295, %s2729_s25  ;;  %vm494_vm0 = vcmask 1046528   ;;  %vm661_vm1 = vcmask 1045504   ;;  %vm1831_vm2 = vcmask 1040384   ;;  %vm2296_vm3 = vcmask 31744  }
  0x1c   : > { %p363_p1 = scmp.gt.s32.totalorder %s2465_s10, 0  ;;  %s2673_s16 = smov 120   ;;  %vm2324_vm4 = vcmask 64512  }
  0x1d   : > { %p375_p0 = scmp.lt.s32.totalorder %s374_s9, 107  ;;  %s2674_s21 = smov 112  }
  0x1e   : > { %s5623_s10 = smov (!%p363_p1, %s2465_s10), 0  ;;  %s2675_s22 = smov 104  }
  0x1f   : > { %s5621_s9 = smov (!%p375_p0, %s374_s9), 107  ;;  %s365_s15 = smul.u32 27, %s5623_s10 }
  0x20   : > { %s2753_s11 = sshll.u32 %s5621_s9, 3  ;;  %s2676_s23 = smov 96  }
  0x21   : > { %s2759_s14 = scalar_lea.vmem %s5135_s1, %s2753_s11  ;;  %p366_p2 = scmp.lt.s32.totalorder %s365_s15, 107 }
  0x22   : > { %v2762_v0 = vld [vmem:[%s2759_s14 + $0x8] sm:$0xff]  ;;  %v2765_v1 = vld [vmem:[%s2759_s14 + $0x10] sm:$0xff]  ;;  %v2768_v2 = vld [vmem:[%s2759_s14] sm:$0xff]  ;;  %s2677_s26 = smov 88   ;;  %s380_s27 = sadd.s32 1, %s2729_s25 }
  0x23   : > { %v502_v3 = vrot.slane %v2762_v0, 1  ;;  %v504_v4 = vrot.slane %v2765_v1, 1  ;;  %v2773_v5 = vrot.slane %v2768_v2, 1  ;;  %v2776_v6 = vld [vmem:[%s2759_s14 + $0x18] sm:$0xff]  ;;  %v2779_v7 = vld [vmem:[%s2759_s14 + $0x20] sm:$0xff]  ;;  %v2786_v10 = vld [vmem:[%s2759_s14 + $0x28] sm:$0xff]  ;;  %s4975_s29 = scalar_lea.vmem %s5141_s7, %s2753_s11 }
  0x24   : > { %v2782_v8 = vrot.slane %v2776_v6, 1  ;;  %v508_v9 = vrot.slane %v2779_v7, 1  ;;  %v2789_v11 = vld [vmem:[%s2759_s14 + $0x30] sm:$0xff]  ;;  %s5625_s15 = smov (!%p366_p2, %s365_s15), 107  ;;  %v510_v16 = vrot.slane %v2786_v10, 1  ;;  %v2845_v27 = vld [vmem:[%s2759_s14 + $0x38] sm:$0xff] }
  0x25   : > { %v2792_v12 = vsel %vm494_vm0, %v502_v3, %v504_v4  ;;  %v2796_v13 = vsel %vm494_vm0, %v2773_v5, %v502_v3  ;;  %v512_v17 = vrot.slane %v2789_v11, 1  ;;  %s2466_s17 = sshll.u32 %s5625_s15, 3  ;;  %v2848_v28 = vld [vmem:[%s2759_s14 + $0x40] sm:$0xff]  ;;  %v514_v31 = vrot.slane %v2845_v27, 1  ;;  %v2858_v33 = vld [vmem:[%s2759_s14 + $0x48] sm:$0xff]  ;;  %v2861_v34 = vld [vmem:[%s2759_s14 + $0x50] sm:$0xff] }
  0x26   : > { %5187 = vst [vmem:[#allocation5_spill] sm:$0xff] %v2782_v8  ;;  %558 = vrot.lane.b32.xlu1 %v2792_v12, %s2673_s16  ;;  %556 = vrot.lane.b32.xlu0 %v2796_v13, %s2673_s16  ;;  %v2804_v14 = vsel %vm494_vm0, %v2782_v8, %v508_v9  ;;  %v2808_v15 = vsel %vm494_vm0, %v504_v4, %v2782_v8  ;;  %s2815_s20 = scalar_lea.vmem %s5134_s0, %s2466_s17  ;;  %v516_v32 = vrot.slane %v2848_v28, 1  ;;  %v518_v37 = vrot.slane %v2858_v33, 1  ;;  %v2874_v39 = vld [vmem:[%s2759_s14 + $0x58] sm:$0xff]  ;;  %v2877_v40 = vld [vmem:[%s2759_s14 + $0x60] sm:$0xff]  ;;  %p381_p3 = scmp.lt.s32.totalorder %s380_s27, 3 }
  0x27   : > { %v2822_v18 = vld [vmem:[%s2815_s20 + $0xc8] sm:$0xff]  ;;  %v2825_v19 = vld [vmem:[%s2815_s20 + $0xd0] sm:$0xff]  ;;  %v2828_v20 = vsel %vm494_vm0, %v510_v16, %v512_v17  ;;  %v2831_v21 = vsel %vm494_vm0, %v508_v9, %v510_v16  ;;  %v2836_v24 = vld [vmem:[%s2815_s20 + $0xc0] sm:$0xff]  ;;  %v2869_v36 = vsel %vm494_vm0, %v512_v17, %v514_v31  ;;  %v520_v38 = vrot.slane %v2861_v34, 1  ;;  %s2678_s9 = smov 80   ;;  %s2679_s10 = smov 72  }
  0x28   : > { %v496_v22 = vrot.slane %v2822_v18, 1  ;;  %v498_v23 = vrot.slane %v2825_v19, 1  ;;  %v495_v25 = vrot.slane %v2836_v24, 1  ;;  %v2866_v35 = vsel %vm494_vm0, %v514_v31, %v516_v32  ;;  %v2892_v45 = vld [vmem:[%s2759_s14 + $0x68] sm:$0xff]  ;;  %v2895_v46 = vld [vmem:[%s2759_s14 + $0x70] sm:$0xff]  ;;  %v2910_v51 = vld [vmem:[%s2759_s14 + $0x78] sm:$0xff] }
  0x29   : > { %v2884_v41 = vsel %vm494_vm0, %v518_v37, %v520_v38  ;;  %v2887_v42 = vsel %vm494_vm0, %v516_v32, %v518_v37  ;;  %v522_v43 = vrot.slane %v2874_v39, 1  ;;  %v524_v44 = vrot.slane %v2877_v40, 1  ;;  %v2913_v52 = vld [vmem:[%s2759_s14 + $0x80] sm:$0xff]  ;;  %v2928_v57 = vld [vmem:[%s2759_s14 + $0x88] sm:$0xff]  ;;  %v2931_v58 = vld [vmem:[%s2759_s14 + $0x90] sm:$0xff]  ;;  %s5627_s27 = smov (!%p381_p3, %s380_s27), 3 }
  0x2a   : > { %562 = vrot.lane.b32.xlu1 %v2804_v14, %s2673_s16  ;;  %560 = vrot.lane.b32.xlu0 %v2808_v15, %s2673_s16  ;;  %v499_v26 = vsel %vm494_vm0, %v496_v22, %v498_v23  ;;  %v501_v29 = vsel %vm494_vm0, %v498_v23, %v2773_v5  ;;  %v497_v30 = vsel %vm494_vm0, %v495_v25, %v496_v22  ;;  %v526_v49 = vrot.slane %v2892_v45, 1  ;;  %v2946_v63 = vld [vmem:[%s2759_s14 + $0x98] sm:$0xff]  ;;  %v2949_v3 = vld [vmem:[%s2759_s14 + $0xa0] sm:$0xff]  ;;  %s383_s25 = smul.u32 27, %s5627_s27  ;;  %s2680_s12 = smov 64  }
  0x2b   : > { %v2902_v47 = vsel %vm494_vm0, %v522_v43, %v524_v44  ;;  %v2905_v48 = vsel %vm494_vm0, %v520_v38, %v522_v43  ;;  %v528_v50 = vrot.slane %v2895_v46, 1  ;;  %v530_v55 = vrot.slane %v2910_v51, 1  ;;  %v2964_v22 = vld [vmem:[%s2759_s14 + $0xa8] sm:$0xff]  ;;  %v2967_v23 = vld [vmem:[%s2759_s14 + $0xb0] sm:$0xff]  ;;  %v2982_v31 = vld [vmem:[%s2759_s14 + $0xb8] sm:$0xff]  ;;  %s4193_s18 = sld [smem:[#allocation2]]  ;;  %s4957_s27 = scalar_lea.vmem %s5137_s3, %s2753_s11 }
  0x2c   : > { %v2923_v54 = vsel %vm494_vm0, %v524_v44, %v526_v49  ;;  %v532_v56 = vrot.slane %v2913_v52, 1  ;;  %v534_v61 = vrot.slane %v2928_v57, 1  ;;  %v536_v62 = vrot.slane %v2931_v58, 1  ;;  %p384_p4 = scmp.lt.s32.totalorder %s383_s25, 107  ;;  %s4200_s19 = sld [smem:[#allocation2 + $0x1]] }
  0x2d   : > { %v2920_v53 = vsel %vm494_vm0, %v526_v49, %v528_v50  ;;  %v2941_v60 = vsel %vm494_vm0, %v528_v50, %v530_v55  ;;  %v538_v16 = vrot.slane %v2946_v63, 1  ;;  %v540_v17 = vrot.slane %v2949_v3, 1 }
  0x2e   : > { %566 = vrot.lane.b32.xlu1 %v2828_v20, %s2673_s16  ;;  %564 = vrot.lane.b32.xlu0 %v2831_v21, %s2673_s16  ;;  %v2938_v59 = vsel %vm494_vm0, %v530_v55, %v532_v56  ;;  %v2956_v4 = vsel %vm494_vm0, %v534_v61, %v536_v62  ;;  %v2959_v9 = vsel %vm494_vm0, %v532_v56, %v534_v61  ;;  %v2995_v38 = vrot.slane %v2982_v31, 1  ;;  %s5629_s25 = smov (!%p384_p4, %s383_s25), 107 }
  0x2f   : > { %v662_v44 = vrot.slane %v2836_v24, 2  ;;  %v663_v49 = vrot.slane %v2822_v18, 2  ;;  %v665_v55 = vrot.slane %v2825_v19, 2  ;;  %v3014_v56 = vrot.slane %v2768_v2, 2  ;;  %s2468_s28 = sshll.u32 %s5629_s25, 3 }
  0x30   : > { %v669_v61 = vrot.slane %v2762_v0, 2  ;;  %s3507_s8 = scalar_lea.vmem %s5136_s2, %s2468_s28 }
  0x31   : > { %v664_v50 = vsel %vm661_vm1, %v662_v44, %v663_v49  ;;  %v668_v18 = vsel %vm661_vm1, %v665_v55, %v3014_v56  ;;  %v666_v24 = vsel %vm661_vm1, %v663_v49, %v665_v55  ;;  %v679_v55 = vrot.slane %v2789_v11, 2 }
  0x32   : > { %552 = vrot.lane.b32.xlu1 %v499_v26, %s2673_s16  ;;  %548 = vrot.lane.b32.xlu0 %v495_v25, %s2673_s16  ;;  %v2974_v25 = vsel %vm494_vm0, %v538_v16, %v540_v17  ;;  %v2977_v26 = vsel %vm494_vm0, %v536_v62, %v538_v16  ;;  %v671_v62 = vrot.slane %v2765_v1, 2 }
  0x34   : > { %v3026_v16 = vsel %vm661_vm1, %v669_v61, %v671_v62 }
  0x36   : > { %554 = vrot.lane.b32.xlu1 %v501_v29, %s2673_s16  ;;  %550 = vrot.lane.b32.xlu0 %v497_v30, %s2673_s16  ;;  %v542_v29 = vrot.slane %v2964_v22, 1  ;;  %v544_v30 = vrot.slane %v2967_v23, 1 }
  0x38   : > { %v2989_v32 = vsel %vm494_vm0, %v542_v29, %v544_v30  ;;  %v2992_v37 = vsel %vm494_vm0, %v540_v17, %v542_v29  ;;  %v3003_v43 = vsel %vm494_vm0, %v544_v30, %v2995_v38  ;;  %v3030_v17 = vsel %vm661_vm1, %v3014_v56, %v669_v61 }
  0x39   : > { %v3033_v29 = vrot.slane %v2776_v6, 2  ;;  %v675_v30 = vrot.slane %v2779_v7, 2  ;;  %v681_v61 = vrot.slane %v2845_v27, 2 }
  0x3a   : > { %570 = vrot.lane.b32.xlu1 %v2866_v35, %s2673_s16  ;;  %568 = vrot.lane.b32.xlu0 %v2869_v36, %s2673_s16 }
  0x3b   : > { %5188 = vst [vmem:[#allocation6_spill] sm:$0xff] %v3033_v29  ;;  %v3046_v49 = vsel %vm661_vm1, %v671_v62, %v3033_v29  ;;  %v683_v62 = vrot.slane %v2848_v28, 2  ;;  %v3070_v8 = vsel %vm661_vm1, %v679_v55, %v681_v61 }
  0x3c   : > { %5193 = vst [vmem:[#allocation11_spill] sm:$0xff] %v3070_v8 }
  0x3e   : > { %574 = vrot.lane.b32.xlu1 %v2884_v41, %s2673_s16  ;;  %572 = vrot.lane.b32.xlu0 %v2887_v42, %s2673_s16 }
  0x42   : > { %578 = vrot.lane.b32.xlu1 %v2902_v47, %s2673_s16  ;;  %576 = vrot.lane.b32.xlu0 %v2905_v48, %s2673_s16 }
  0x46   : > { %582 = vrot.lane.b32.xlu1 %v2920_v53, %s2673_s16  ;;  %580 = vrot.lane.b32.xlu0 %v2923_v54, %s2673_s16 }
  0x4a   : > { %586 = vrot.lane.b32.xlu1 %v2938_v59, %s2673_s16  ;;  %584 = vrot.lane.b32.xlu0 %v2941_v60, %s2673_s16 }
  0x4e   : > { %590 = vrot.lane.b32.xlu1 %v2956_v4, %s2673_s16  ;;  %588 = vrot.lane.b32.xlu0 %v2959_v9, %s2673_s16 }
  0x52   : > { %594 = vrot.lane.b32.xlu1 %v2974_v25, %s2673_s16  ;;  %592 = vrot.lane.b32.xlu0 %v2977_v26, %s2673_s16 }
  0x56   : > { %598 = vrot.lane.b32.xlu1 %v2989_v32, %s2673_s16  ;;  %596 = vrot.lane.b32.xlu0 %v2992_v37, %s2673_s16 }
  0x5a   : > { %602 = vrot.lane.b32.xlu1 %v2995_v38, %s2673_s16  ;;  %600 = vrot.lane.b32.xlu0 %v3003_v43, %s2673_s16  ;;  %s2681_s16 = smov 4  }
  0x5e   : > { %719 = vrot.lane.b32.xlu1 %v664_v50, %s2674_s21  ;;  %717 = vrot.lane.b32.xlu0 %v662_v44, %s2674_s21  ;;  %v3042_v44 = vsel %vm661_vm1, %v3033_v29, %v675_v30  ;;  %v677_v50 = vrot.slane %v2786_v10, 2  ;;  %v3067_v29 = vsel %vm661_vm1, %v681_v61, %v683_v62 }
  0x5f   : > { %5189 = vst [vmem:[#allocation7_spill] sm:$0xff] %v3042_v44  ;;  %5192 = vst [vmem:[#allocation10_spill] sm:$0xff] %v3067_v29 }
  0x62   : > { %723 = vrot.lane.b32.xlu1 %v668_v18, %s2674_s21  ;;  %721 = vrot.lane.b32.xlu0 %v666_v24, %s2674_s21  ;;  %v3055_v18 = vsel %vm661_vm1, %v677_v50, %v679_v55  ;;  %v3058_v24 = vsel %vm661_vm1, %v675_v30, %v677_v50  ;;  %v687_v30 = vrot.slane %v2861_v34, 2  ;;  %v691_v55 = vrot.slane %v2877_v40, 2 }
  0x63   : > { %5190 = vst [vmem:[#allocation8_spill] sm:$0xff] %v3055_v18  ;;  %5191 = vst [vmem:[#allocation9_spill] sm:$0xff] %v3058_v24 }
  0x66   : > { %727 = vrot.lane.b32.xlu1 %v3026_v16, %s2674_s21  ;;  %725 = vrot.lane.b32.xlu0 %v3030_v17, %s2674_s21 }
  0x6a   : > { %731 = vrot.lane.b32.xlu1 %v3042_v44, %s2674_s21  ;;  %729 = vrot.lane.b32.xlu0 %v3046_v49, %s2674_s21  ;;  %v685_v44 = vrot.slane %v2858_v33, 2 }
  0x6c   : > { %v3079_v50 = vsel %vm661_vm1, %v685_v44, %v687_v30 }
  0x6d   : > { %5194 = vst [vmem:[#allocation12_spill] sm:$0xff] %v3079_v50 }
  0x6e   : > { %735 = vrot.lane.b32.xlu1 %v3055_v18, %s2674_s21  ;;  %733 = vrot.lane.b32.xlu0 %v3058_v24, %s2674_s21  ;;  %v3082_v18 = vsel %vm661_vm1, %v683_v62, %v685_v44  ;;  %v689_v24 = vrot.slane %v2874_v39, 2  ;;  %v695_v44 = vrot.slane %v2895_v46, 2 }
  0x6f   : > { %5195 = vst [vmem:[#allocation13_spill] sm:$0xff] %v3082_v18 }
  0x70   : > { %v3091_v61 = vsel %vm661_vm1, %v689_v24, %v691_v55 }
  0x71   : > { %5196 = vst [vmem:[#allocation14_spill] sm:$0xff] %v3091_v61 }
  0x72   : > { %739 = vrot.lane.b32.xlu1 %v3067_v29, %s2674_s21  ;;  %737 = vrot.lane.b32.xlu0 %v3070_v8, %s2674_s21  ;;  %v3094_v29 = vsel %vm661_vm1, %v687_v30, %v689_v24  ;;  %v693_v8 = vrot.slane %v2892_v45, 2  ;;  %v699_v24 = vrot.slane %v2913_v52, 2 }
  0x73   : > { %5197 = vst [vmem:[#allocation15_spill] sm:$0xff] %v3094_v29 }
  0x74   : > { %v3103_v62 = vsel %vm661_vm1, %v693_v8, %v695_v44 }
  0x75   : > { %5198 = vst [vmem:[#allocation16_spill] sm:$0xff] %v3103_v62 }
  0x76   : > { %743 = vrot.lane.b32.xlu1 %v3079_v50, %s2674_s21  ;;  %741 = vrot.lane.b32.xlu0 %v3082_v18, %s2674_s21  ;;  %v3106_v50 = vsel %vm661_vm1, %v691_v55, %v693_v8  ;;  %v697_v18 = vrot.slane %v2910_v51, 2  ;;  %v701_v8 = vrot.slane %v2928_v57, 2  ;;  %v703_v55 = vrot.slane %v2931_v58, 2 }
  0x77   : > { %5199 = vst [vmem:[#allocation17_spill] sm:$0xff] %v3106_v50 }
  0x78   : > { %v3115_v30 = vsel %vm661_vm1, %v697_v18, %v699_v24 }
  0x79   : > { %5200 = vst [vmem:[#allocation18_spill] sm:$0xff] %v3115_v30 }
  0x7a   : > { %747 = vrot.lane.b32.xlu1 %v3091_v61, %s2674_s21  ;;  %745 = vrot.lane.b32.xlu0 %v3094_v29, %s2674_s21  ;;  %v3118_v61 = vsel %vm661_vm1, %v695_v44, %v697_v18  ;;  %v705_v29 = vrot.slane %v2946_v63, 2  ;;  %v707_v18 = vrot.slane %v2949_v3, 2 }
  0x7b   : > { %5201 = vst [vmem:[#allocation19_spill] sm:$0xff] %v3118_v61 }
  0x7c   : > { %v3139_v44 = vsel %vm661_vm1, %v705_v29, %v707_v18 }
  0x7d   : > { %5204 = vst [vmem:[#allocation22_spill] sm:$0xff] %v3139_v44 }
  0x7e   : > { %751 = vrot.lane.b32.xlu1 %v3103_v62, %s2674_s21  ;;  %749 = vrot.lane.b32.xlu0 %v3106_v50, %s2674_s21  ;;  %v3127_v62 = vsel %vm661_vm1, %v701_v8, %v703_v55  ;;  %v3130_v50 = vsel %vm661_vm1, %v699_v24, %v701_v8  ;;  %v711_v24 = vrot.slane %v2967_v23, 2  ;;  %v3147_v8 = vld [vmem:[%s2759_s14 + $0xc0] sm:$0xff] }
  0x7f   : > { %5202 = vst [vmem:[#allocation20_spill] sm:$0xff] %v3127_v62  ;;  %5203 = vst [vmem:[#allocation21_spill] sm:$0xff] %v3130_v50 }
  0x82   : > { %755 = vrot.lane.b32.xlu1 %v3115_v30, %s2674_s21  ;;  %753 = vrot.lane.b32.xlu0 %v3118_v61, %s2674_s21  ;;  %v3142_v30 = vsel %vm661_vm1, %v703_v55, %v705_v29  ;;  %v709_v61 = vrot.slane %v2964_v22, 2  ;;  %v713_v29 = vrot.slane %v2982_v31, 2  ;;  %v5178_v55 = vrot.slane %v3147_v8, 2 }
  0x83   : > { %5205 = vst [vmem:[#allocation23_spill] sm:$0xff] %v3142_v30 }
  0x86   : > { %759 = vrot.lane.b32.xlu1 %v3127_v62, %s2674_s21  ;;  %757 = vrot.lane.b32.xlu0 %v3130_v50, %s2674_s21  ;;  %v3154_v62 = vsel %vm661_vm1, %v709_v61, %v711_v24  ;;  %v3157_v50 = vsel %vm661_vm1, %v707_v18, %v709_v61 }
  0x87   : > { %5206 = vst [vmem:[#allocation24_spill] sm:$0xff] %v3154_v62  ;;  %5207 = vst [vmem:[#allocation25_spill] sm:$0xff] %v3157_v50 }
  0x8a   : > { %763 = vrot.lane.b32.xlu1 %v3139_v44, %s2674_s21  ;;  %761 = vrot.lane.b32.xlu0 %v3142_v30, %s2674_s21  ;;  %v3168_v44 = vsel %vm661_vm1, %v713_v29, %v5178_v55  ;;  %v3171_v30 = vsel %vm661_vm1, %v711_v24, %v713_v29 }
  0x8b   : > { %5208 = vst [vmem:[#allocation26_spill] sm:$0xff] %v3171_v30 }
  0x8e   : > { %767 = vrot.lane.b32.xlu1 %v3154_v62, %s2674_s21  ;;  %765 = vrot.lane.b32.xlu0 %v3157_v50, %s2674_s21 }
  0x92   : > { %771 = vrot.lane.b32.xlu1 %v3168_v44, %s2674_s21  ;;  %769 = vrot.lane.b32.xlu0 %v3171_v30, %s2674_s21 }
  0x96   : > { %833 = vrot.lane.b32.xlu1 %v2768_v2, %s2675_s22  ;;  %831 = vrot.lane.b32.xlu0 %v2825_v19, %s2675_s22 }
  0x98   : > { %v3181_v61 = vpop.permute.xlu1 %558  ;;  %v3183_v18 = vpop.permute.xlu0 %556 }
  0x99   : > { %5209 = vst [vmem:[#allocation27_spill] sm:$0xff] %v3181_v61  ;;  %5210 = vst [vmem:[#allocation28_spill] sm:$0xff] %v3183_v18  ;;  %v5281_v61 = vld [vmem:[#allocation15_spill] sm:$0xff] }
  0x9a   : > { %837 = vrot.lane.b32.xlu1 %v2765_v1, %s2675_s22  ;;  %835 = vrot.lane.b32.xlu0 %v2762_v0, %s2675_s22 }
  0x9c   : > { %v3189_v24 = vpop.permute.xlu1 %562  ;;  %v3191_v29 = vpop.permute.xlu0 %560 }
  0x9d   : > { %5211 = vst [vmem:[#allocation29_spill] sm:$0xff] %v3189_v24  ;;  %5212 = vst [vmem:[#allocation30_spill] sm:$0xff] %v3191_v29 }
  0x9e   : > { %841 = vrot.lane.b32.xlu1 %v2779_v7, %s2675_s22  ;;  %839 = vrot.lane.b32.xlu0 %v2776_v6, %s2675_s22 }
  0xa0   : > { %v3197_v2 = vpop.permute.xlu1 %566  ;;  %v3199_v19 = vpop.permute.xlu0 %564 }
  0xa1   : > { %5213 = vst [vmem:[#allocation31_spill] sm:$0xff] %v3197_v2  ;;  %5214 = vst [vmem:[#allocation32_spill] sm:$0xff] %v3199_v19 }
  0xa2   : > { %845 = vrot.lane.b32.xlu1 %v2789_v11, %s2675_s22  ;;  %843 = vrot.lane.b32.xlu0 %v2786_v10, %s2675_s22 }
  0xa4   : > { %v3205_v0 = vpop.permute.xlu1 %552  ;;  %v3207_v55 = vpop.permute.xlu0 %548 }
  0xa5   : > { %5215 = vst [vmem:[#allocation33_spill] sm:$0xff] %v3205_v0  ;;  %5216 = vst [vmem:[#allocation34_spill] sm:$0xff] %v3207_v55 }
  0xa6   : > { %849 = vrot.lane.b32.xlu1 %v2848_v28, %s2675_s22  ;;  %847 = vrot.lane.b32.xlu0 %v2845_v27, %s2675_s22 }
  0xa8   : > { %v3213_v29 = vpop.permute.xlu1 %554  ;;  %v3215_v2 = vpop.permute.xlu0 %550 }
  0xa9   : > { %5217 = vst [vmem:[#allocation35_spill] sm:$0xff] %v3213_v29  ;;  %5218 = vst [vmem:[#allocation36_spill] sm:$0xff] %v3215_v2 }
  0xaa   : > { %853 = vrot.lane.b32.xlu1 %v2861_v34, %s2675_s22  ;;  %851 = vrot.lane.b32.xlu0 %v2858_v33, %s2675_s22 }
  0xac   : > { %v3221_v19 = vpop.permute.xlu1 %570  ;;  %v3223_v0 = vpop.permute.xlu0 %568 }
  0xad   : > { %5219 = vst [vmem:[#allocation37_spill] sm:$0xff] %v3221_v19  ;;  %5220 = vst [vmem:[#allocation38_spill] sm:$0xff] %v3223_v0 }
  0xae   : > { %857 = vrot.lane.b32.xlu1 %v2877_v40, %s2675_s22  ;;  %855 = vrot.lane.b32.xlu0 %v2874_v39, %s2675_s22 }
  0xb0   : > { %v3229_v55 = vpop.permute.xlu1 %574  ;;  %v3231_v29 = vpop.permute.xlu0 %572 }
  0xb1   : > { %5221 = vst [vmem:[#allocation39_spill] sm:$0xff] %v3229_v55  ;;  %5222 = vst [vmem:[#allocation40_spill] sm:$0xff] %v3231_v29 }
  0xb2   : > { %861 = vrot.lane.b32.xlu1 %v2895_v46, %s2675_s22  ;;  %859 = vrot.lane.b32.xlu0 %v2892_v45, %s2675_s22 }
  0xb4   : > { %v3237_v2 = vpop.permute.xlu1 %578  ;;  %v3239_v19 = vpop.permute.xlu0 %576 }
  0xb5   : > { %5223 = vst [vmem:[#allocation41_spill] sm:$0xff] %v3237_v2  ;;  %5224 = vst [vmem:[#allocation42_spill] sm:$0xff] %v3239_v19 }
  0xb6   : > { %865 = vrot.lane.b32.xlu1 %v2913_v52, %s2675_s22  ;;  %863 = vrot.lane.b32.xlu0 %v2910_v51, %s2675_s22 }
  0xb8   : > { %v3245_v0 = vpop.permute.xlu1 %582  ;;  %v3247_v29 = vpop.permute.xlu0 %580 }
  0xb9   : > { %5225 = vst [vmem:[#allocation43_spill] sm:$0xff] %v3245_v0  ;;  %5226 = vst [vmem:[#allocation44_spill] sm:$0xff] %v3247_v29 }
  0xba   : > { %869 = vrot.lane.b32.xlu1 %v2931_v58, %s2675_s22  ;;  %867 = vrot.lane.b32.xlu0 %v2928_v57, %s2675_s22 }
  0xbc   : > { %v3253_v2 = vpop.permute.xlu1 %586  ;;  %v3255_v19 = vpop.permute.xlu0 %584 }
  0xbd   : > { %5227 = vst [vmem:[#allocation45_spill] sm:$0xff] %v3253_v2  ;;  %5228 = vst [vmem:[#allocation46_spill] sm:$0xff] %v3255_v19  ;;  %v3278_v19 = vld [vmem:[%s2759_s14 + $0xd0] sm:$0xff] }
  0xbe   : > { %873 = vrot.lane.b32.xlu1 %v2949_v3, %s2675_s22  ;;  %871 = vrot.lane.b32.xlu0 %v2946_v63, %s2675_s22 }
  0xc0   : > { %v3261_v0 = vpop.permute.xlu1 %590  ;;  %v3263_v29 = vpop.permute.xlu0 %588 }
  0xc1   : > { %5229 = vst [vmem:[#allocation47_spill] sm:$0xff] %v3261_v0  ;;  %5230 = vst [vmem:[#allocation48_spill] sm:$0xff] %v3263_v29  ;;  %v3281_v0 = vld [vmem:[%s2759_s14 + $0xc8] sm:$0xff] }
  0xc2   : > { %877 = vrot.lane.b32.xlu1 %v2967_v23, %s2675_s22  ;;  %875 = vrot.lane.b32.xlu0 %v2964_v22, %s2675_s22 }
  0xc4   : > { %v3269_v55 = vpop.permute.xlu1 %594  ;;  %v3271_v2 = vpop.permute.xlu0 %592 }
  0xc5   : > { %5231 = vst [vmem:[#allocation49_spill] sm:$0xff] %v3269_v55  ;;  %5232 = vst [vmem:[#allocation50_spill] sm:$0xff] %v3271_v2 }
  0xc6   : > { %881 = vrot.lane.b32.xlu1 %v3147_v8, %s2675_s22  ;;  %879 = vrot.lane.b32.xlu0 %v2982_v31, %s2675_s22 }
  0xc8   : > { %v3283_v29 = vpop.permute.xlu1 %598  ;;  %v3285_v24 = vpop.permute.xlu0 %596 }
  0xc9   : > { %5233 = vst [vmem:[#allocation51_spill] sm:$0xff] %v3283_v29  ;;  %5234 = vst [vmem:[#allocation52_spill] sm:$0xff] %v3285_v24 }
  0xca   : > { %885 = vrot.lane.b32.xlu1 %v3278_v19, %s2675_s22  ;;  %883 = vrot.lane.b32.xlu0 %v3281_v0, %s2675_s22 }
  0xcc   : > { %v3291_v2 = vpop.permute.xlu1 %602  ;;  %v3293_v55 = vpop.permute.xlu0 %600 }
  0xcd   : > { %5235 = vst [vmem:[#allocation53_spill] sm:$0xff] %v3291_v2  ;;  %5236 = vst [vmem:[#allocation54_spill] sm:$0xff] %v3293_v55 }
  0xce   : > { %951 = vrot.lane.b32.xlu1 %v2796_v13, %s2676_s23  ;;  %949 = vrot.lane.b32.xlu0 %v2773_v5, %s2676_s23 }
  0xd0   : > { %v3299_v29 = vpop.permute.xlu1 %719  ;;  %v3301_v24 = vpop.permute.xlu0 %717 }
  0xd1   : > { %5237 = vst [vmem:[#allocation55_spill] sm:$0xff] %v3299_v29  ;;  %5238 = vst [vmem:[#allocation56_spill] sm:$0xff] %v3301_v24  ;;  %v3397_v24 = vrot.slane %v3278_v19, 1 }
  0xd2   : > { %955 = vrot.lane.b32.xlu1 %v2808_v15, %s2676_s23  ;;  %953 = vrot.lane.b32.xlu0 %v2792_v12, %s2676_s23 }
  0xd4   : > { %v3307_v2 = vpop.permute.xlu1 %723  ;;  %v3309_v55 = vpop.permute.xlu0 %721 }
  0xd5   : > { %5239 = vst [vmem:[#allocation57_spill] sm:$0xff] %v3307_v2  ;;  %5240 = vst [vmem:[#allocation58_spill] sm:$0xff] %v3309_v55 }
  0xd6   : > { %959 = vrot.lane.b32.xlu1 %v2831_v21, %s2676_s23  ;;  %957 = vrot.lane.b32.xlu0 %v2804_v14, %s2676_s23 }
  0xd8   : > { %v3315_v5 = vpop.permute.xlu1 %727  ;;  %v3317_v13 = vpop.permute.xlu0 %725 }
  0xd9   : > { %5241 = vst [vmem:[#allocation59_spill] sm:$0xff] %v3315_v5  ;;  %5242 = vst [vmem:[#allocation60_spill] sm:$0xff] %v3317_v13 }
  0xda   : > { %963 = vrot.lane.b32.xlu1 %v2869_v36, %s2676_s23  ;;  %961 = vrot.lane.b32.xlu0 %v2828_v20, %s2676_s23 }
  0xdc   : > { %v3323_v12 = vpop.permute.xlu1 %731  ;;  %v3325_v15 = vpop.permute.xlu0 %729 }
  0xdd   : > { %5243 = vst [vmem:[#allocation61_spill] sm:$0xff] %v3323_v12  ;;  %5244 = vst [vmem:[#allocation62_spill] sm:$0xff] %v3325_v15 }
  0xde   : > { %967 = vrot.lane.b32.xlu1 %v2887_v42, %s2676_s23  ;;  %965 = vrot.lane.b32.xlu0 %v2866_v35, %s2676_s23 }
  0xe0   : > { %v3331_v55 = vpop.permute.xlu1 %735  ;;  %v3333_v5 = vpop.permute.xlu0 %733 }
  0xe1   : > { %5245 = vst [vmem:[#allocation63_spill] sm:$0xff] %v3331_v55  ;;  %5246 = vst [vmem:[#allocation64_spill] sm:$0xff] %v3333_v5 }
  0xe2   : > { %971 = vrot.lane.b32.xlu1 %v2905_v48, %s2676_s23  ;;  %969 = vrot.lane.b32.xlu0 %v2884_v41, %s2676_s23 }
  0xe4   : > { %v3339_v13 = vpop.permute.xlu1 %739  ;;  %v3341_v12 = vpop.permute.xlu0 %737 }
  0xe5   : > { %5247 = vst [vmem:[#allocation65_spill] sm:$0xff] %v3339_v13  ;;  %5248 = vst [vmem:[#allocation66_spill] sm:$0xff] %v3341_v12 }
  0xe6   : > { %975 = vrot.lane.b32.xlu1 %v2923_v54, %s2676_s23  ;;  %973 = vrot.lane.b32.xlu0 %v2902_v47, %s2676_s23 }
  0xe8   : > { %v3347_v15 = vpop.permute.xlu1 %743  ;;  %v3349_v55 = vpop.permute.xlu0 %741 }
  0xe9   : > { %5249 = vst [vmem:[#allocation67_spill] sm:$0xff] %v3347_v15  ;;  %5250 = vst [vmem:[#allocation68_spill] sm:$0xff] %v3349_v55 }
  0xea   : > { %979 = vrot.lane.b32.xlu1 %v2941_v60, %s2676_s23  ;;  %977 = vrot.lane.b32.xlu0 %v2920_v53, %s2676_s23 }
  0xec   : > { %v3355_v5 = vpop.permute.xlu1 %747  ;;  %v3357_v13 = vpop.permute.xlu0 %745 }
  0xed   : > { %5251 = vst [vmem:[#allocation69_spill] sm:$0xff] %v3355_v5  ;;  %5252 = vst [vmem:[#allocation70_spill] sm:$0xff] %v3357_v13 }
  0xee   : > { %983 = vrot.lane.b32.xlu1 %v2959_v9, %s2676_s23  ;;  %981 = vrot.lane.b32.xlu0 %v2938_v59, %s2676_s23 }
  0xf0   : > { %v3363_v12 = vpop.permute.xlu1 %751  ;;  %v3365_v15 = vpop.permute.xlu0 %749 }
  0xf1   : > { %5253 = vst [vmem:[#allocation71_spill] sm:$0xff] %v3363_v12  ;;  %5254 = vst [vmem:[#allocation72_spill] sm:$0xff] %v3365_v15  ;;  %v945_v12 = vrot.slane %v3281_v0, 1  ;;  %v943_v15 = vrot.slane %v3147_v8, 1 }
  0xf2   : > { %987 = vrot.lane.b32.xlu1 %v2977_v26, %s2676_s23  ;;  %985 = vrot.lane.b32.xlu0 %v2956_v4, %s2676_s23 }
  0xf4   : > { %v3371_v55 = vpop.permute.xlu1 %755  ;;  %v3373_v5 = vpop.permute.xlu0 %753 }
  0xf5   : > { %5255 = vst [vmem:[#allocation73_spill] sm:$0xff] %v3371_v55  ;;  %5256 = vst [vmem:[#allocation74_spill] sm:$0xff] %v3373_v5  ;;  %v3390_v5 = vsel %vm494_vm0, %v943_v15, %v945_v12  ;;  %v3394_v55 = vsel %vm494_vm0, %v2995_v38, %v943_v15 }
  0xf6   : > { %991 = vrot.lane.b32.xlu1 %v2992_v37, %s2676_s23  ;;  %989 = vrot.lane.b32.xlu0 %v2974_v25, %s2676_s23 }
  0xf8   : > { %v3381_v13 = vpop.permute.xlu1 %759  ;;  %v3383_v2 = vpop.permute.xlu0 %757 }
  0xf9   : > { %5257 = vst [vmem:[#allocation75_spill] sm:$0xff] %v3381_v13  ;;  %5258 = vst [vmem:[#allocation76_spill] sm:$0xff] %v3383_v2  ;;  %v3409_v2 = vsel %vm494_vm0, %v945_v12, %v3397_v24 }
  0xfa   : > { %995 = vrot.lane.b32.xlu1 %v3003_v43, %s2676_s23  ;;  %993 = vrot.lane.b32.xlu0 %v2989_v32, %s2676_s23 }
  0xfc   : > { %v3399_v29 = vpop.permute.xlu1 %763  ;;  %v3401_v13 = vpop.permute.xlu0 %761 }
  0xfd   : > { %5259 = vst [vmem:[#allocation77_spill] sm:$0xff] %v3399_v29  ;;  %5260 = vst [vmem:[#allocation78_spill] sm:$0xff] %v3401_v13  ;;  %v5278_v29 = vld [vmem:[#allocation10_spill] sm:$0xff] }
  0xfe   : > { %999 = vrot.lane.b32.xlu1 %v3390_v5, %s2676_s23  ;;  %997 = vrot.lane.b32.xlu0 %v3394_v55, %s2676_s23 }
 0x100   : > { %v3411_v18 = vpop.permute.xlu1 %767  ;;  %v3413_v38 = vpop.permute.xlu0 %765 }
 0x101   : > { %5261 = vst [vmem:[#allocation79_spill] sm:$0xff] %v3411_v18  ;;  %5262 = vst [vmem:[#allocation80_spill] sm:$0xff] %v3413_v38  ;;  %v5269_v18 = vld [vmem:[#allocation9_spill] sm:$0xff] }
 0x102   : > { %1003 = vrot.lane.b32.xlu1 %v3397_v24, %s2676_s23  ;;  %1001 = vrot.lane.b32.xlu0 %v3409_v2, %s2676_s23 }
 0x104   : > { %v3419_v15 = vpop.permute.xlu1 %771  ;;  %v3421_v13 = vpop.permute.xlu0 %769 }
 0x105   : > { %5263 = vst [vmem:[#allocation81_spill] sm:$0xff] %v3419_v15  ;;  %5264 = vst [vmem:[#allocation82_spill] sm:$0xff] %v3421_v13 }
 0x106   : > { %1070 = vrot.lane.b32.xlu1 %v3030_v17, %s2677_s26  ;;  %1068 = vrot.lane.b32.xlu0 %v3014_v56, %s2677_s26  ;;  %v5270_v17 = vld [vmem:[#allocation7_spill] sm:$0xff] }
 0x108   : > { %v3427_v12 = vpop.permute.xlu1 %833  ;;  %v3429_v38 = vpop.permute.xlu0 %831 }
 0x109   : > { %5265 = vst [vmem:[#allocation83_spill] sm:$0xff] %v3427_v12  ;;  %5266 = vst [vmem:[#allocation84_spill] sm:$0xff] %v3429_v38  ;;  %v5273_v38 = vld [vmem:[#allocation11_spill] sm:$0xff] }
 0x10a   : > { %1074 = vrot.lane.b32.xlu1 %v3046_v49, %s2677_s26  ;;  %1072 = vrot.lane.b32.xlu0 %v3026_v16, %s2677_s26  ;;  %v5274_v49 = vld [vmem:[#allocation8_spill] sm:$0xff] }
 0x10c   : > { %v3435_v15 = vpop.permute.xlu1 %837  ;;  %v3437_v13 = vpop.permute.xlu0 %835 }
 0x10d   : > { %5267 = vst [vmem:[#allocation85_spill] sm:$0xff] %v3435_v15  ;;  %5268 = vst [vmem:[#allocation86_spill] sm:$0xff] %v3437_v13  ;;  %v5277_v15 = vld [vmem:[#allocation13_spill] sm:$0xff] }
 0x10e   : > { %1078 = vrot.lane.b32.xlu1 %v5269_v18, %s2677_s26  ;;  %1076 = vrot.lane.b32.xlu0 %v5270_v17, %s2677_s26 }
 0x110   : > { %v3443_v56 = vpop.permute.xlu1 %841  ;;  %v3445_v12 = vpop.permute.xlu0 %839 }
 0x111   : > { %5271 = vst [vmem:[#allocation9_spill] sm:$0xff] %v3443_v56  ;;  %5272 = vst [vmem:[#allocation7_spill] sm:$0xff] %v3445_v12 }
 0x112   : > { %1082 = vrot.lane.b32.xlu1 %v5273_v38, %s2677_s26  ;;  %1080 = vrot.lane.b32.xlu0 %v5274_v49, %s2677_s26  ;;  %v5282_v38 = vld [vmem:[#allocation12_spill] sm:$0xff] }
 0x114   : > { %v3452_v16 = vpop.permute.xlu1 %845  ;;  %v3454_v13 = vpop.permute.xlu0 %843 }
 0x115   : > { %5275 = vst [vmem:[#allocation8_spill] sm:$0xff] %v3452_v16  ;;  %5276 = vst [vmem:[#allocation87_spill] sm:$0xff] %v3454_v13 }
 0x116   : > { %1086 = vrot.lane.b32.xlu1 %v5277_v15, %s2677_s26  ;;  %1084 = vrot.lane.b32.xlu0 %v5278_v29, %s2677_s26  ;;  %v5285_v15 = vld [vmem:[#allocation17_spill] sm:$0xff]  ;;  %v5286_v29 = vld [vmem:[#allocation14_spill] sm:$0xff] }
 0x118   : > { %v3460_v56 = vpop.permute.xlu1 %849  ;;  %v3462_v12 = vpop.permute.xlu0 %847 }
 0x119   : > { %5279 = vst [vmem:[#allocation88_spill] sm:$0xff] %v3460_v56  ;;  %5280 = vst [vmem:[#allocation89_spill] sm:$0xff] %v3462_v12 }
 0x11a   : > { %1090 = vrot.lane.b32.xlu1 %v5281_v61, %s2677_s26  ;;  %1088 = vrot.lane.b32.xlu0 %v5282_v38, %s2677_s26  ;;  %v5289_v61 = vld [vmem:[#allocation19_spill] sm:$0xff]  ;;  %v5290_v38 = vld [vmem:[#allocation16_spill] sm:$0xff] }
 0x11c   : > { %v3468_v16 = vpop.permute.xlu1 %853  ;;  %v3470_v13 = vpop.permute.xlu0 %851 }
 0x11d   : > { %5283 = vst [vmem:[#allocation90_spill] sm:$0xff] %v3468_v16  ;;  %5284 = vst [vmem:[#allocation91_spill] sm:$0xff] %v3470_v13 }
 0x11e   : > { %1094 = vrot.lane.b32.xlu1 %v5285_v15, %s2677_s26  ;;  %1092 = vrot.lane.b32.xlu0 %v5286_v29, %s2677_s26  ;;  %v5293_v15 = vld [vmem:[#allocation21_spill] sm:$0xff]  ;;  %v5294_v29 = vld [vmem:[#allocation18_spill] sm:$0xff] }
 0x120   : > { %v3476_v56 = vpop.permute.xlu1 %857  ;;  %v3478_v12 = vpop.permute.xlu0 %855 }
 0x121   : > { %5287 = vst [vmem:[#allocation92_spill] sm:$0xff] %v3476_v56  ;;  %5288 = vst [vmem:[#allocation93_spill] sm:$0xff] %v3478_v12 }
 0x122   : > { %1098 = vrot.lane.b32.xlu1 %v5289_v61, %s2677_s26  ;;  %1096 = vrot.lane.b32.xlu0 %v5290_v38, %s2677_s26  ;;  %v5297_v61 = vld [vmem:[#allocation23_spill] sm:$0xff]  ;;  %v5298_v38 = vld [vmem:[#allocation20_spill] sm:$0xff] }
 0x124   : > { %v3484_v16 = vpop.permute.xlu1 %861  ;;  %v3486_v13 = vpop.permute.xlu0 %859 }
 0x125   : > { %5291 = vst [vmem:[#allocation94_spill] sm:$0xff] %v3484_v16  ;;  %5292 = vst [vmem:[#allocation95_spill] sm:$0xff] %v3486_v13 }
 0x126   : > { %1102 = vrot.lane.b32.xlu1 %v5293_v15, %s2677_s26  ;;  %1100 = vrot.lane.b32.xlu0 %v5294_v29, %s2677_s26 }
 0x128   : > { %v3492_v56 = vpop.permute.xlu1 %865  ;;  %v3494_v12 = vpop.permute.xlu0 %863 }
 0x129   : > { %5295 = vst [vmem:[#allocation96_spill] sm:$0xff] %v3492_v56  ;;  %5296 = vst [vmem:[#allocation97_spill] sm:$0xff] %v3494_v12  ;;  %v5301_v12 = vld [vmem:[#allocation22_spill] sm:$0xff]  ;;  %v1062_v56 = vrot.slane %v3281_v0, 2 }
 0x12a   : > { %1106 = vrot.lane.b32.xlu1 %v5297_v61, %s2677_s26  ;;  %1104 = vrot.lane.b32.xlu0 %v5298_v38, %s2677_s26 }
 0x12c   : > { %v3500_v16 = vpop.permute.xlu1 %869  ;;  %v3502_v13 = vpop.permute.xlu0 %867 }
 0x12d   : > { %5299 = vst [vmem:[#allocation98_spill] sm:$0xff] %v3500_v16  ;;  %5300 = vst [vmem:[#allocation99_spill] sm:$0xff] %v3502_v13  ;;  %v3519_v16 = vld [vmem:[%s3507_s8] sm:$0xff]  ;;  %v1064_v13 = vrot.slane %v3278_v19, 2 }
 0x12e   : > { %1110 = vrot.lane.b32.xlu1 %v3157_v50, %s2677_s26  ;;  %1108 = vrot.lane.b32.xlu0 %v5301_v12, %s2677_s26  ;;  %v5304_v50 = vrot.slane %v3147_v8, 2  ;;  %v5182_v38 = vrot.slane %v3519_v16, 2 }
 0x130   : > { %v3514_v61 = vpop.permute.xlu1 %873  ;;  %v3516_v15 = vpop.permute.xlu0 %871  ;;  %v3529_v12 = vsel %vm661_vm1, %v5304_v50, %v1062_v56  ;;  %v3546_v50 = vsel %vm661_vm1, %v1062_v56, %v1064_v13 }
 0x131   : > { %5302 = vst [vmem:[#allocation100_spill] sm:$0xff] %v3514_v61  ;;  %5303 = vst [vmem:[#allocation101_spill] sm:$0xff] %v3516_v15 }
 0x132   : > { %1114 = vrot.lane.b32.xlu1 %v3171_v30, %s2677_s26  ;;  %1112 = vrot.lane.b32.xlu0 %v3154_v62, %s2677_s26  ;;  %v3543_v30 = vsel %vm661_vm1, %v1064_v13, %v5182_v38 }
 0x134   : > { %v3532_v61 = vpop.permute.xlu1 %877  ;;  %v3534_v15 = vpop.permute.xlu0 %875 }
 0x135   : > { %5305 = vst [vmem:[#allocation102_spill] sm:$0xff] %v3532_v61  ;;  %5306 = vst [vmem:[#allocation103_spill] sm:$0xff] %v3534_v15 }
 0x136   : > { %1118 = vrot.lane.b32.xlu1 %v3529_v12, %s2677_s26  ;;  %1116 = vrot.lane.b32.xlu0 %v3168_v44, %s2677_s26 }
 0x138   : > { %v3548_v62 = vpop.permute.xlu1 %881  ;;  %v3550_v29 = vpop.permute.xlu0 %879 }
 0x13a   : > { %1122 = vrot.lane.b32.xlu1 %v3543_v30, %s2677_s26  ;;  %1120 = vrot.lane.b32.xlu0 %v3546_v50, %s2677_s26 }
 0x13c   : > { %v3556_v15 = vpop.permute.xlu1 %885  ;;  %v3558_v61 = vpop.permute.xlu0 %883 }
 0x13d   : > { %5307 = vst [vmem:[#allocation104_spill] sm:$0xff] %v3558_v61 }
 0x13e   : > { %1184 = vrot.lane.b32.xlu1 %v2776_v6, %s2678_s9  ;;  %1182 = vrot.lane.b32.xlu0 %v2765_v1, %s2678_s9 }
 0x140   : > { %v3564_v13 = vpop.permute.xlu1 %951  ;;  %v3566_v56 = vpop.permute.xlu0 %949 }
 0x142   : > { %1188 = vrot.lane.b32.xlu1 %v2786_v10, %s2678_s9  ;;  %1186 = vrot.lane.b32.xlu0 %v2779_v7, %s2678_s9 }
 0x144   : > { %v3572_v38 = vpop.permute.xlu1 %955  ;;  %v3574_v61 = vpop.permute.xlu0 %953 }
 0x146   : > { %1192 = vrot.lane.b32.xlu1 %v2845_v27, %s2678_s9  ;;  %1190 = vrot.lane.b32.xlu0 %v2789_v11, %s2678_s9 }
 0x148   : > { %v3580_v1 = vpop.permute.xlu1 %959  ;;  %v3582_v6 = vpop.permute.xlu0 %957 }
 0x14a   : > { %1196 = vrot.lane.b32.xlu1 %v2858_v33, %s2678_s9  ;;  %1194 = vrot.lane.b32.xlu0 %v2848_v28, %s2678_s9 }
 0x14c   : > { %v3588_v7 = vpop.permute.xlu1 %963  ;;  %v3590_v10 = vpop.permute.xlu0 %961 }
 0x14e   : > { %1200 = vrot.lane.b32.xlu1 %v2874_v39, %s2678_s9  ;;  %1198 = vrot.lane.b32.xlu0 %v2861_v34, %s2678_s9 }
 0x150   : > { %v3596_v11 = vpop.permute.xlu1 %967  ;;  %v3598_v27 = vpop.permute.xlu0 %965 }
 0x152   : > { %1204 = vrot.lane.b32.xlu1 %v2892_v45, %s2678_s9  ;;  %1202 = vrot.lane.b32.xlu0 %v2877_v40, %s2678_s9 }
 0x154   : > { %v3604_v28 = vpop.permute.xlu1 %971  ;;  %v3606_v33 = vpop.permute.xlu0 %969 }
 0x155   : > { %5308 = vst [vmem:[#allocation105_spill] sm:$0xff] %v3604_v28  ;;  %5309 = vst [vmem:[#allocation106_spill] sm:$0xff] %v3606_v33  ;;  %v5462_v28 = vld [vmem:[#allocation64_spill] sm:$0xff] }
 0x156   : > { %1208 = vrot.lane.b32.xlu1 %v2910_v51, %s2678_s9  ;;  %1206 = vrot.lane.b32.xlu0 %v2895_v46, %s2678_s9 }
 0x158   : > { %v3612_v34 = vpop.permute.xlu1 %975  ;;  %v3614_v39 = vpop.permute.xlu0 %973 }
 0x159   : > { %5310 = vst [vmem:[#allocation107_spill] sm:$0xff] %v3612_v34  ;;  %5311 = vst [vmem:[#allocation108_spill] sm:$0xff] %v3614_v39  ;;  %v5456_v39 = vld [vmem:[#allocation58_spill] sm:$0xff] }
 0x15a   : > { %1212 = vrot.lane.b32.xlu1 %v2928_v57, %s2678_s9  ;;  %1210 = vrot.lane.b32.xlu0 %v2913_v52, %s2678_s9 }
 0x15c   : > { %v3620_v40 = vpop.permute.xlu1 %979  ;;  %v3622_v45 = vpop.permute.xlu0 %977 }
 0x15d   : > { %5312 = vst [vmem:[#allocation109_spill] sm:$0xff] %v3620_v40  ;;  %5313 = vst [vmem:[#allocation110_spill] sm:$0xff] %v3622_v45 }
 0x15e   : > { %1216 = vrot.lane.b32.xlu1 %v2946_v63, %s2678_s9  ;;  %1214 = vrot.lane.b32.xlu0 %v2931_v58, %s2678_s9 }
 0x160   : > { %v3628_v46 = vpop.permute.xlu1 %983  ;;  %v3630_v51 = vpop.permute.xlu0 %981 }
 0x161   : > { %5314 = vst [vmem:[#allocation111_spill] sm:$0xff] %v3628_v46  ;;  %5315 = vst [vmem:[#allocation112_spill] sm:$0xff] %v3630_v51 }
 0x162   : > { %1220 = vrot.lane.b32.xlu1 %v2964_v22, %s2678_s9  ;;  %1218 = vrot.lane.b32.xlu0 %v2949_v3, %s2678_s9 }
 0x164   : > { %v3636_v52 = vpop.permute.xlu1 %987  ;;  %v3638_v57 = vpop.permute.xlu0 %985 }
 0x165   : > { %5316 = vst [vmem:[#allocation113_spill] sm:$0xff] %v3636_v52  ;;  %5317 = vst [vmem:[#allocation114_spill] sm:$0xff] %v3638_v57  ;;  %v2640_v57 = vld [vmem:[%s2759_s14 + $0xa8] sm:$0xff]  ;;  %v5449_v52 = vld [vmem:[#allocation51_spill] sm:$0xff] }
 0x166   : > { %1224 = vrot.lane.b32.xlu1 %v2982_v31, %s2678_s9  ;;  %1222 = vrot.lane.b32.xlu0 %v2967_v23, %s2678_s9  ;;  %v3661_v23 = vld [vmem:[%s3507_s8 + $0x10] sm:$0xff]  ;;  %v3664_v31 = vld [vmem:[%s3507_s8 + $0x8] sm:$0xff] }
 0x168   : > { %v3644_v58 = vpop.permute.xlu1 %991  ;;  %v3646_v63 = vpop.permute.xlu0 %989 }
 0x169   : > { %5318 = vst [vmem:[#allocation115_spill] sm:$0xff] %v3644_v58  ;;  %5319 = vst [vmem:[#allocation116_spill] sm:$0xff] %v3646_v63 }
 0x16a   : > { %1228 = vrot.lane.b32.xlu1 %v3281_v0, %s2678_s9  ;;  %1226 = vrot.lane.b32.xlu0 %v3147_v8, %s2678_s9 }
 0x16c   : > { %v3652_v3 = vpop.permute.xlu1 %995  ;;  %v3654_v22 = vpop.permute.xlu0 %993 }
 0x16d   : > { %5320 = vst [vmem:[#allocation117_spill] sm:$0xff] %v3652_v3  ;;  %5321 = vst [vmem:[#allocation118_spill] sm:$0xff] %v3654_v22 }
 0x16e   : > { %1232 = vrot.lane.b32.xlu1 %v3519_v16, %s2678_s9  ;;  %1230 = vrot.lane.b32.xlu0 %v3278_v19, %s2678_s9  ;;  %v5326_v19 = vld [vmem:[#allocation5_spill] sm:$0xff] }
 0x170   : > { %v3666_v63 = vpop.permute.xlu1 %999  ;;  %v3668_v0 = vpop.permute.xlu0 %997 }
 0x171   : > { %5322 = vst [vmem:[#allocation119_spill] sm:$0xff] %v3666_v63  ;;  %5323 = vst [vmem:[#allocation120_spill] sm:$0xff] %v3668_v0 }
 0x172   : > { %1236 = vrot.lane.b32.xlu1 %v3661_v23, %s2678_s9  ;;  %1234 = vrot.lane.b32.xlu0 %v3664_v31, %s2678_s9 }
 0x174   : > { %v3674_v8 = vpop.permute.xlu1 %1003  ;;  %v3676_v22 = vpop.permute.xlu0 %1001 }
 0x175   : > { %5324 = vst [vmem:[#allocation121_spill] sm:$0xff] %v3674_v8  ;;  %5325 = vst [vmem:[#allocation122_spill] sm:$0xff] %v3676_v22 }
 0x176   : > { %1302 = vrot.lane.b32.xlu1 %v2804_v14, %s2679_s10  ;;  %1300 = vrot.lane.b32.xlu0 %v5326_v19, %s2679_s10 }
 0x178   : > { %v3682_v63 = vpop.permute.xlu1 %1070  ;;  %v3684_v0 = vpop.permute.xlu0 %1068 }
 0x17a   : > { %1306 = vrot.lane.b32.xlu1 %v2828_v20, %s2679_s10  ;;  %1304 = vrot.lane.b32.xlu0 %v2831_v21, %s2679_s10 }
 0x17c   : > { %v3690_v8 = vpop.permute.xlu1 %1074  ;;  %v3692_v22 = vpop.permute.xlu0 %1072 }
 0x17d   : > { %5327 = vst [vmem:[#allocation5_spill] sm:$0xff] %v3690_v8  ;;  %5328 = vst [vmem:[#allocation123_spill] sm:$0xff] %v3692_v22  ;;  %v5444_v22 = vld [vmem:[#allocation48_spill] sm:$0xff] }
 0x17e   : > { %1310 = vrot.lane.b32.xlu1 %v2866_v35, %s2679_s10  ;;  %1308 = vrot.lane.b32.xlu0 %v2869_v36, %s2679_s10 }
 0x180   : > { %v3698_v14 = vpop.permute.xlu1 %1078  ;;  %v3700_v19 = vpop.permute.xlu0 %1076 }
 0x181   : > { %5329 = vst [vmem:[#allocation124_spill] sm:$0xff] %v3698_v14  ;;  %5330 = vst [vmem:[#allocation125_spill] sm:$0xff] %v3700_v19 }
 0x182   : > { %1314 = vrot.lane.b32.xlu1 %v2884_v41, %s2679_s10  ;;  %1312 = vrot.lane.b32.xlu0 %v2887_v42, %s2679_s10 }
 0x184   : > { %v3706_v20 = vpop.permute.xlu1 %1082  ;;  %v3708_v21 = vpop.permute.xlu0 %1080 }
 0x185   : > { %5331 = vst [vmem:[#allocation126_spill] sm:$0xff] %v3706_v20  ;;  %5332 = vst [vmem:[#allocation127_spill] sm:$0xff] %v3708_v21  ;;  %v5436_v21 = vld [vmem:[#allocation40_spill] sm:$0xff]  ;;  %v5437_v20 = vld [vmem:[#allocation41_spill] sm:$0xff] }
 0x186   : > { %1318 = vrot.lane.b32.xlu1 %v2902_v47, %s2679_s10  ;;  %1316 = vrot.lane.b32.xlu0 %v2905_v48, %s2679_s10 }
 0x188   : > { %v3714_v35 = vpop.permute.xlu1 %1086  ;;  %v3716_v36 = vpop.permute.xlu0 %1084 }
 0x189   : > { %5333 = vst [vmem:[#allocation128_spill] sm:$0xff] %v3714_v35  ;;  %5334 = vst [vmem:[#allocation129_spill] sm:$0xff] %v3716_v36  ;;  %v5432_v36 = vld [vmem:[#allocation36_spill] sm:$0xff]  ;;  %v5434_v35 = vld [vmem:[#allocation38_spill] sm:$0xff] }
 0x18a   : > { %1322 = vrot.lane.b32.xlu1 %v2920_v53, %s2679_s10  ;;  %1320 = vrot.lane.b32.xlu0 %v2923_v54, %s2679_s10 }
 0x18c   : > { %v3722_v41 = vpop.permute.xlu1 %1090  ;;  %v3724_v42 = vpop.permute.xlu0 %1088 }
 0x18d   : > { %5335 = vst [vmem:[#allocation130_spill] sm:$0xff] %v3722_v41  ;;  %5336 = vst [vmem:[#allocation131_spill] sm:$0xff] %v3724_v42  ;;  %v5426_v42 = vld [vmem:[#allocation32_spill] sm:$0xff]  ;;  %v5431_v41 = vld [vmem:[#allocation35_spill] sm:$0xff] }
 0x18e   : > { %1326 = vrot.lane.b32.xlu1 %v2938_v59, %s2679_s10  ;;  %1324 = vrot.lane.b32.xlu0 %v2941_v60, %s2679_s10 }
 0x190   : > { %v3730_v47 = vpop.permute.xlu1 %1094  ;;  %v3732_v48 = vpop.permute.xlu0 %1092 }
 0x191   : > { %5337 = vst [vmem:[#allocation132_spill] sm:$0xff] %v3730_v47  ;;  %5338 = vst [vmem:[#allocation133_spill] sm:$0xff] %v3732_v48  ;;  %v2617_v48 = vld [vmem:[%s2759_s14 + $0x8] sm:$0xff]  ;;  %v2622_v47 = vld [vmem:[%s2759_s14 + $0x20] sm:$0xff] }
 0x192   : > { %1330 = vrot.lane.b32.xlu1 %v2956_v4, %s2679_s10  ;;  %1328 = vrot.lane.b32.xlu0 %v2959_v9, %s2679_s10 }
 0x194   : > { %v3738_v53 = vpop.permute.xlu1 %1098  ;;  %v3740_v54 = vpop.permute.xlu0 %1096 }
 0x195   : > { %5339 = vst [vmem:[#allocation134_spill] sm:$0xff] %v3738_v53  ;;  %5340 = vst [vmem:[#allocation135_spill] sm:$0xff] %v3740_v54  ;;  %v5374_v54 = vld [vmem:[#allocation18_spill] sm:$0xff] }
 0x196   : > { %1334 = vrot.lane.b32.xlu1 %v2974_v25, %s2679_s10  ;;  %1332 = vrot.lane.b32.xlu0 %v2977_v26, %s2679_s10  ;;  %v1296_v25 = vrot.slane %v3664_v31, 1  ;;  %v1294_v26 = vrot.slane %v3519_v16, 1 }
 0x198   : > { %v3746_v59 = vpop.permute.xlu1 %1102  ;;  %v3748_v60 = vpop.permute.xlu0 %1100 }
 0x199   : > { %5341 = vst [vmem:[#allocation136_spill] sm:$0xff] %v3746_v59  ;;  %5342 = vst [vmem:[#allocation137_spill] sm:$0xff] %v3748_v60 }
 0x19a   : > { %1338 = vrot.lane.b32.xlu1 %v2989_v32, %s2679_s10  ;;  %1336 = vrot.lane.b32.xlu0 %v2992_v37, %s2679_s10  ;;  %v1298_v37 = vrot.slane %v3661_v23, 1 }
 0x19c   : > { %v3754_v4 = vpop.permute.xlu1 %1106  ;;  %v3756_v9 = vpop.permute.xlu0 %1104 }
 0x19d   : > { %5343 = vst [vmem:[#allocation138_spill] sm:$0xff] %v3754_v4  ;;  %5344 = vst [vmem:[#allocation139_spill] sm:$0xff] %v3756_v9 }
 0x19e   : > { %1342 = vrot.lane.b32.xlu1 %v3394_v55, %s2679_s10  ;;  %1340 = vrot.lane.b32.xlu0 %v3003_v43, %s2679_s10  ;;  %v1297_v55 = vsel %vm494_vm0, %v1294_v26, %v1296_v25  ;;  %v1295_v43 = vsel %vm494_vm0, %v3397_v24, %v1294_v26  ;;  %v5353_v26 = vld [vmem:[#allocation6_spill] sm:$0xff] }
 0x1a0   : > { %v3764_v60 = vpop.permute.xlu1 %1110  ;;  %v3766_v32 = vpop.permute.xlu0 %1108 }
 0x1a1   : > { %5345 = vst [vmem:[#allocation140_spill] sm:$0xff] %v3764_v60  ;;  %5346 = vst [vmem:[#allocation141_spill] sm:$0xff] %v3766_v32 }
 0x1a2   : > { %1346 = vrot.lane.b32.xlu1 %v3409_v2, %s2679_s10  ;;  %1344 = vrot.lane.b32.xlu0 %v3390_v5, %s2679_s10  ;;  %v1299_v2 = vsel %vm494_vm0, %v1296_v25, %v1298_v37 }
 0x1a4   : > { %v3776_v9 = vpop.permute.xlu1 %1114  ;;  %v3778_v4 = vpop.permute.xlu0 %1112 }
 0x1a5   : > { %5347 = vst [vmem:[#allocation142_spill] sm:$0xff] %v3776_v9  ;;  %5348 = vst [vmem:[#allocation143_spill] sm:$0xff] %v3778_v4  ;;  %v5370_v9 = vld [vmem:[#allocation16_spill] sm:$0xff] }
 0x1a6   : > { %1350 = vrot.lane.b32.xlu1 %v1297_v55, %s2679_s10  ;;  %1348 = vrot.lane.b32.xlu0 %v1295_v43, %s2679_s10 }
 0x1a8   : > { %v3783_v32 = vpop.permute.xlu1 %1118  ;;  %v3785_v5 = vpop.permute.xlu0 %1116 }
 0x1a9   : > { %5349 = vst [vmem:[#allocation144_spill] sm:$0xff] %v3783_v32  ;;  %5350 = vst [vmem:[#allocation145_spill] sm:$0xff] %v3785_v5  ;;  %v5366_v32 = vld [vmem:[#allocation14_spill] sm:$0xff] }
 0x1aa   : > { %1354 = vrot.lane.b32.xlu1 %v1298_v37, %s2679_s10  ;;  %1352 = vrot.lane.b32.xlu0 %v1299_v2, %s2679_s10  ;;  %v5358_v2 = vld [vmem:[#allocation10_spill] sm:$0xff] }
 0x1ac   : > { %v3789_v60 = vpop.permute.xlu1 %1122  ;;  %v3791_v24 = vpop.permute.xlu0 %1120 }
 0x1ad   : > { %5351 = vst [vmem:[#allocation146_spill] sm:$0xff] %v3789_v60  ;;  %5352 = vst [vmem:[#allocation147_spill] sm:$0xff] %v3791_v24  ;;  %v5362_v60 = vld [vmem:[#allocation12_spill] sm:$0xff] }
 0x1ae   : > { %1421 = vrot.lane.b32.xlu1 %v5270_v17, %s2680_s12  ;;  %1419 = vrot.lane.b32.xlu0 %v5353_v26, %s2680_s12  ;;  %v5359_v17 = vld [vmem:[#allocation11_spill] sm:$0xff] }
 0x1b0   : > { %v3797_v25 = vpop.permute.xlu1 %1184  ;;  %v3799_v55 = vpop.permute.xlu0 %1182 }
 0x1b1   : > { %5354 = vst [vmem:[#allocation6_spill] sm:$0xff] %v3797_v25  ;;  %5355 = vst [vmem:[#allocation148_spill] sm:$0xff] %v3799_v55  ;;  %v5459_v25 = vld [vmem:[#allocation61_spill] sm:$0xff] }
 0x1b2   : > { %1425 = vrot.lane.b32.xlu1 %v5274_v49, %s2680_s12  ;;  %1423 = vrot.lane.b32.xlu0 %v5269_v18, %s2680_s12  ;;  %v5363_v49 = vld [vmem:[#allocation13_spill] sm:$0xff] }
 0x1b4   : > { %v3805_v37 = vpop.permute.xlu1 %1188  ;;  %v3807_v43 = vpop.permute.xlu0 %1186 }
 0x1b5   : > { %5356 = vst [vmem:[#allocation149_spill] sm:$0xff] %v3805_v37  ;;  %5357 = vst [vmem:[#allocation150_spill] sm:$0xff] %v3807_v43 }
 0x1b6   : > { %1429 = vrot.lane.b32.xlu1 %v5358_v2, %s2680_s12  ;;  %1427 = vrot.lane.b32.xlu0 %v5359_v17, %s2680_s12  ;;  %v5367_v2 = vld [vmem:[#allocation15_spill] sm:$0xff] }
 0x1b8   : > { %v3813_v26 = vpop.permute.xlu1 %1192  ;;  %v3815_v24 = vpop.permute.xlu0 %1190 }
 0x1b9   : > { %5360 = vst [vmem:[#allocation10_spill] sm:$0xff] %v3813_v26  ;;  %5361 = vst [vmem:[#allocation11_spill] sm:$0xff] %v3815_v24  ;;  %v5427_v24 = vld [vmem:[#allocation33_spill] sm:$0xff] }
 0x1ba   : > { %1433 = vrot.lane.b32.xlu1 %v5362_v60, %s2680_s12  ;;  %1431 = vrot.lane.b32.xlu0 %v5363_v49, %s2680_s12  ;;  %v5371_v60 = vld [vmem:[#allocation17_spill] sm:$0xff] }
 0x1bb   : > { %v5433_v26 = vld [vmem:[#allocation37_spill] sm:$0xff] }
 0x1bc   : > { %v3821_v18 = vpop.permute.xlu1 %1196  ;;  %v3823_v5 = vpop.permute.xlu0 %1194 }
 0x1bd   : > { %5364 = vst [vmem:[#allocation12_spill] sm:$0xff] %v3821_v18  ;;  %5365 = vst [vmem:[#allocation13_spill] sm:$0xff] %v3823_v5  ;;  %v5425_v18 = vld [vmem:[#allocation31_spill] sm:$0xff] }
 0x1be   : > { %1437 = vrot.lane.b32.xlu1 %v5366_v32, %s2680_s12  ;;  %1435 = vrot.lane.b32.xlu0 %v5367_v2, %s2680_s12  ;;  %v5375_v32 = vld [vmem:[#allocation19_spill] sm:$0xff] }
 0x1c0   : > { %v3829_v17 = vpop.permute.xlu1 %1200  ;;  %v3831_v4 = vpop.permute.xlu0 %1198 }
 0x1c1   : > { %5368 = vst [vmem:[#allocation14_spill] sm:$0xff] %v3829_v17  ;;  %5369 = vst [vmem:[#allocation15_spill] sm:$0xff] %v3831_v4  ;;  %v5378_v4 = vld [vmem:[#allocation20_spill] sm:$0xff]  ;;  %v5423_v17 = vld [vmem:[#allocation29_spill] sm:$0xff] }
 0x1c2   : > { %1441 = vrot.lane.b32.xlu1 %v5370_v9, %s2680_s12  ;;  %1439 = vrot.lane.b32.xlu0 %v5371_v60, %s2680_s12  ;;  %v5379_v9 = vld [vmem:[#allocation21_spill] sm:$0xff] }
 0x1c4   : > { %v3837_v49 = vpop.permute.xlu1 %1204  ;;  %v3839_v59 = vpop.permute.xlu0 %1202 }
 0x1c5   : > { %5372 = vst [vmem:[#allocation16_spill] sm:$0xff] %v3837_v49  ;;  %5373 = vst [vmem:[#allocation17_spill] sm:$0xff] %v3839_v59 }
 0x1c6   : > { %1445 = vrot.lane.b32.xlu1 %v5374_v54, %s2680_s12  ;;  %1443 = vrot.lane.b32.xlu0 %v5375_v32, %s2680_s12  ;;  %v5382_v54 = vld [vmem:[#allocation22_spill] sm:$0xff]  ;;  %v5383_v32 = vld [vmem:[#allocation23_spill] sm:$0xff] }
 0x1c8   : > { %v3845_v2 = vpop.permute.xlu1 %1208  ;;  %v3847_v53 = vpop.permute.xlu0 %1206 }
 0x1c9   : > { %5376 = vst [vmem:[#allocation18_spill] sm:$0xff] %v3845_v2  ;;  %5377 = vst [vmem:[#allocation19_spill] sm:$0xff] %v3847_v53 }
 0x1ca   : > { %1449 = vrot.lane.b32.xlu1 %v5378_v4, %s2680_s12  ;;  %1447 = vrot.lane.b32.xlu0 %v5379_v9, %s2680_s12  ;;  %v5386_v4 = vld [vmem:[#allocation24_spill] sm:$0xff]  ;;  %v5387_v9 = vld [vmem:[#allocation25_spill] sm:$0xff] }
 0x1cc   : > { %v3853_v60 = vpop.permute.xlu1 %1212  ;;  %v3855_v49 = vpop.permute.xlu0 %1210 }
 0x1cd   : > { %5380 = vst [vmem:[#allocation20_spill] sm:$0xff] %v3853_v60  ;;  %5381 = vst [vmem:[#allocation21_spill] sm:$0xff] %v3855_v49 }
 0x1ce   : > { %1453 = vrot.lane.b32.xlu1 %v5382_v54, %s2680_s12  ;;  %1451 = vrot.lane.b32.xlu0 %v5383_v32, %s2680_s12  ;;  %v5390_v54 = vld [vmem:[#allocation26_spill] sm:$0xff]  ;;  %v1413_v32 = vrot.slane %v3664_v31, 2 }
 0x1d0   : > { %v3861_v2 = vpop.permute.xlu1 %1216  ;;  %v3863_v53 = vpop.permute.xlu0 %1214 }
 0x1d1   : > { %5384 = vst [vmem:[#allocation22_spill] sm:$0xff] %v3861_v2  ;;  %5385 = vst [vmem:[#allocation23_spill] sm:$0xff] %v3863_v53 }
 0x1d2   : > { %1457 = vrot.lane.b32.xlu1 %v5386_v4, %s2680_s12  ;;  %1455 = vrot.lane.b32.xlu0 %v5387_v9, %s2680_s12  ;;  %v438_v4 = vld [vmem:[%s3507_s8 + $0x18] sm:$0xff]  ;;  %v1415_v9 = vrot.slane %v3661_v23, 2 }
 0x1d4   : > { %v3869_v59 = vpop.permute.xlu1 %1220  ;;  %v3871_v60 = vpop.permute.xlu0 %1218 }
 0x1d5   : > { %5388 = vst [vmem:[#allocation24_spill] sm:$0xff] %v3869_v59  ;;  %5389 = vst [vmem:[#allocation25_spill] sm:$0xff] %v3871_v60 }
 0x1d6   : > { %1461 = vrot.lane.b32.xlu1 %v3168_v44, %s2680_s12  ;;  %1459 = vrot.lane.b32.xlu0 %v5390_v54, %s2680_s12  ;;  %v5393_v44 = vrot.slane %v3519_v16, 2  ;;  %v1417_v54 = vrot.slane %v438_v4, 2  ;;  %v3909_v16 = vld [vmem:[%s5139_s5] ss:$0 sm:$0xff] }
 0x1d7   : > { %5398 = vst [vmem:[#allocation156_spill] sm:$0xff] %v3909_v16 }
 0x1d8   : > { %v3878_v2 = vpop.permute.xlu1 %1224  ;;  %v3880_v53 = vpop.permute.xlu0 %1222  ;;  %v1414_v60 = vsel %vm661_vm1, %v5393_v44, %v1413_v32 }
 0x1d9   : > { %5391 = vst [vmem:[#allocation26_spill] sm:$0xff] %v3878_v2  ;;  %5392 = vst [vmem:[#allocation151_spill] sm:$0xff] %v3880_v53 }
 0x1da   : > { %1465 = vrot.lane.b32.xlu1 %v3546_v50, %s2680_s12  ;;  %1463 = vrot.lane.b32.xlu0 %v3529_v12, %s2680_s12  ;;  %v1418_v50 = vsel %vm661_vm1, %v1415_v9, %v1417_v54  ;;  %v1416_v12 = vsel %vm661_vm1, %v1413_v32, %v1415_v9 }
 0x1dc   : > { %v3891_v59 = vpop.permute.xlu1 %1228  ;;  %v3893_v31 = vpop.permute.xlu0 %1226 }
 0x1dd   : > { %5394 = vst [vmem:[#allocation152_spill] sm:$0xff] %v3891_v59  ;;  %5395 = vst [vmem:[#allocation153_spill] sm:$0xff] %v3893_v31 }
 0x1de   : > { %1469 = vrot.lane.b32.xlu1 %v1414_v60, %s2680_s12  ;;  %1467 = vrot.lane.b32.xlu0 %v3543_v30, %s2680_s12 }
 0x1e0   : > { %v3900_v53 = vpop.permute.xlu1 %1232  ;;  %v3902_v23 = vpop.permute.xlu0 %1230 }
 0x1e1   : > { %5396 = vst [vmem:[#allocation154_spill] sm:$0xff] %v3900_v53  ;;  %5397 = vst [vmem:[#allocation155_spill] sm:$0xff] %v3902_v23 }
 0x1e2   : > { %1473 = vrot.lane.b32.xlu1 %v1418_v50, %s2680_s12  ;;  %1471 = vrot.lane.b32.xlu0 %v1416_v12, %s2680_s12 }
 0x1e4   : > { %v3911_v60 = vpop.permute.xlu1 %1236  ;;  %v3913_v30 = vpop.permute.xlu0 %1234 }
 0x1e5   : > { %5399 = vst [vmem:[#allocation157_spill] sm:$0xff] %v3911_v60  ;;  %5400 = vst [vmem:[#allocation158_spill] sm:$0xff] %v3913_v30 }
 0x1e6   : > { %1689 = vrot.lane.b32.xlu0 %v3909_v16, %s2681_s16 }
 0x1e8   : > { %v3917_v32 = vpop.permute.xlu1 %1302  ;;  %v3919_v4 = vpop.permute.xlu0 %1300 }
 0x1e9   : > { %5401 = vst [vmem:[#allocation159_spill] sm:$0xff] %v3917_v32  ;;  %5402 = vst [vmem:[#allocation160_spill] sm:$0xff] %v3919_v4  ;;  %v5450_v32 = vld [vmem:[#allocation52_spill] sm:$0xff] }
 0x1ec   : > { %v3921_v9 = vpop.permute.xlu1 %1306  ;;  %v3923_v44 = vpop.permute.xlu0 %1304 }
 0x1ed   : > { %5403 = vst [vmem:[#allocation161_spill] sm:$0xff] %v3921_v9  ;;  %5404 = vst [vmem:[#allocation162_spill] sm:$0xff] %v3923_v44  ;;  %v5435_v44 = vld [vmem:[#allocation39_spill] sm:$0xff]  ;;  %v5438_v9 = vld [vmem:[#allocation42_spill] sm:$0xff] }
 0x1f0   : > { %v3925_v54 = vpop.permute.xlu1 %1310  ;;  %v3927_v50 = vpop.permute.xlu0 %1308 }
 0x1f1   : > { %5405 = vst [vmem:[#allocation163_spill] sm:$0xff] %v3925_v54  ;;  %5406 = vst [vmem:[#allocation164_spill] sm:$0xff] %v3927_v50  ;;  %v5422_v50 = vld [vmem:[#allocation28_spill] sm:$0xff] }
 0x1f4   : > { %v3929_v12 = vpop.permute.xlu1 %1314  ;;  %v3931_v30 = vpop.permute.xlu0 %1312 }
 0x1f5   : > { %5407 = vst [vmem:[#allocation165_spill] sm:$0xff] %v3929_v12  ;;  %5408 = vst [vmem:[#allocation166_spill] sm:$0xff] %v3931_v30 }
 0x1f8   : > { %v3933_v16 = vpop.permute.xlu1 %1318  ;;  %v3935_v60 = vpop.permute.xlu0 %1316 }
 0x1f9   : > { %5409 = vst [vmem:[#allocation167_spill] sm:$0xff] %v3933_v16  ;;  %5410 = vst [vmem:[#allocation168_spill] sm:$0xff] %v3935_v60 }
 0x1fc   : > { %v3937_v23 = vpop.permute.xlu1 %1322  ;;  %v3939_v53 = vpop.permute.xlu0 %1320 }
 0x1fd   : > { %5411 = vst [vmem:[#allocation169_spill] sm:$0xff] %v3937_v23  ;;  %5412 = vst [vmem:[#allocation170_spill] sm:$0xff] %v3939_v53  ;;  %v404_v53 = vld [vmem:[%s2815_s20 + $0xb8] sm:$0xff] }
 0x200   : > { %v3941_v31 = vpop.permute.xlu1 %1326  ;;  %v3943_v59 = vpop.permute.xlu0 %1324 }
 0x201   : > { %5413 = vst [vmem:[#allocation171_spill] sm:$0xff] %v3941_v31  ;;  %5414 = vst [vmem:[#allocation172_spill] sm:$0xff] %v3943_v59  ;;  %v5421_v31 = vld [vmem:[#allocation27_spill] sm:$0xff]  ;;  %v2618_v59 = vld [vmem:[%s2759_s14] sm:$0xff] }
 0x202   : > { %v637_v12 = vadd.f32 %v2617_v48, %v5421_v31  ;;  %v640_v48 = vadd.f32 %v2622_v47, %v5426_v42  ;;  %v2623_v31 = vld [vmem:[%s2815_s20 + $0xc8] sm:$0xff]  ;;  %v2626_v47 = vld [vmem:[%s2759_s14 + $0x38] sm:$0xff] }
 0x204   : > { %v3945_v2 = vpop.permute.xlu1 %1330  ;;  %v3947_v49 = vpop.permute.xlu0 %1328 }
 0x205   : > { %5415 = vst [vmem:[#allocation173_spill] sm:$0xff] %v3945_v2  ;;  %5416 = vst [vmem:[#allocation174_spill] sm:$0xff] %v3947_v49  ;;  %v636_v2 = vadd.f32 %v2618_v59, %v5422_v50  ;;  %v2619_v49 = vld [vmem:[%s2759_s14 + $0x18] sm:$0xff]  ;;  %v634_v59 = vadd.f32 %v2623_v31, %v5427_v24  ;;  %v643_v24 = vadd.f32 %v2626_v47, %v5433_v26  ;;  %v2627_v31 = vld [vmem:[%s2759_s14 + $0x30] sm:$0xff] }
 0x206   : > { %v639_v5 = vadd.f32 %v2619_v49, %v5423_v17  ;;  %v5430_v49 = vld [vmem:[#allocation34_spill] sm:$0xff]  ;;  %v5439_v47 = vld [vmem:[#allocation43_spill] sm:$0xff] }
 0x207   : > { %v2632_v26 = vld [vmem:[%s2759_s14 + $0x68] sm:$0xff] }
 0x208   : > { %v3949_v30 = vpop.permute.xlu1 %1334  ;;  %v3951_v16 = vpop.permute.xlu0 %1332  ;;  %v649_v14 = vadd.f32 %v2632_v26, %v5439_v47  ;;  %v2638_v26 = vld [vmem:[%s2759_s14 + $0x98] sm:$0xff]  ;;  %v5445_v47 = vld [vmem:[#allocation49_spill] sm:$0xff] }
 0x209   : > { %5417 = vst [vmem:[#allocation175_spill] sm:$0xff] %v3949_v30  ;;  %5418 = vst [vmem:[#allocation176_spill] sm:$0xff] %v3951_v16  ;;  %v2620_v30 = vld [vmem:[%s2759_s14 + $0x10] sm:$0xff]  ;;  %v5424_v16 = vld [vmem:[#allocation30_spill] sm:$0xff]  ;;  %v655_v4 = vadd.f32 %v2638_v26, %v5445_v47 }
 0x20a   : > { %v638_v54 = vadd.f32 %v2620_v30, %v5424_v16  ;;  %v632_v16 = vadd.f32 %v5430_v49, %v404_v53  ;;  %v2624_v30 = vld [vmem:[%s2815_s20 + $0xd0] sm:$0xff]  ;;  %v2629_v49 = vld [vmem:[%s2759_s14 + $0x40] sm:$0xff] }
 0x20b   : > { %v5453_v26 = vld [vmem:[#allocation55_spill] sm:$0xff] }
 0x20c   : > { %v3953_v60 = vpop.permute.xlu1 %1338  ;;  %v3955_v23 = vpop.permute.xlu0 %1336 }
 0x20d   : > { %5419 = vst [vmem:[#allocation177_spill] sm:$0xff] %v3953_v60  ;;  %5420 = vst [vmem:[#allocation178_spill] sm:$0xff] %v3955_v23  ;;  %v2621_v60 = vld [vmem:[%s2759_s14 + $0x28] sm:$0xff] }
 0x20e   : > { %v641_v23 = vadd.f32 %v2621_v60, %v5425_v18  ;;  %v635_v18 = vadd.f32 %v2624_v30, %v5431_v41  ;;  %v2625_v60 = vld [vmem:[%s2815_s20 + $0xc0] sm:$0xff]  ;;  %v644_v41 = vadd.f32 %v2629_v49, %v5436_v21  ;;  %v2630_v30 = vld [vmem:[%s2759_s14 + $0x58] sm:$0xff]  ;;  %v2635_v21 = vld [vmem:[%s2759_s14 + $0x70] sm:$0xff]  ;;  %s2682_s20 = smov 124  }
 0x20f   : > { %v633_v42 = vadd.f32 %v2625_v60, %v5432_v36  ;;  %v647_v36 = vadd.f32 %v2630_v30, %v5437_v20  ;;  %v2631_v60 = vld [vmem:[%s2759_s14 + $0x50] sm:$0xff]  ;;  %v5442_v49 = vld [vmem:[#allocation46_spill] sm:$0xff] }
 0x210   : > { %v3972_v50 = vpop.permute.xlu1 %1342  ;;  %v3974_v17 = vpop.permute.xlu0 %1340  ;;  %v646_v19 = vadd.f32 %v2631_v60, %v5438_v9  ;;  %v650_v3 = vadd.f32 %v2635_v21, %v5442_v49  ;;  %v2636_v20 = vld [vmem:[%s2759_s14 + $0x88] sm:$0xff]  ;;  %v5443_v30 = vld [vmem:[#allocation47_spill] sm:$0xff]  ;;  %v2637_v60 = vld [vmem:[%s2759_s14 + $0x80] sm:$0xff]  ;;  %v657_v21 = vadd.f32 %v2640_v57, %v5449_v52 }
 0x211   : > { %5428 = vst [vmem:[#allocation27_spill] sm:$0xff] %v3972_v50  ;;  %5429 = vst [vmem:[#allocation28_spill] sm:$0xff] %v3974_v17  ;;  %v642_v50 = vadd.f32 %v2627_v31, %v5434_v35  ;;  %v2628_v17 = vld [vmem:[%s2759_s14 + $0x48] sm:$0xff]  ;;  %v2633_v35 = vld [vmem:[%s2759_s14 + $0x60] sm:$0xff]  ;;  %v653_v9 = vadd.f32 %v2636_v20, %v5443_v30  ;;  %v652_v58 = vadd.f32 %v2637_v60, %v5444_v22 }
 0x212   : > { %v645_v53 = vadd.f32 %v2628_v17, %v5435_v44  ;;  %v5440_v31 = vld [vmem:[#allocation44_spill] sm:$0xff]  ;;  %v5441_v17 = vld [vmem:[#allocation45_spill] sm:$0xff]  ;;  %v2643_v22 = vld [vmem:[%s2759_s14 + $0xb0] sm:$0xff]  ;;  %v802_v47 = vadd.f32 %v5453_v26, %v633_v42 }
 0x213   : > { %v648_v43 = vadd.f32 %v2633_v35, %v5440_v31  ;;  %v2634_v44 = vld [vmem:[%s2759_s14 + $0x78] sm:$0xff]  ;;  %v2639_v31 = vld [vmem:[%s2759_s14 + $0x90] sm:$0xff]  ;;  %v2641_v49 = vld [vmem:[%s2759_s14 + $0xa0] sm:$0xff] }
 0x214   : > { %v651_v37 = vadd.f32 %v2634_v44, %v5441_v17  ;;  %v4007_v8 = vpop.permute.xlu1 %1346  ;;  %v4009_v35 = vpop.permute.xlu0 %1344  ;;  %v5448_v44 = vld [vmem:[#allocation50_spill] sm:$0xff]  ;;  %v656_v51 = vadd.f32 %v2641_v49, %v5450_v32  ;;  %v2642_v20 = vld [vmem:[%s2759_s14 + $0xb8] sm:$0xff]  ;;  %v5451_v30 = vld [vmem:[#allocation53_spill] sm:$0xff]  ;;  %v808_v32 = vadd.f32 %v5459_v25, %v639_v5 }
 0x215   : > { %5446 = vst [vmem:[#allocation29_spill] sm:$0xff] %v4007_v8  ;;  %5447 = vst [vmem:[#allocation30_spill] sm:$0xff] %v4009_v35  ;;  %v654_v17 = vadd.f32 %v2639_v31, %v5448_v44  ;;  %v659_v46 = vadd.f32 %v2642_v20, %v5451_v30  ;;  %v5452_v60 = vld [vmem:[#allocation54_spill] sm:$0xff]  ;;  %v5454_v8 = vld [vmem:[#allocation56_spill] sm:$0xff]  ;;  %v803_v31 = vadd.f32 %v5456_v39, %v634_v59 }
 0x216   : > { %v658_v45 = vadd.f32 %v2643_v22, %v5452_v60  ;;  %v801_v55 = vadd.f32 %v5454_v8, %v632_v16  ;;  %v5455_v35 = vld [vmem:[#allocation57_spill] sm:$0xff]  ;;  %v5457_v44 = vld [vmem:[#allocation59_spill] sm:$0xff]  ;;  %v5458_v52 = vld [vmem:[#allocation60_spill] sm:$0xff]  ;;  %v809_v22 = vadd.f32 %v5462_v28, %v640_v48 }
 0x217   : > { %v804_v40 = vadd.f32 %v5455_v35, %v635_v18  ;;  %v806_v34 = vadd.f32 %v5457_v44, %v637_v12  ;;  %v805_v57 = vadd.f32 %v5458_v52, %v636_v2  ;;  %v5460_v49 = vld [vmem:[#allocation62_spill] sm:$0xff]  ;;  %v5461_v20 = vld [vmem:[#allocation63_spill] sm:$0xff]  ;;  %v5463_v60 = vld [vmem:[#allocation65_spill] sm:$0xff] }
 0x218   : > { %v807_v33 = vadd.f32 %v5460_v49, %v638_v54  ;;  %v810_v30 = vadd.f32 %v5461_v20, %v641_v23  ;;  %v812_v42 = vadd.f32 %v5463_v60, %v643_v24  ;;  %v4032_v26 = vpop.permute.xlu1 %1350  ;;  %v4034_v8 = vpop.permute.xlu0 %1348  ;;  %v5466_v16 = vld [vmem:[#allocation66_spill] sm:$0xff]  ;;  %v5467_v59 = vld [vmem:[#allocation67_spill] sm:$0xff]  ;;  %v5468_v18 = vld [vmem:[#allocation68_spill] sm:$0xff] }
 0x219   : > { %5464 = vst [vmem:[#allocation31_spill] sm:$0xff] %v4032_v26  ;;  %5465 = vst [vmem:[#allocation32_spill] sm:$0xff] %v4034_v8  ;;  %v811_v39 = vadd.f32 %v5466_v16, %v642_v50  ;;  %v814_v12 = vadd.f32 %v5467_v59, %v645_v53  ;;  %v813_v2 = vadd.f32 %v5468_v18, %v644_v41  ;;  %v5469_v35 = vld [vmem:[#allocation69_spill] sm:$0xff]  ;;  %v5470_v25 = vld [vmem:[#allocation70_spill] sm:$0xff] }
 0x21a   : > { %v816_v5 = vadd.f32 %v5469_v35, %v647_v36  ;;  %v815_v54 = vadd.f32 %v5470_v25, %v646_v19  ;;  %v5471_v44 = vld [vmem:[#allocation71_spill] sm:$0xff]  ;;  %v5472_v52 = vld [vmem:[#allocation72_spill] sm:$0xff]  ;;  %v5473_v48 = vld [vmem:[#allocation73_spill] sm:$0xff] }
 0x21b   : > { %v818_v23 = vadd.f32 %v5471_v44, %v649_v14  ;;  %v817_v28 = vadd.f32 %v5472_v52, %v648_v43  ;;  %v820_v24 = vadd.f32 %v5473_v48, %v651_v37  ;;  %v5474_v49 = vld [vmem:[#allocation74_spill] sm:$0xff]  ;;  %v5475_v60 = vld [vmem:[#allocation75_spill] sm:$0xff]  ;;  %v5476_v26 = vld [vmem:[#allocation76_spill] sm:$0xff] }
 0x21c   : > { %v819_v20 = vadd.f32 %v5474_v49, %v650_v3  ;;  %v822_v8 = vadd.f32 %v5475_v60, %v653_v9  ;;  %v821_v50 = vadd.f32 %v5476_v26, %v652_v58  ;;  %v5477_v16 = vld [vmem:[#allocation77_spill] sm:$0xff]  ;;  %v5478_v59 = vld [vmem:[#allocation78_spill] sm:$0xff]  ;;  %v5479_v18 = vld [vmem:[#allocation79_spill] sm:$0xff]  ;;  %v4052_v44 = vpop.permute.xlu1 %1354  ;;  %v4054_v43 = vpop.permute.xlu0 %1352 }
 0x21d   : > { %v824_v53 = vadd.f32 %v5477_v16, %v655_v4  ;;  %v823_v41 = vadd.f32 %v5478_v59, %v654_v17  ;;  %v826_v36 = vadd.f32 %v5479_v18, %v657_v21  ;;  %v5480_v35 = vld [vmem:[#allocation80_spill] sm:$0xff]  ;;  %v5481_v25 = vld [vmem:[#allocation81_spill] sm:$0xff]  ;;  %5482 = vst [vmem:[#allocation33_spill] sm:$0xff] %v4052_v44  ;;  %5483 = vst [vmem:[#allocation34_spill] sm:$0xff] %v4054_v43 }
 0x21e   : > { %v825_v19 = vadd.f32 %v5480_v35, %v656_v51  ;;  %v828_v14 = vadd.f32 %v5481_v25, %v659_v46  ;;  %v5484_v37 = vld [vmem:[#allocation82_spill] sm:$0xff]  ;;  %v5485_v52 = vld [vmem:[#allocation83_spill] sm:$0xff]  ;;  %v5486_v48 = vld [vmem:[#allocation84_spill] sm:$0xff] }
 0x21f   : > { %v827_v3 = vadd.f32 %v5484_v37, %v658_v45  ;;  %v916_v9 = vadd.f32 %v5485_v52, %v802_v47  ;;  %v915_v58 = vadd.f32 %v5486_v48, %v801_v55  ;;  %v5487_v26 = vld [vmem:[#allocation85_spill] sm:$0xff]  ;;  %v5488_v49 = vld [vmem:[#allocation86_spill] sm:$0xff]  ;;  %v5490_v16 = vld [vmem:[#allocation7_spill] sm:$0xff] }
 0x220   : > { %v918_v4 = vadd.f32 %v5487_v26, %v804_v40  ;;  %v917_v17 = vadd.f32 %v5488_v49, %v803_v31  ;;  %v5489_v60 = vld [vmem:[#allocation9_spill] sm:$0xff]  ;;  %v919_v51 = vadd.f32 %v5490_v16, %v805_v57  ;;  %v5491_v59 = vld [vmem:[#allocation8_spill] sm:$0xff]  ;;  %v5492_v18 = vld [vmem:[#allocation87_spill] sm:$0xff]  ;;  %v1420_v57 = vpop.permute.xlu0 %1419 }
 0x221   : > { %v920_v21 = vadd.f32 %v5489_v60, %v806_v34  ;;  %v922_v46 = vadd.f32 %v5491_v59, %v808_v32  ;;  %v921_v35 = vadd.f32 %v5492_v18, %v807_v33  ;;  %v5493_v25 = vld [vmem:[#allocation88_spill] sm:$0xff]  ;;  %v5494_v44 = vld [vmem:[#allocation89_spill] sm:$0xff]  ;;  %v5495_v37 = vld [vmem:[#allocation90_spill] sm:$0xff]  ;;  %v1422_v60 = vpop.permute.xlu1 %1421 }
 0x222   : > { %v924_v43 = vadd.f32 %v5493_v25, %v810_v30  ;;  %v923_v45 = vadd.f32 %v5494_v44, %v809_v22  ;;  %v926_v47 = vadd.f32 %v5495_v37, %v812_v42  ;;  %v5496_v52 = vld [vmem:[#allocation91_spill] sm:$0xff]  ;;  %v5497_v48 = vld [vmem:[#allocation92_spill] sm:$0xff]  ;;  %v5498_v26 = vld [vmem:[#allocation93_spill] sm:$0xff] }
 0x223   : > { %v925_v55 = vadd.f32 %v5496_v52, %v811_v39  ;;  %v928_v40 = vadd.f32 %v5497_v48, %v814_v12  ;;  %v927_v31 = vadd.f32 %v5498_v26, %v813_v2  ;;  %v5499_v49 = vld [vmem:[#allocation94_spill] sm:$0xff]  ;;  %v5500_v16 = vld [vmem:[#allocation95_spill] sm:$0xff]  ;;  %v5501_v59 = vld [vmem:[#allocation96_spill] sm:$0xff] }
 0x224   : > { %v930_v34 = vadd.f32 %v5499_v49, %v816_v5  ;;  %v929_v32 = vadd.f32 %v5500_v16, %v815_v54  ;;  %v932_v33 = vadd.f32 %v5501_v59, %v818_v23  ;;  %v5502_v18 = vld [vmem:[#allocation97_spill] sm:$0xff]  ;;  %v5503_v25 = vld [vmem:[#allocation98_spill] sm:$0xff]  ;;  %v5504_v44 = vld [vmem:[#allocation99_spill] sm:$0xff]  ;;  %v940_v49 = vadd.f32 %v3548_v62, %v826_v36 }
 0x225   : > { %v931_v30 = vadd.f32 %v5502_v18, %v817_v28  ;;  %v934_v22 = vadd.f32 %v5503_v25, %v820_v24  ;;  %v933_v42 = vadd.f32 %v5504_v44, %v819_v20  ;;  %v5505_v37 = vld [vmem:[#allocation100_spill] sm:$0xff]  ;;  %v5506_v52 = vld [vmem:[#allocation101_spill] sm:$0xff]  ;;  %v5507_v48 = vld [vmem:[#allocation102_spill] sm:$0xff]  ;;  %v939_v54 = vadd.f32 %v3550_v29, %v825_v19  ;;  %v1426_v59 = vpop.permute.xlu1 %1425 }
 0x226   : > { %v936_v39 = vadd.f32 %v5505_v37, %v822_v8  ;;  %v935_v12 = vadd.f32 %v5506_v52, %v821_v50  ;;  %v938_v2 = vadd.f32 %v5507_v48, %v824_v53  ;;  %v5508_v26 = vld [vmem:[#allocation103_spill] sm:$0xff]  ;;  %v1034_v23 = vadd.f32 %v3564_v13, %v916_v9  ;;  %v5509_v16 = vld [vmem:[#allocation104_spill] sm:$0xff]  ;;  %v1424_v50 = vpop.permute.xlu0 %1423  ;;  %v5510_v19 = vld [vmem:[#allocation105_spill] sm:$0xff] }
 0x227   : > { %v937_v5 = vadd.f32 %v5508_v26, %v823_v41  ;;  %v942_v28 = vadd.f32 %v3556_v15, %v828_v14  ;;  %v941_v24 = vadd.f32 %v5509_v16, %v827_v3  ;;  %v1033_v20 = vadd.f32 %v3566_v56, %v915_v58  ;;  %v5511_v3 = vld [vmem:[#allocation106_spill] sm:$0xff]  ;;  %v5513_v58 = vld [vmem:[#allocation107_spill] sm:$0xff]  ;;  %v5524_v37 = vld [vmem:[#allocation160_spill] sm:$0xff] }
 0x228   : > { %v1036_v8 = vadd.f32 %v3572_v38, %v918_v4  ;;  %v1035_v53 = vadd.f32 %v3574_v61, %v917_v17  ;;  %v1038_v41 = vadd.f32 %v3580_v1, %v920_v21  ;;  %v1037_v62 = vadd.f32 %v3582_v6, %v919_v51  ;;  %v5512_v9 = vld [vmem:[#allocation6_spill] sm:$0xff]  ;;  %v5514_v4 = vld [vmem:[#allocation108_spill] sm:$0xff]  ;;  %v5515_v17 = vld [vmem:[#allocation109_spill] sm:$0xff] }
 0x229   : > { %v1153_v29 = vadd.f32 %v3682_v63, %v1034_v23  ;;  %v1040_v13 = vadd.f32 %v3588_v7, %v922_v46  ;;  %v1039_v15 = vadd.f32 %v3590_v10, %v921_v35  ;;  %v1042_v36 = vadd.f32 %v3596_v11, %v924_v43  ;;  %v5516_v10 = vld [vmem:[#allocation148_spill] sm:$0xff]  ;;  %v1430_v11 = vpop.permute.xlu1 %1429  ;;  %v5525_v48 = vld [vmem:[#allocation115_spill] sm:$0xff] }
 0x22a   : > { %v1152_v56 = vadd.f32 %v3684_v0, %v1033_v20  ;;  %v1041_v38 = vadd.f32 %v3598_v27, %v923_v45  ;;  %v1044_v14 = vadd.f32 %v5510_v19, %v926_v47  ;;  %v1043_v61 = vadd.f32 %v5511_v3, %v925_v55  ;;  %v1428_v43 = vpop.permute.xlu0 %1427  ;;  %v5517_v0 = vld [vmem:[#allocation110_spill] sm:$0xff]  ;;  %v5518_v27 = vld [vmem:[#allocation111_spill] sm:$0xff]  ;;  %v5519_v35 = vld [vmem:[#allocation112_spill] sm:$0xff] }
 0x22b   : > { %v1267_v1 = vadd.f32 %v5512_v9, %v1153_v29  ;;  %v1046_v6 = vadd.f32 %v5513_v58, %v928_v40  ;;  %v1045_v63 = vadd.f32 %v5514_v4, %v927_v31  ;;  %v4103_v7 = vadd.f32 %v5515_v17, %v930_v34  ;;  %v5520_v47 = vld [vmem:[#allocation159_spill] sm:$0xff]  ;;  %v5521_v40 = vld [vmem:[#allocation113_spill] sm:$0xff]  ;;  %v5522_v31 = vld [vmem:[#allocation114_spill] sm:$0xff] }
 0x22c   : > { %v1266_v21 = vadd.f32 %v5516_v10, %v1152_v56  ;;  %v1047_v51 = vadd.f32 %v5517_v0, %v929_v32  ;;  %v4108_v46 = vadd.f32 %v5518_v27, %v932_v33  ;;  %v4111_v45 = vadd.f32 %v5519_v35, %v931_v30  ;;  %v5523_v34 = vld [vmem:[#allocation5_spill] sm:$0xff]  ;;  %v5526_v32 = vld [vmem:[#allocation116_spill] sm:$0xff]  ;;  %v5527_v23 = vld [vmem:[#allocation123_spill] sm:$0xff] }
 0x22d   : > { %v1385_v55 = vadd.f32 %v5520_v47, %v1267_v1  ;;  %v1052_v18 = vadd.f32 %v5521_v40, %v934_v22  ;;  %v4116_v25 = vadd.f32 %v5522_v31, %v933_v42  ;;  %v1155_v44 = vadd.f32 %v5523_v34, %v1036_v8  ;;  %v5528_v20 = vld [vmem:[#allocation117_spill] sm:$0xff]  ;;  %v5529_v22 = vld [vmem:[#allocation118_spill] sm:$0xff]  ;;  %v1434_v3 = vpop.permute.xlu1 %1433  ;;  %v5531_v9 = vld [vmem:[#allocation119_spill] sm:$0xff] }
 0x22e   : > { %v1384_v52 = vadd.f32 %v5524_v37, %v1266_v21  ;;  %v4121_v26 = vadd.f32 %v5525_v48, %v936_v39  ;;  %v4124_v33 = vadd.f32 %v5526_v32, %v935_v12  ;;  %v1154_v30 = vadd.f32 %v5527_v23, %v1035_v53  ;;  %v5530_v42 = vld [vmem:[#allocation149_spill] sm:$0xff]  ;;  %v1432_v12 = vpop.permute.xlu0 %1431  ;;  %v5535_v17 = vld [vmem:[#allocation122_spill] sm:$0xff]  ;;  %v5536_v21 = vld [vmem:[#allocation124_spill] sm:$0xff] }
 0x22f   : > { %v1504_v16 = vadd.f32 %v1422_v60, %v1385_v55  ;;  %v4128_v29 = vadd.f32 %v5528_v20, %v938_v2  ;;  %v4131_v56 = vadd.f32 %v5529_v22, %v937_v5  ;;  %v1269_v19 = vadd.f32 %v5530_v42, %v1155_v44  ;;  %v4137_v8 = vld [vmem:[%s5138_s4] ss:$0 sm:$0xff]  ;;  %v5532_v60 = vld [vmem:[#allocation120_spill] sm:$0xff]  ;;  %v5534_v5 = vld [vmem:[#allocation150_spill] sm:$0xff] }
 0x230   : > { %v1503_v39 = vadd.f32 %v1420_v57, %v1384_v52  ;;  %v4140_v1 = vadd.f32 %v5531_v9, %v940_v49  ;;  %v4143_v53 = vadd.f32 %v5532_v60, %v939_v54  ;;  %v5533_v2 = vld [vmem:[#allocation121_spill] sm:$0xff]  ;;  %v1268_v4 = vadd.f32 %v5534_v5, %v1154_v30  ;;  %v5539_v55 = vld [vmem:[#allocation126_spill] sm:$0xff]  ;;  %v5540_v40 = vld [vmem:[#allocation127_spill] sm:$0xff] }
 0x231   : > { %v4146_v58 = vadd.f32 %v5533_v2, %v942_v28  ;;  %v4150_v10 = vadd.f32 %v5535_v17, %v941_v24  ;;  %v1157_v0 = vadd.f32 %v5536_v21, %v1038_v41  ;;  %v5537_v27 = vld [vmem:[#allocation125_spill] sm:$0xff]  ;;  %v1159_v49 = vadd.f32 %v5539_v55, %v1040_v13  ;;  %v5541_v54 = vld [vmem:[#allocation162_spill] sm:$0xff]  ;;  %v5542_v44 = vld [vmem:[#allocation128_spill] sm:$0xff] }
 0x232   : > { %v1156_v57 = vadd.f32 %v5537_v27, %v1037_v62  ;;  %v5538_v35 = vld [vmem:[#allocation161_spill] sm:$0xff]  ;;  %v1158_v31 = vadd.f32 %v5540_v40, %v1039_v15  ;;  %v1386_v34 = vadd.f32 %v5541_v54, %v1268_v4  ;;  %v4159_v28 = vadd.f32 %v4137_v8, %v1504_v16  ;;  %v5543_v52 = vld [vmem:[#allocation10_spill] sm:$0xff]  ;;  %v1438_v62 = vpop.permute.xlu1 %1437  ;;  %v1436_v32 = vpop.permute.xlu0 %1435  ;;  %v5546_v15 = vld [vmem:[#allocation11_spill] sm:$0xff] }
 0x233   : > { %v1387_v47 = vadd.f32 %v5538_v35, %v1269_v19  ;;  %v1161_v37 = vadd.f32 %v5542_v44, %v1042_v36  ;;  %v1271_v24 = vadd.f32 %v5543_v52, %v1157_v0  ;;  %v4164_v48 = vadd.f32 %v4137_v8, %v1503_v39  ;;  %v5544_v23 = vld [vmem:[#allocation129_spill] sm:$0xff]  ;;  %v5545_v13 = vld [vmem:[#allocation130_spill] sm:$0xff]  ;;  %v5547_v19 = vld [vmem:[#allocation131_spill] sm:$0xff] }
 0x234   : > { %v1160_v30 = vadd.f32 %v5544_v23, %v1041_v38  ;;  %v1163_v20 = vadd.f32 %v5545_v13, %v1044_v14  ;;  %v1270_v22 = vadd.f32 %v5546_v15, %v1156_v57  ;;  %v1505_v42 = vadd.f32 %v1424_v50, %v1386_v34  ;;  %v5548_v9 = vld [vmem:[#allocation132_spill] sm:$0xff]  ;;  %v5550_v5 = vld [vmem:[#allocation163_spill] sm:$0xff]  ;;  %v5551_v4 = vld [vmem:[#allocation13_spill] sm:$0xff] }
 0x235   : > { %v1506_v41 = vadd.f32 %v1426_v59, %v1387_v47  ;;  %v1162_v16 = vadd.f32 %v5547_v19, %v1043_v61  ;;  %v4171_v60 = vadd.f32 %v5548_v9, %v1046_v6  ;;  %v5549_v36 = vld [vmem:[#allocation12_spill] sm:$0xff]  ;;  %v1389_v39 = vadd.f32 %v5550_v5, %v1271_v24  ;;  %v5552_v17 = vld [vmem:[#allocation14_spill] sm:$0xff]  ;;  %v5554_v14 = vld [vmem:[#allocation165_spill] sm:$0xff] }
 0x236   : > { %v1273_v2 = vadd.f32 %v5549_v36, %v1159_v49  ;;  %v1272_v59 = vadd.f32 %v5551_v4, %v1158_v31  ;;  %v1275_v21 = vadd.f32 %v5552_v17, %v1161_v37  ;;  %v5553_v0 = vld [vmem:[#allocation164_spill] sm:$0xff]  ;;  %2505 = vtanh.f32 %v4159_v28  ;;  %v1442_v6 = vpop.permute.xlu1 %1441  ;;  %v1440_v57 = vpop.permute.xlu0 %1439  ;;  %v5555_v35 = vld [vmem:[#allocation133_spill] sm:$0xff]  ;;  %v5556_v55 = vld [vmem:[#allocation166_spill] sm:$0xff] }
 0x237   : > { %v1388_v38 = vadd.f32 %v5553_v0, %v1270_v22  ;;  %2507 = vtanh.f32 %v4164_v48  ;;  %v4182_v50 = vadd.f32 %v4137_v8, %v1506_v41  ;;  %v1508_v61 = vadd.f32 %v1430_v11, %v1389_v39  ;;  %v5557_v54 = vld [vmem:[#allocation134_spill] sm:$0xff]  ;;  %v5558_v44 = vld [vmem:[#allocation135_spill] sm:$0xff]  ;;  %v5560_v11 = vld [vmem:[#allocation136_spill] sm:$0xff] }
 0x238   : > { %v1391_v27 = vadd.f32 %v5554_v14, %v1273_v2  ;;  %v1164_v47 = vadd.f32 %v5555_v35, %v1045_v63  ;;  %v1390_v49 = vadd.f32 %v5556_v55, %v1272_v59  ;;  %v4187_v40 = vadd.f32 %v4137_v8, %v1505_v42  ;;  %v5559_v52 = vld [vmem:[#allocation167_spill] sm:$0xff]  ;;  %v5561_v63 = vld [vmem:[#allocation137_spill] sm:$0xff]  ;;  %v5562_v15 = vld [vmem:[#allocation138_spill] sm:$0xff] }
 0x239   : > { %v1507_v31 = vadd.f32 %v1428_v43, %v1388_v38  ;;  %v1167_v34 = vadd.f32 %v5557_v54, %v4103_v7  ;;  %v1166_v37 = vadd.f32 %v5558_v44, %v1047_v51  ;;  %v1393_v24 = vadd.f32 %v5559_v52, %v1275_v21  ;;  %v5563_v43 = vld [vmem:[#allocation15_spill] sm:$0xff]  ;;  %v5567_v5 = vld [vmem:[#allocation17_spill] sm:$0xff]  ;;  %v5571_v0 = vld [vmem:[#allocation16_spill] sm:$0xff] }
 0x23a   : > { %v1510_v41 = vadd.f32 %v1434_v3, %v1391_v27  ;;  %v1169_v23 = vadd.f32 %v5560_v11, %v4108_v46  ;;  %v1168_v13 = vadd.f32 %v5561_v63, %v4111_v45  ;;  %v1171_v22 = vadd.f32 %v5562_v15, %v1052_v18  ;;  %v4207_v19 = vpop.permute.xlu0 %1443  ;;  %v5564_v46 = vld [vmem:[#allocation139_spill] sm:$0xff]  ;;  %v5565_v45 = vld [vmem:[#allocation140_spill] sm:$0xff]  ;;  %v5572_v27 = vld [vmem:[#allocation170_spill] sm:$0xff] }
 0x23b   : > { %v1509_v42 = vadd.f32 %v1432_v12, %v1390_v49  ;;  %v1274_v7 = vadd.f32 %v5563_v43, %v1160_v30  ;;  %2509 = vtanh.f32 %v4182_v50  ;;  %v4205_v51 = vadd.f32 %v4137_v8, %v1508_v61  ;;  %v1446_v12 = vpop.permute.xlu1 %1445  ;;  %v5566_v30 = vld [vmem:[#allocation141_spill] sm:$0xff]  ;;  %v5576_v54 = vld [vmem:[#allocation146_spill] sm:$0xff]  ;;  %v5577_v52 = vld [vmem:[#allocation147_spill] sm:$0xff] }
 0x23c   : > { %v1512_v3 = vadd.f32 %v1438_v62, %v1393_v24  ;;  %v1170_v9 = vadd.f32 %v5564_v46, %v4116_v25  ;;  %v1173_v36 = vadd.f32 %v5565_v45, %v4121_v26  ;;  %2511 = vtanh.f32 %v4187_v40  ;;  %v5568_v62 = vld [vmem:[#allocation168_spill] sm:$0xff]  ;;  %v5569_v25 = vld [vmem:[#allocation142_spill] sm:$0xff]  ;;  %v5570_v26 = vld [vmem:[#allocation143_spill] sm:$0xff] }
 0x23d   : > { %v4215_v18 = vadd.f32 %v4137_v8, %v1507_v31  ;;  %v1172_v2 = vadd.f32 %v5566_v30, %v4124_v33  ;;  %v1276_v39 = vadd.f32 %v5567_v5, %v1162_v16  ;;  %v1392_v4 = vadd.f32 %v5568_v62, %v1274_v7  ;;  %v5575_v49 = vld [vmem:[#allocation169_spill] sm:$0xff]  ;;  %v5578_v15 = vld [vmem:[#allocation18_spill] sm:$0xff]  ;;  %v5579_v43 = vld [vmem:[#allocation19_spill] sm:$0xff] }
 0x23e   : > { %v4222_v59 = vadd.f32 %v4137_v8, %v1510_v41  ;;  %v1175_v17 = vadd.f32 %v5569_v25, %v4128_v29  ;;  %v1174_v21 = vadd.f32 %v5570_v26, %v4131_v56  ;;  %v1277_v38 = vadd.f32 %v5571_v0, %v1163_v20  ;;  %v4237_v35 = vpop.permute.xlu0 %1447  ;;  %v5573_v29 = vld [vmem:[#allocation144_spill] sm:$0xff]  ;;  %v5574_v20 = vld [vmem:[#allocation145_spill] sm:$0xff]  ;;  %v5582_v30 = vld [vmem:[#allocation22_spill] sm:$0xff] }
 0x23f   : > { %v4230_v14 = vadd.f32 %v4137_v8, %v1509_v42  ;;  %v1394_v33 = vadd.f32 %v5572_v27, %v1276_v39  ;;  %2513 = vtanh.f32 %v4205_v51  ;;  %v4235_v16 = vadd.f32 %v4137_v8, %v1512_v3  ;;  %v5581_v46 = vld [vmem:[#allocation21_spill] sm:$0xff]  ;;  %v5583_v39 = vld [vmem:[#allocation23_spill] sm:$0xff]  ;;  %v5586_v26 = vld [vmem:[#allocation26_spill] sm:$0xff] }
 0x240   : > { %v1511_v61 = vadd.f32 %v1436_v32, %v1392_v4  ;;  %v1177_v56 = vadd.f32 %v5573_v29, %v4140_v1  ;;  %v1176_v55 = vadd.f32 %v5574_v20, %v4143_v53  ;;  %v1395_v31 = vadd.f32 %v5575_v49, %v1277_v38  ;;  %v1450_v1 = vpop.permute.xlu1 %1449  ;;  %v5584_v4 = vld [vmem:[#allocation24_spill] sm:$0xff]  ;;  %v5585_v25 = vld [vmem:[#allocation25_spill] sm:$0xff]  ;;  %v5587_v27 = vld [vmem:[#allocation151_spill] sm:$0xff] }
 0x241   : > { %2515 = vtanh.f32 %v4215_v18  ;;  %v1179_v44 = vadd.f32 %v5576_v54, %v4146_v58  ;;  %v1178_v24 = vadd.f32 %v5577_v52, %v4150_v10  ;;  %v1513_v32 = vadd.f32 %v1440_v57, %v1394_v33  ;;  %v5592_v54 = vld [vmem:[#allocation154_spill] sm:$0xff]  ;;  %v5593_v52 = vld [vmem:[#allocation155_spill] sm:$0xff] }
 0x242   : > { %2517 = vtanh.f32 %v4222_v59  ;;  %v1514_v41 = vadd.f32 %v1442_v6, %v1395_v31  ;;  %v4252_v11 = vstv %s4193_s18  ;;  %v4255_v53 = vstv %s4200_s19  ;;  %v4264_v57 = vpop.permute.xlu0 %1451  ;;  %v5580_v6 = vld [vmem:[#allocation20_spill] sm:$0xff]  ;;  %v5591_v31 = vld [vmem:[#allocation153_spill] sm:$0xff] }
 0x243   : > { %2519 = vtanh.f32 %v4230_v14  ;;  %v2506_v63 = vpop.eup %2505  ;;  %v1279_v42 = vadd.f32 %v5578_v15, %v4171_v60  ;;  %v1278_v58 = vadd.f32 %v5579_v43, %v1164_v47  ;;  %v4262_v10 = vadd.f32 %v4137_v8, %v1511_v61  ;;  %v5588_v61 = vld [vmem:[#allocation152_spill] sm:$0xff]  ;;  %v5594_v43 = vld [vmem:[#allocation157_spill] sm:$0xff] }
 0x244   : > { %2521 = vtanh.f32 %v4235_v16  ;;  %v2508_v7 = vpop.eup %2507  ;;  %v1281_v3 = vadd.f32 %v5580_v6, %v1167_v34  ;;  %v1280_v45 = vadd.f32 %v5581_v46, %v1166_v37  ;;  %v1283_v5 = vadd.f32 %v5582_v30, %v1169_v23  ;;  %v5589_v34 = vld [vmem:[#allocation171_spill] sm:$0xff]  ;;  %v5590_v23 = vld [vmem:[#allocation172_spill] sm:$0xff]  ;;  %v5595_v6 = vld [vmem:[#allocation158_spill] sm:$0xff] }
 0x245   : > { %v1282_v62 = vadd.f32 %v5583_v39, %v1168_v13  ;;  %v1285_v60 = vadd.f32 %v5584_v4, %v1171_v22  ;;  %v1284_v47 = vadd.f32 %v5585_v25, %v1170_v9  ;;  %v1287_v0 = vadd.f32 %v5586_v26, %v1173_v36  ;;  %v5596_v30 = vld [vmem:[#allocation173_spill] sm:$0xff]  ;;  %v5597_v39 = vld [vmem:[#allocation174_spill] sm:$0xff] }
 0x246   : > { %v4274_v38 = vadd.f32 %v4137_v8, %v1513_v32  ;;  %v1286_v33 = vadd.f32 %v5587_v27, %v1172_v2  ;;  %v1289_v29 = vadd.f32 %v5588_v61, %v1175_v17  ;;  %v1397_v20 = vadd.f32 %v5589_v34, %v1279_v42  ;;  %v4284_v22 = vpop.permute.xlu0 %1455 }
 0x247   : > { %v4280_v37 = vadd.f32 %v4137_v8, %v1514_v41  ;;  %v1396_v13 = vadd.f32 %v5590_v23, %v1278_v58  ;;  %2523 = vtanh.f32 %v4262_v10  ;;  %v1598_v9 = vmul.f32 %v2508_v7, %v4252_v11  ;;  %v1454_v41 = vpop.permute.xlu1 %1453 }
 0x248   : > { %v1599_v36 = vmul.f32 %v2506_v63, %v4252_v11  ;;  %v2510_v49 = vpop.eup %2509  ;;  %v1288_v2 = vadd.f32 %v5591_v31, %v1174_v21  ;;  %v1291_v17 = vadd.f32 %v5592_v54, %v1177_v56  ;;  %v1290_v32 = vadd.f32 %v5593_v52, %v1176_v55  ;;  %v5598_v21 = vld [vmem:[#allocation175_spill] sm:$0xff]  ;;  %v5599_v56 = vld [vmem:[#allocation176_spill] sm:$0xff]  ;;  %v5600_v55 = vld [vmem:[#allocation177_spill] sm:$0xff] }
 0x249   : > { %v1516_v15 = vadd.f32 %v1446_v12, %v1397_v20  ;;  %v2512_v42 = vpop.eup %2511  ;;  %v1293_v58 = vadd.f32 %v5594_v43, %v1179_v44  ;;  %v1292_v46 = vadd.f32 %v5595_v6, %v1178_v24  ;;  %2525 = vtanh.f32 %v4274_v38  ;;  %v5604_v31 = vld [vmem:[#allocation29_spill] sm:$0xff]  ;;  %v5605_v52 = vld [vmem:[#allocation30_spill] sm:$0xff]  ;;  %v5607_v6 = vld [vmem:[#allocation32_spill] sm:$0xff] }
 0x24a   : > { %v1515_v7 = vadd.f32 %v4207_v19, %v1396_v13  ;;  %v1399_v63 = vadd.f32 %v5596_v30, %v1281_v3  ;;  %v1398_v4 = vadd.f32 %v5597_v39, %v1280_v45  ;;  %v1401_v25 = vadd.f32 %v5598_v21, %v1283_v5  ;;  %v4301_v27 = vpop.permute.xlu0 %1459  ;;  %v5601_v19 = vld [vmem:[#allocation178_spill] sm:$0xff] }
 0x24b   : > { %2527 = vtanh.f32 %v4280_v37  ;;  %v1400_v12 = vadd.f32 %v5599_v56, %v1282_v62  ;;  %v1403_v26 = vadd.f32 %v5600_v55, %v1285_v60  ;;  %v1627_v44 = vadd.f32 %v4255_v53, %v1598_v9  ;;  %v5602_v62 = vld [vmem:[#allocation27_spill] sm:$0xff]  ;;  %v5603_v60 = vld [vmem:[#allocation28_spill] sm:$0xff]  ;;  %v1458_v43 = vpop.permute.xlu1 %1457 }
 0x24c   : > { %v1628_v24 = vadd.f32 %v4255_v53, %v1599_v36  ;;  %v2514_v61 = vpop.eup %2513  ;;  %v1402_v34 = vadd.f32 %v5601_v19, %v1284_v47  ;;  %v4307_v3 = vadd.f32 %v4137_v8, %v1516_v15  ;;  %v1600_v45 = vmul.f32 %v2512_v42, %v4252_v11 }
 0x24d   : > { %v1601_v5 = vmul.f32 %v2510_v49, %v4252_v11  ;;  %v4312_v23 = vadd.f32 %v5602_v62, %v1287_v0  ;;  %v4315_v13 = vadd.f32 %v5603_v60, %v1286_v33  ;;  %v4318_v9 = vadd.f32 %v4137_v8, %v1515_v7  ;;  %v5606_v49 = vld [vmem:[#allocation31_spill] sm:$0xff]  ;;  %v5608_v7 = vld [vmem:[#allocation33_spill] sm:$0xff] }
 0x24e   : > { %v2516_v20 = vpop.eup %2515  ;;  %v1518_v36 = vadd.f32 %v1450_v1, %v1399_v63  ;;  %v4321_v54 = vadd.f32 %v5604_v31, %v1289_v29  ;;  %v4324_v15 = vadd.f32 %v5605_v52, %v1288_v2  ;;  %v4327_v42 = vadd.f32 %v5606_v49, %v1291_v17  ;;  %v4336_v63 = vpop.permute.xlu0 %1463  ;;  %v5609_v29 = vld [vmem:[#allocation156_spill] sm:$0xff] }
 0x24f   : > { %v2518_v47 = vpop.eup %2517  ;;  %v1517_v0 = vadd.f32 %v4237_v35, %v1398_v4  ;;  %v4331_v30 = vadd.f32 %v5607_v6, %v1290_v32  ;;  %v4334_v1 = vadd.f32 %v5608_v7, %v1293_v58  ;;  %v4339_v39 = vmul.f32 %v5609_v29, %v1627_v44 }
 0x250   : > { %v2520_v33 = vpop.eup %2519  ;;  %v4342_v2 = vmul.f32 %v5609_v29, %v1628_v24  ;;  %2529 = vtanh.f32 %v4307_v3  ;;  %v1629_v35 = vadd.f32 %v4255_v53, %v1600_v45  ;;  %v1630_v4 = vadd.f32 %v4255_v53, %v1601_v5  ;;  %v5610_v45 = vld [vmem:[#allocation34_spill] sm:$0xff] }
 0x251   : > { %v2522_v17 = vpop.eup %2521  ;;  %v1603_v32 = vmul.f32 %v2514_v61, %v4252_v11  ;;  %2531 = vtanh.f32 %v4318_v9  ;;  %v4350_v58 = vadd.f32 %v4137_v8, %v1518_v36  ;;  %v1520_v21 = vadd.f32 %v1454_v41, %v1401_v25 }
 0x252   : > { %v1602_v56 = vmul.f32 %v2516_v20, %v4252_v11  ;;  %v4354_v55 = vadd.f32 %v4137_v8, %v1517_v0  ;;  %v1519_v44 = vadd.f32 %v4264_v57, %v1400_v12  ;;  %v1604_v24 = vmul.f32 %v2520_v33, %v4252_v11  ;;  %v4362_v62 = vpop.permute.xlu0 %1467  ;;  %v1462_v20 = vpop.permute.xlu1 %1461 }
 0x253   : > { %v1605_v19 = vmul.f32 %v2518_v47, %v4252_v11  ;;  %v4360_v5 = vadd.f32 %v5610_v45, %v1292_v46  ;;  %v1522_v61 = vadd.f32 %v1458_v43, %v1403_v26  ;;  %v5185_v60 = vrot.slane %v4342_v2, 7 }
 0x254   : > { %v1607_v41 = vmul.f32 %v2522_v17, %v4252_v11  ;;  %v2524_v25 = vpop.eup %2523  ;;  %v2160_v36 = vrot.slane %v4339_v39, 7  ;;  %v4368_v57 = vmul.f32 %v5609_v29, %v1629_v35  ;;  %v4371_v12 = vmul.f32 %v5609_v29, %v1630_v4 }
 0x255   : > { %v1749_v46 = vmul.f32 1.442695, %v4342_v2  ;;  %2533 = vtanh.f32 %v4350_v58  ;;  %v4376_v26 = vadd.f32 %v4137_v8, %v1520_v21  ;;  %v1631_v47 = vadd.f32 %v4255_v53, %v1602_v56 }
 0x256   : > { %v1632_v31 = vadd.f32 %v4255_v53, %v1603_v32  ;;  %v2526_v52 = vpop.eup %2525  ;;  %2535 = vtanh.f32 %v4354_v55  ;;  %v4382_v49 = vadd.f32 %v4137_v8, %v1519_v44  ;;  %v1633_v0 = vadd.f32 %v4255_v53, %v1604_v24  ;;  %v4390_v17 = vpop.permute.xlu0 %1471 }
 0x257   : > { %v1634_v43 = vadd.f32 %v4255_v53, %v1605_v19  ;;  %v4387_v6 = vadd.f32 %v4137_v8, %v1522_v61  ;;  %v1521_v7 = vadd.f32 %v4284_v22, %v1402_v34  ;;  %v1606_v35 = vmul.f32 %v2524_v25, %v4252_v11  ;;  %v1466_v24 = vpop.permute.xlu1 %1465 }
 0x258   : > { %v2528_v33 = vpop.eup %2527  ;;  %v1636_v4 = vadd.f32 %v4255_v53, %v1607_v41  ;;  %v4397_v32 = vsel %vm1831_vm2, %v2160_v36, %v5185_v60  ;;  %v2163_v21 = vrot.slane %v4368_v57, 7  ;;  %2537 = vpow2.f32 %v1749_v46 }
 0x259   : > { %2539 = vtanh.f32 %v4376_v26  ;;  %v4403_v22 = vmul.f32 %v5609_v29, %v1631_v47  ;;  %v4406_v34 = vmul.f32 %v5609_v29, %v1632_v31  ;;  %v1608_v44 = vmul.f32 %v2526_v52, %v4252_v11 }
 0x25a   : > { %2541 = vtanh.f32 %v4382_v49  ;;  %v4411_v19 = vmul.f32 %v5609_v29, %v1633_v0  ;;  %v4414_v45 = vmul.f32 %v5609_v29, %v1634_v43  ;;  %v1609_v61 = vmul.f32 %v2528_v33, %v4252_v11  ;;  %v4421_v25 = vpop.permute.xlu0 %1689 }
 0x25b   : > { %2543 = vtanh.f32 %v4387_v6  ;;  %v4419_v41 = vadd.f32 %v4137_v8, %v1521_v7  ;;  %v1635_v36 = vadd.f32 %v4255_v53, %v1606_v35  ;;  %v4425_v46 = vmul.f32 %v5609_v29, %v1636_v4 }
 0x25c   : > { %v1524_v47 = vadd.f32 %v1462_v20, %v4312_v23  ;;  %v1693_v31 = vmul.f32 %v4421_v25, %v4159_v28  ;;  %v1694_v52 = vmul.f32 %v4421_v25, %v4187_v40  ;;  %v1692_v0 = vmul.f32 %v4421_v25, %v4164_v48 }
 0x25d   : > { %v2530_v43 = vpop.eup %2529  ;;  %v1523_v33 = vadd.f32 %v4301_v27, %v4315_v13  ;;  %v1695_v7 = vmul.f32 %v4421_v25, %v4182_v50  ;;  %v1696_v35 = vmul.f32 %v4421_v25, %v4215_v18  ;;  %v1637_v23 = vadd.f32 %v4255_v53, %v1608_v44  ;;  %v1470_v18 = vpop.permute.xlu1 %1469 }
 0x25e   : > { %v2532_v20 = vpop.eup %2531  ;;  %v1970_v28 = vrot.slane %v1693_v31, 7  ;;  %v1972_v4 = vrot.slane %v1694_v52, 7  ;;  %v1969_v56 = vrot.slane %v1692_v0, 7  ;;  %v1638_v40 = vadd.f32 %v4255_v53, %v1609_v61 }
 0x25f   : > { %v1526_v48 = vadd.f32 %v1466_v24, %v4321_v54  ;;  %v1697_v60 = vmul.f32 %v4421_v25, %v4205_v51  ;;  %v4447_v27 = vmul.f32 %v4421_v25, %v4230_v14  ;;  %v4450_v50 = vmul.f32 %v5609_v29, %v1635_v36 }
 0x260   : > { %v1973_v13 = vsel %vm1831_vm2, %v1970_v28, %v1972_v4  ;;  %v1971_v44 = vsel %vm1831_vm2, %v1969_v56, %v1970_v28  ;;  %v1974_v31 = vrot.slane %v1695_v7, 7  ;;  %v1976_v52 = vrot.slane %v1696_v35, 7 }
 0x261   : > { %2545 = vtanh.f32 %v4419_v41  ;;  %v4456_v54 = vadd.f32 %v4137_v8, %v1524_v47  ;;  %v1525_v51 = vadd.f32 %v4336_v63, %v4324_v15  ;;  %2026 = vrot.lane.b32.xlu0 %v1973_v13, %s2682_s20  ;;  %2024 = vrot.lane.b32.xlu1 %v1971_v44, %s2682_s20  ;;  %v1610_v14 = vmul.f32 %v2532_v20, %v4252_v11 }
 0x262   : > { %v2534_v24 = vpop.eup %2533  ;;  %v4464_v56 = vadd.f32 %v4137_v8, %v1523_v33  ;;  %v4467_v61 = vmul.f32 %v5609_v29, %v1637_v23  ;;  %v4470_v36 = vmul.f32 %v5609_v29, %v1638_v40  ;;  %v1611_v47 = vmul.f32 %v2530_v43, %v4252_v11 }
 0x263   : > { %v2536_v15 = vpop.eup %2535  ;;  %v4474_v63 = vadd.f32 %v4137_v8, %v1526_v48  ;;  %v1978_v0 = vrot.slane %v1697_v60, 7  ;;  %v1699_v7 = vmul.f32 %v4421_v25, %v4222_v59  ;;  %v1751_v35 = vmul.f32 1.442695, %v4368_v57  ;;  %v1474_v48 = vpop.permute.xlu1 %1473 }
 0x264   : > { %v1977_v33 = vsel %vm1831_vm2, %v1974_v31, %v1976_v52  ;;  %v1975_v23 = vsel %vm1831_vm2, %v1972_v4, %v1974_v31  ;;  %v1980_v20 = vrot.slane %v4447_v27, 7  ;;  %v1700_v28 = vmul.f32 %v4421_v25, %v4262_v10 }
 0x265   : > { %v4484_v43 = vpop.eup %2537  ;;  %2547 = vtanh.f32 %v4456_v54  ;;  %v4488_v60 = vadd.f32 %v4137_v8, %v1525_v51  ;;  %v1528_v59 = vadd.f32 %v1470_v18, %v4327_v42  ;;  %2030 = vrot.lane.b32.xlu0 %v1977_v33, %s2682_s20  ;;  %2028 = vrot.lane.b32.xlu1 %v1975_v23, %s2682_s20  ;;  %v1639_v4 = vadd.f32 %v4255_v53, %v1610_v14 }
 0x266   : > { %v2540_v40 = vpop.eup %2539  ;;  %2549 = vtanh.f32 %v4464_v56  ;;  %v1527_v10 = vadd.f32 %v4362_v62, %v4331_v30  ;;  %v1612_v27 = vmul.f32 %v2536_v15, %v4252_v11  ;;  %v1613_v13 = vmul.f32 %v2534_v24, %v4252_v11 }
 0x267   : > { %v2542_v44 = vpop.eup %2541  ;;  %2551 = vtanh.f32 %v4474_v63  ;;  %v1979_v42 = vsel %vm1831_vm2, %v1976_v52, %v1978_v0  ;;  %v1982_v18 = vrot.slane %v1699_v7, 7  ;;  %v1640_v31 = vadd.f32 %v4255_v53, %v1611_v47 }
 0x268   : > { %v4502_v51 = vpop.eup %2543  ;;  %v1981_v14 = vsel %vm1831_vm2, %v1978_v0, %v1980_v20  ;;  %v1984_v33 = vrot.slane %v1700_v28, 7  ;;  %v1701_v30 = vmul.f32 %v4421_v25, %v4235_v16  ;;  %v1702_v62 = vmul.f32 %v4421_v25, %v4274_v38 }
 0x269   : > { %2553 = vtanh.f32 %v4488_v60  ;;  %v4511_v24 = vadd.f32 %v4137_v8, %v1528_v59  ;;  %v1530_v52 = vadd.f32 %v1474_v48, %v4334_v1  ;;  %2034 = vrot.lane.b32.xlu0 %v1981_v14, %s2682_s20  ;;  %2032 = vrot.lane.b32.xlu1 %v1979_v42, %s2682_s20  ;;  %v4517_v47 = vmul.f32 %v5609_v29, %v1639_v4 }
 0x26a   : > { %v1562_v15 = vadd.f32 %v4137_v8, %v1527_v10  ;;  %v1529_v16 = vadd.f32 %v4390_v17, %v4360_v5  ;;  %v1641_v38 = vadd.f32 %v4255_v53, %v1612_v27  ;;  %v1642_v0 = vadd.f32 %v4255_v53, %v1613_v13 }
 0x26b   : > { %v1983_v7 = vsel %vm1831_vm2, %v1980_v20, %v1982_v18  ;;  %v1703_v1 = vmul.f32 %v4421_v25, %v4280_v37  ;;  %v4529_v23 = vmul.f32 %v4421_v25, %v4318_v9  ;;  %v1614_v28 = vmul.f32 %v2542_v44, %v4252_v11 }
 0x26c   : > { %v1985_v59 = vsel %vm1831_vm2, %v1982_v18, %v1984_v33  ;;  %v1986_v4 = vrot.slane %v1701_v30, 7  ;;  %v1988_v10 = vrot.slane %v1702_v62, 7  ;;  %2555 = vpow2.f32 %v1751_v35 }
 0x26d   : > { %2557 = vtanh.f32 %v4511_v24  ;;  %v1565_v5 = vadd.f32 %v4137_v8, %v1530_v52  ;;  %2038 = vrot.lane.b32.xlu0 %v1985_v59, %s2682_s20  ;;  %2036 = vrot.lane.b32.xlu1 %v1983_v7, %s2682_s20  ;;  %v4538_v37 = vmul.f32 %v5609_v29, %v1640_v31  ;;  %v1615_v9 = vmul.f32 %v2540_v40, %v4252_v11 }
 0x26e   : > { %v2546_v17 = vpop.eup %2545  ;;  %2559 = vtanh.f32 %v1562_v15  ;;  %v1564_v20 = vadd.f32 %v4137_v8, %v1529_v16  ;;  %v4543_v48 = vmul.f32 %v5609_v29, %v1641_v38  ;;  %v4546_v35 = vmul.f32 %v5609_v29, %v1642_v0 }
 0x26f   : > { %v1990_v27 = vrot.slane %v1703_v1, 7  ;;  %v1705_v13 = vmul.f32 %v4421_v25, %v4307_v3  ;;  %v1706_v44 = vmul.f32 %v4421_v25, %v4354_v55  ;;  %v4553_v42 = vadd.f32 %v4255_v53, %v1614_v28 }
 0x270   : > { %v1989_v40 = vsel %vm1831_vm2, %v1986_v4, %v1988_v10  ;;  %v1987_v8 = vsel %vm1831_vm2, %v1984_v33, %v1986_v4  ;;  %v1992_v18 = vrot.slane %v4529_v23, 7  ;;  %v1707_v29 = vmul.f32 %v4421_v25, %v4350_v58 }
 0x271   : > { %2561 = vtanh.f32 %v1565_v5  ;;  %2042 = vrot.lane.b32.xlu0 %v1989_v40, %s2682_s20  ;;  %2040 = vrot.lane.b32.xlu1 %v1987_v8, %s2682_s20  ;;  %v1708_v3 = vmul.f32 %v4421_v25, %v4382_v49  ;;  %v1709_v55 = vmul.f32 %v4421_v25, %v4376_v26  ;;  %v1710_v31 = vmul.f32 %v4421_v25, %v4419_v41 }
 0x272   : > { %v4568_v14 = vpop.eup %2547  ;;  %2563 = vtanh.f32 %v1564_v20  ;;  %v1711_v58 = vmul.f32 %v4421_v25, %v4387_v6  ;;  %v1712_v33 = vmul.f32 %v4421_v25, %v4464_v56  ;;  %v1644_v30 = vadd.f32 %v4255_v53, %v1615_v9 }
 0x273   : > { %v4575_v62 = vpop.eup %2549  ;;  %v1994_v49 = vrot.slane %v1705_v13, 7  ;;  %v1713_v26 = vmul.f32 %v4421_v25, %v4456_v54  ;;  %v1714_v41 = vmul.f32 %v4421_v25, %v4488_v60  ;;  %v1715_v52 = vmul.f32 %v4421_v25, %v4474_v63 }
 0x274   : > { %v4583_v16 = vpop.eup %2551  ;;  %v1993_v6 = vsel %vm1831_vm2, %v1990_v27, %v1992_v18  ;;  %v1991_v56 = vsel %vm1831_vm2, %v1988_v10, %v1990_v27  ;;  %v1996_v38 = vrot.slane %v1706_v44, 7  ;;  %v1998_v0 = vrot.slane %v1707_v29, 7 }
 0x275   : > { %2046 = vrot.lane.b32.xlu0 %v1993_v6, %s2682_s20  ;;  %2044 = vrot.lane.b32.xlu1 %v1991_v56, %s2682_s20  ;;  %v2000_v7 = vrot.slane %v1708_v3, 7  ;;  %v2002_v54 = vrot.slane %v1709_v55, 7  ;;  %v2004_v1 = vrot.slane %v1710_v31, 7  ;;  %v1716_v60 = vmul.f32 %v4421_v25, %v1562_v15 }
 0x276   : > { %v4590_v23 = vpop.eup %2553  ;;  %v2006_v63 = vrot.slane %v1711_v58, 7  ;;  %v2008_v28 = vrot.slane %v1712_v33, 7  ;;  %v1717_v59 = vmul.f32 %v4421_v25, %v4511_v24  ;;  %v1718_v4 = vmul.f32 %v4421_v25, %v1564_v20 }
 0x277   : > { %v2010_v10 = vrot.slane %v1713_v26, 7  ;;  %v2012_v9 = vrot.slane %v1714_v41, 7  ;;  %v2014_v27 = vrot.slane %v1715_v52, 7  ;;  %v1616_v13 = vmul.f32 %v2546_v17, %v4252_v11  ;;  %v4623_v52 = vld [vmem:[%s5139_s5] ss:$0 sm:$0xff] }
 0x278   : > { %v1997_v44 = vsel %vm1831_vm2, %v1994_v49, %v1996_v38  ;;  %v1995_v40 = vsel %vm1831_vm2, %v1992_v18, %v1994_v49  ;;  %v1719_v15 = vmul.f32 %v4421_v25, %v1565_v5  ;;  %v1617_v8 = vmul.f32 %v4502_v51, %v4252_v11 }
 0x279   : > { %v4601_v29 = vpop.eup %2555  ;;  %2050 = vrot.lane.b32.xlu0 %v1997_v44, %s2682_s20  ;;  %2048 = vrot.lane.b32.xlu1 %v1995_v40, %s2682_s20  ;;  %v2001_v24 = vsel %vm1831_vm2, %v1998_v0, %v2000_v7  ;;  %v1999_v20 = vsel %vm1831_vm2, %v1996_v38, %v1998_v0  ;;  %v2005_v17 = vsel %vm1831_vm2, %v2002_v54, %v2004_v1  ;;  %v2016_v3 = vrot.slane %v1716_v60, 7 }
 0x27a   : > { %v2558_v55 = vpop.eup %2557  ;;  %v2003_v18 = vsel %vm1831_vm2, %v2000_v7, %v2002_v54  ;;  %v2009_v25 = vsel %vm1831_vm2, %v2006_v63, %v2008_v28  ;;  %v2018_v5 = vrot.slane %v1717_v59, 7  ;;  %v2020_v51 = vrot.slane %v1718_v4, 7 }
 0x27b   : > { %v2560_v31 = vpop.eup %2559  ;;  %v2007_v58 = vsel %vm1831_vm2, %v2004_v1, %v2006_v63  ;;  %v4612_v33 = vsel %vm1831_vm2, %v2010_v10, %v2012_v9  ;;  %v4615_v49 = vsel %vm1831_vm2, %v2008_v28, %v2010_v10  ;;  %v4618_v26 = vsel %vm1831_vm2, %v2012_v9, %v2014_v27 }
 0x27c   : > { %v2022_v41 = vrot.slane %v1719_v15, 7  ;;  %v4627_v6 = vmul.f32 %v4623_v52, %v4553_v42  ;;  %v1833_v56 = vrot.slane %v4484_v43, 7  ;;  %v1835_v38 = vrot.slane %v4601_v29, 7 }
 0x27d   : > { %2054 = vrot.lane.b32.xlu0 %v2001_v24, %s2682_s20  ;;  %2052 = vrot.lane.b32.xlu1 %v1999_v20, %s2682_s20  ;;  %v4634_v0 = vsel %vm1831_vm2, %v2014_v27, %v2016_v3  ;;  %v4637_v7 = vmul.f32 %v4623_v52, %v1644_v30  ;;  %v1645_v54 = vadd.f32 %v4255_v53, %v1616_v13  ;;  %v1747_v1 = vmul.f32 1.442695, %v4339_v39 }
 0x27e   : > { %v2562_v42 = vpop.eup %2561  ;;  %v4642_v60 = vsel %vm1831_vm2, %v2018_v5, %v2020_v51  ;;  %v1646_v63 = vadd.f32 %v4255_v53, %v1617_v8  ;;  %v4650_v28 = vsel %vm1831_vm2, %v1833_v56, %v1835_v38  ;;  %v1753_v30 = vmul.f32 1.442695, %v4371_v12 }
 0x27f   : > { %v2564_v59 = vpop.eup %2563  ;;  %v4654_v4 = vsel %vm1831_vm2, %v2016_v3, %v2018_v5  ;;  %v1618_v39 = vmul.f32 %v4575_v62, %v4252_v11  ;;  %2565 = vpow2.f32 %v1747_v1  ;;  %v1755_v10 = vmul.f32 1.442695, %v4403_v22 }
 0x280   : > { %v4660_v9 = vsel %vm1831_vm2, %v2020_v51, %v2022_v41  ;;  %2567 = vpow2.f32 %v1753_v30  ;;  %v1757_v27 = vmul.f32 1.442695, %v4406_v34  ;;  %v1759_v13 = vmul.f32 1.442695, %v4411_v19 }
 0x281   : > { %2058 = vrot.lane.b32.xlu0 %v2005_v17, %s2682_s20  ;;  %2056 = vrot.lane.b32.xlu1 %v2003_v18, %s2682_s20  ;;  %v4667_v44 = vmul.f32 %v4623_v52, %v1645_v54  ;;  %2569 = vpow2.f32 %v1755_v10  ;;  %v1761_v62 = vmul.f32 1.442695, %v4414_v45  ;;  %v1763_v40 = vmul.f32 1.442695, %v4450_v50 }
 0x282   : > { %v4672_v15 = vmul.f32 %v4623_v52, %v1646_v63  ;;  %v1619_v8 = vmul.f32 %v4568_v14, %v4252_v11  ;;  %2571 = vpow2.f32 %v1757_v27  ;;  %v1765_v24 = vmul.f32 1.442695, %v4425_v46 }
 0x283   : > { %v1620_v20 = vmul.f32 %v4590_v23, %v4252_v11  ;;  %v1621_v17 = vmul.f32 %v4583_v16, %v4252_v11  ;;  %2573 = vpow2.f32 %v1759_v13  ;;  %v1767_v3 = vmul.f32 1.442695, %v4467_v61 }
 0x284   : > { %v1622_v18 = vmul.f32 %v2560_v31, %v4252_v11  ;;  %v1623_v5 = vmul.f32 %v2558_v55, %v4252_v11  ;;  %2575 = vpow2.f32 %v1761_v62  ;;  %v1769_v51 = vmul.f32 1.442695, %v4470_v36 }
 0x285   : > { %2062 = vrot.lane.b32.xlu0 %v2009_v25, %s2682_s20  ;;  %2060 = vrot.lane.b32.xlu1 %v2007_v58, %s2682_s20  ;;  %v1647_v14 = vadd.f32 %v4255_v53, %v1618_v39  ;;  %v1624_v23 = vmul.f32 %v2564_v59, %v4252_v11  ;;  %2577 = vpow2.f32 %v1763_v40  ;;  %v1771_v16 = vmul.f32 1.442695, %v4517_v47 }
 0x286   : > { %v1648_v41 = vadd.f32 %v4255_v53, %v1619_v8  ;;  %v1625_v31 = vmul.f32 %v2562_v42, %v4252_v11  ;;  %2579 = vpow2.f32 %v1765_v24  ;;  %v1773_v55 = vmul.f32 1.442695, %v4538_v37 }
 0x287   : > { %v1649_v54 = vadd.f32 %v4255_v53, %v1620_v20  ;;  %v1650_v25 = vadd.f32 %v4255_v53, %v1621_v17  ;;  %2581 = vpow2.f32 %v1767_v3  ;;  %v1775_v58 = vmul.f32 1.442695, %v4543_v48 }
 0x288   : > { %v1651_v1 = vadd.f32 %v4255_v53, %v1622_v18  ;;  %v1652_v63 = vadd.f32 %v4255_v53, %v1623_v5  ;;  %2583 = vpow2.f32 %v1769_v51  ;;  %v1777_v30 = vmul.f32 1.442695, %v4546_v35 }
 0x289   : > { %2066 = vrot.lane.b32.xlu0 %v4612_v33, %s2682_s20  ;;  %2064 = vrot.lane.b32.xlu1 %v4615_v49, %s2682_s20  ;;  %v4704_v11 = vmul.f32 %v4623_v52, %v1647_v14  ;;  %v1653_v42 = vadd.f32 %v4255_v53, %v1624_v23  ;;  %2585 = vpow2.f32 %v1771_v16  ;;  %v1779_v59 = vmul.f32 1.442695, %v4627_v6 }
 0x28a   : > { %v4709_v39 = vmul.f32 %v4623_v52, %v1648_v41  ;;  %v1654_v10 = vadd.f32 %v4255_v53, %v1625_v31  ;;  %2587 = vpow2.f32 %v1773_v55  ;;  %v1781_v27 = vmul.f32 1.442695, %v4637_v7 }
 0x28b   : > { %v4714_v33 = vmul.f32 %v4623_v52, %v1649_v54  ;;  %v4717_v49 = vmul.f32 %v4623_v52, %v1650_v25  ;;  %2589 = vpow2.f32 %v1775_v58  ;;  %v1783_v13 = vmul.f32 1.442695, %v4667_v44 }
 0x28c   : > { %v2566_v62 = vpop.eup %2565  ;;  %v4721_v40 = vmul.f32 %v4623_v52, %v1651_v1  ;;  %v4724_v8 = vmul.f32 %v4623_v52, %v1652_v63  ;;  %2591 = vpow2.f32 %v1777_v30  ;;  %v1785_v53 = vmul.f32 1.442695, %v4672_v15 }
 0x28d   : > { %v2568_v24 = vpop.eup %2567  ;;  %2070 = vrot.lane.b32.xlu0 %v4634_v0, %s2682_s20  ;;  %2068 = vrot.lane.b32.xlu1 %v4618_v26, %s2682_s20  ;;  %v4732_v20 = vmul.f32 %v4623_v52, %v1653_v42  ;;  %v1832_v17 = vrot.slane %v2566_v62, 7  ;;  %2593 = vpow2.f32 %v1779_v59  ;;  %v1787_v3 = vmul.f32 1.442695, %v4704_v11 }
 0x28e   : > { %v2570_v18 = vpop.eup %2569  ;;  %v4736_v5 = vmul.f32 %v4623_v52, %v1654_v10  ;;  %v1837_v51 = vrot.slane %v2568_v24, 7  ;;  %2595 = vpow2.f32 %v1781_v27  ;;  %v1789_v14 = vmul.f32 1.442695, %v4709_v39 }
 0x28f   : > { %v2572_v23 = vpop.eup %2571  ;;  %v4742_v26 = vsel %vm1831_vm2, %v1832_v17, %v1833_v56  ;;  %v1839_v0 = vrot.slane %v2570_v18, 7  ;;  %2597 = vpow2.f32 %v1783_v13  ;;  %v1791_v16 = vmul.f32 1.442695, %v4714_v33 }
 0x290   : > { %v2574_v41 = vpop.eup %2573  ;;  %v4748_v52 = vsel %vm1831_vm2, %v1835_v38, %v1837_v51  ;;  %v1841_v31 = vrot.slane %v2572_v23, 7  ;;  %2599 = vpow2.f32 %v1785_v53  ;;  %v1793_v55 = vmul.f32 1.442695, %v4717_v49 }
 0x291   : > { %v2576_v54 = vpop.eup %2575  ;;  %2074 = vrot.lane.b32.xlu0 %v4642_v60, %s2682_s20  ;;  %2072 = vrot.lane.b32.xlu1 %v4654_v4, %s2682_s20  ;;  %v4756_v43 = vsel %vm1831_vm2, %v1837_v51, %v1839_v0  ;;  %v1843_v56 = vrot.slane %v2574_v41, 7  ;;  %2601 = vpow2.f32 %v1787_v3  ;;  %v1795_v29 = vmul.f32 1.442695, %v4721_v40 }
 0x292   : > { %v2578_v38 = vpop.eup %2577  ;;  %v4760_v25 = vsel %vm1831_vm2, %v1839_v0, %v1841_v31  ;;  %v1845_v58 = vrot.slane %v2576_v54, 7  ;;  %2603 = vpow2.f32 %v1789_v14  ;;  %v1797_v1 = vmul.f32 1.442695, %v4724_v8 }
 0x293   : > { %v2580_v63 = vpop.eup %2579  ;;  %v4764_v60 = vsel %vm1831_vm2, %v1841_v31, %v1843_v56  ;;  %v1847_v4 = vrot.slane %v2578_v38, 7  ;;  %2605 = vpow2.f32 %v1791_v16  ;;  %v1799_v30 = vmul.f32 1.442695, %v4732_v20 }
 0x294   : > { %v2582_v42 = vpop.eup %2581  ;;  %v4768_v59 = vsel %vm1831_vm2, %v1843_v56, %v1845_v58  ;;  %v1849_v10 = vrot.slane %v2580_v63, 7  ;;  %2607 = vpow2.f32 %v1793_v55  ;;  %v1801_v27 = vmul.f32 1.442695, %v4736_v5 }
 0x295   : > { %v2584_v13 = vpop.eup %2583  ;;  %2076 = vrot.lane.b32.xlu1 %v4660_v9, %s2682_s20  ;;  %2215 = vrot.lane.b32.xlu0 %v4397_v32, %s2681_s16  ;;  %v5611_v62 = vrot.slane %v4342_v2, 7  ;;  %v4781_v24 = vsel %vm1831_vm2, %v1845_v58, %v1847_v4  ;;  %v1851_v17 = vrot.slane %v2582_v42, 7  ;;  %2609 = vpow2.f32 %v1795_v29 }
 0x296   : > { %v2586_v3 = vpop.eup %2585  ;;  %v5612_v18 = vrot.slane %v4371_v12, 7  ;;  %v4789_v32 = vsel %vm1831_vm2, %v1847_v4, %v1849_v10  ;;  %v1853_v51 = vrot.slane %v2584_v13, 7  ;;  %2611 = vpow2.f32 %v1797_v1 }
 0x297   : > { %v2164_v53 = vsel %vm1831_vm2, %v5611_v62, %v2163_v21  ;;  %v2588_v2 = vpop.eup %2587  ;;  %v2167_v14 = vrot.slane %v4403_v22, 7  ;;  %v4793_v23 = vsel %vm1831_vm2, %v1849_v10, %v1851_v17  ;;  %v1855_v0 = vrot.slane %v2586_v3, 7 }
 0x298   : > { %v2166_v9 = vsel %vm1831_vm2, %v2163_v21, %v5612_v18  ;;  %2613 = vpow2.f32 %v1799_v30  ;;  %v2590_v16 = vpop.eup %2589  ;;  %v2169_v41 = vrot.slane %v4406_v34, 7  ;;  %v4797_v57 = vsel %vm1831_vm2, %v1851_v17, %v1853_v51 }
 0x299   : > { %v1857_v21 = vrot.slane %v2588_v2, 7  ;;  %2615 = vpow2.f32 %v1801_v27  ;;  %v2592_v31 = vpop.eup %2591  ;;  %2217 = vrot.lane.b32.xlu1 %v2164_v53, %s2681_s16  ;;  %2219 = vrot.lane.b32.xlu0 %v2166_v9, %s2681_s16  ;;  %v4802_v22 = vsel %vm1831_vm2, %v1853_v51, %v1855_v0  ;;  %v1859_v55 = vrot.slane %v2590_v16, 7 }
 0x29a   : > { %v2594_v54 = vpop.eup %2593  ;;  %v1861_v29 = vrot.slane %v2592_v31, 7  ;;  %v5613_v38 = vmov %v5612_v18  ;;  %v2171_v1 = vrot.slane %v4411_v19, 7  ;;  %v2170_v42 = vsel %vm1831_vm2, %v2167_v14, %v2169_v41 }
 0x29b   : > { %v4805_v56 = vsel %vm1831_vm2, %v1855_v0, %v1857_v21  ;;  %v2596_v34 = vpop.eup %2595  ;;  %v2168_v58 = vsel %vm1831_vm2, %v5613_v38, %v2167_v14  ;;  %v4812_v63 = vsel %vm1831_vm2, %v1857_v21, %v1859_v55  ;;  %v1863_v4 = vrot.slane %v2594_v54, 7 }
 0x29c   : > { %v2598_v30 = vpop.eup %2597  ;;  %v2173_v10 = vrot.slane %v4414_v45, 7  ;;  %v4817_v27 = vsel %vm1831_vm2, %v1859_v55, %v1861_v29  ;;  %v1865_v13 = vrot.slane %v2596_v34, 7  ;;  %v2172_v45 = vsel %vm1831_vm2, %v2169_v41, %v2171_v1 }
 0x29d   : > { %v2600_v62 = vpop.eup %2599  ;;  %2221 = vrot.lane.b32.xlu1 %v2168_v58, %s2681_s16  ;;  %2223 = vrot.lane.b32.xlu0 %v2170_v42, %s2681_s16  ;;  %v4822_v12 = vsel %vm1831_vm2, %v1861_v29, %v1863_v4  ;;  %v1867_v19 = vrot.slane %v2598_v30, 7  ;;  %v2175_v9 = vrot.slane %v4450_v50, 7  ;;  %v2177_v16 = vrot.slane %v4425_v46, 7 }
 0x29e   : > { %v2602_v53 = vpop.eup %2601  ;;  %v4825_v17 = vsel %vm1831_vm2, %v1863_v4, %v1865_v13  ;;  %v1869_v3 = vrot.slane %v2600_v62, 7  ;;  %v2174_v0 = vsel %vm1831_vm2, %v2171_v1, %v2173_v10  ;;  %v2179_v58 = vrot.slane %v4467_v61, 7 }
 0x29f   : > { %v2604_v18 = vpop.eup %2603  ;;  %v4830_v51 = vsel %vm1831_vm2, %v1865_v13, %v1867_v19  ;;  %v1871_v2 = vrot.slane %v2602_v53, 7  ;;  %v2176_v46 = vsel %vm1831_vm2, %v2173_v10, %v2175_v9  ;;  %v2178_v42 = vsel %vm1831_vm2, %v2175_v9, %v2177_v16 }
 0x2a0   : > { %v2606_v14 = vpop.eup %2605  ;;  %v4835_v21 = vsel %vm1831_vm2, %v1867_v19, %v1869_v3  ;;  %v1873_v31 = vrot.slane %v2604_v18, 7  ;;  %v2181_v13 = vrot.slane %v4470_v36, 7 }
 0x2a1   : > { %v2608_v55 = vpop.eup %2607  ;;  %2225 = vrot.lane.b32.xlu1 %v2172_v45, %s2681_s16  ;;  %2227 = vrot.lane.b32.xlu0 %v2174_v0, %s2681_s16  ;;  %v4840_v50 = vsel %vm1831_vm2, %v1869_v3, %v1871_v2  ;;  %v1875_v41 = vrot.slane %v2606_v14, 7  ;;  %v2180_v45 = vsel %vm1831_vm2, %v2177_v16, %v2179_v58  ;;  %v2185_v14 = vrot.slane %v4538_v37, 7 }
 0x2a2   : > { %v2610_v54 = vpop.eup %2609  ;;  %v4843_v29 = vsel %vm1831_vm2, %v1871_v2, %v1873_v31  ;;  %v1877_v34 = vrot.slane %v2608_v55, 7  ;;  %v2182_v9 = vsel %vm1831_vm2, %v2179_v58, %v2181_v13  ;;  %v2183_v2 = vrot.slane %v4517_v47, 7 }
 0x2a3   : > { %v2612_v38 = vpop.eup %2611  ;;  %v4848_v1 = vsel %vm1831_vm2, %v1873_v31, %v1875_v41  ;;  %v1879_v4 = vrot.slane %v2610_v54, 7  ;;  %v2187_v55 = vrot.slane %v4543_v48, 7  ;;  %v2191_v54 = vrot.slane %v4627_v6, 7 }
 0x2a4   : > { %v4853_v62 = vsel %vm1831_vm2, %v1875_v41, %v1877_v34  ;;  %v1881_v19 = vrot.slane %v2612_v38, 7  ;;  %v2184_v31 = vsel %vm1831_vm2, %v2181_v13, %v2183_v2  ;;  %v2186_v16 = vsel %vm1831_vm2, %v2183_v2, %v2185_v14 }
 0x2a5   : > { %v2614_v30 = vpop.eup %2613  ;;  %2229 = vrot.lane.b32.xlu1 %v2176_v46, %s2681_s16  ;;  %2231 = vrot.lane.b32.xlu0 %v2178_v42, %s2681_s16  ;;  %v4858_v61 = vsel %vm1831_vm2, %v1877_v34, %v1879_v4  ;;  %v2189_v41 = vrot.slane %v4546_v35, 7  ;;  %v2188_v47 = vsel %vm1831_vm2, %v2185_v14, %v2187_v55  ;;  %v2193_v34 = vrot.slane %v4637_v7, 7 }
 0x2a6   : > { %v2616_v53 = vpop.eup %2615  ;;  %v1883_v10 = vrot.slane %v2614_v30, 7  ;;  %v4861_v3 = vsel %vm1831_vm2, %v1879_v4, %v1881_v19  ;;  %v2195_v38 = vrot.slane %v4667_v44, 7  ;;  %v2197_v46 = vrot.slane %v4672_v15, 7 }
 0x2a7   : > { %v1885_v18 = vrot.slane %v2616_v53, 7  ;;  %v2190_v37 = vsel %vm1831_vm2, %v2187_v55, %v2189_v41  ;;  %v2192_v48 = vsel %vm1831_vm2, %v2189_v41, %v2191_v54  ;;  %v2194_v35 = vsel %vm1831_vm2, %v2191_v54, %v2193_v34 }
 0x2a8   : > { %v4865_v36 = vsel %vm1831_vm2, %v1881_v19, %v1883_v10  ;;  %v2196_v6 = vsel %vm1831_vm2, %v2193_v34, %v2195_v38  ;;  %v2198_v7 = vsel %vm1831_vm2, %v2195_v38, %v2197_v46  ;;  %v2199_v58 = vrot.slane %v4704_v11, 7 }
 0x2a9   : > { %v4871_v0 = vsel %vm1831_vm2, %v1883_v10, %v1885_v18  ;;  %2233 = vrot.lane.b32.xlu1 %v2180_v45, %s2681_s16  ;;  %2235 = vrot.lane.b32.xlu0 %v2182_v9, %s2681_s16  ;;  %v2201_v4 = vrot.slane %v4709_v39, 7  ;;  %v2203_v30 = vrot.slane %v4714_v33, 7  ;;  %v2205_v42 = vrot.slane %v4717_v49, 7 }
 0x2aa   : > { %5614 = vst [vmem:[#allocation35_spill] sm:$0xff] %v4871_v0  ;;  %v2200_v44 = vsel %vm1831_vm2, %v2197_v46, %v2199_v58  ;;  %v2207_v13 = vrot.slane %v4721_v40, 7  ;;  %v2209_v19 = vrot.slane %v4724_v8, 7  ;;  %v2211_v53 = vrot.slane %v4732_v20, 7 }
 0x2ab   : > { %v2202_v15 = vsel %vm1831_vm2, %v2199_v58, %v2201_v4  ;;  %v2204_v11 = vsel %vm1831_vm2, %v2201_v4, %v2203_v30  ;;  %v2206_v39 = vsel %vm1831_vm2, %v2203_v30, %v2205_v42  ;;  %v2213_v10 = vrot.slane %v4736_v5, 7 }
 0x2ac   : > { %v2208_v33 = vsel %vm1831_vm2, %v2205_v42, %v2207_v13  ;;  %v2210_v49 = vsel %vm1831_vm2, %v2207_v13, %v2209_v19  ;;  %v2212_v40 = vsel %vm1831_vm2, %v2209_v19, %v2211_v53  ;;  %v1722_v13 = vld [vmem:[%s4957_s27 + $0x10] sm:$0xff] }
 0x2ad   : > { %2237 = vrot.lane.b32.xlu1 %v2184_v31, %s2681_s16  ;;  %2239 = vrot.lane.b32.xlu0 %v2186_v16, %s2681_s16  ;;  %v2214_v8 = vsel %vm1831_vm2, %v2211_v53, %v2213_v10 }
 0x2b1   : > { %2241 = vrot.lane.b32.xlu1 %v2188_v47, %s2681_s16  ;;  %2243 = vrot.lane.b32.xlu0 %v2190_v37, %s2681_s16 }
 0x2b5   : > { %2245 = vrot.lane.b32.xlu1 %v2192_v48, %s2681_s16  ;;  %2247 = vrot.lane.b32.xlu0 %v2194_v35, %s2681_s16 }
 0x2b9   : > { %2249 = vrot.lane.b32.xlu1 %v2196_v6, %s2681_s16  ;;  %2251 = vrot.lane.b32.xlu0 %v2198_v7, %s2681_s16 }
 0x2bd   : > { %2253 = vrot.lane.b32.xlu1 %v2200_v44, %s2681_s16  ;;  %2255 = vrot.lane.b32.xlu0 %v2202_v15, %s2681_s16  ;;  %v1720_v15 = vld [vmem:[%s4957_s27] sm:$0xff] }
 0x2c1   : > { %2257 = vrot.lane.b32.xlu1 %v2204_v11, %s2681_s16  ;;  %2259 = vrot.lane.b32.xlu0 %v2206_v39, %s2681_s16  ;;  %v1914_v11 = vmul.f32 %v4742_v26, %v1720_v15  ;;  %v1721_v39 = vld [vmem:[%s4957_s27 + $0x8] sm:$0xff]  ;;  %v1916_v26 = vmul.f32 %v4748_v52, %v1722_v13  ;;  %v1726_v13 = vld [vmem:[%s4957_s27 + $0x30] sm:$0xff] }
 0x2c2   : > { %v1915_v53 = vmul.f32 %v4650_v28, %v1721_v39  ;;  %v1725_v39 = vld [vmem:[%s4957_s27 + $0x28] sm:$0xff] }
 0x2c5   : > { %2261 = vrot.lane.b32.xlu1 %v2208_v33, %s2681_s16  ;;  %2263 = vrot.lane.b32.xlu0 %v2210_v49, %s2681_s16 }
 0x2c9   : > { %2265 = vrot.lane.b32.xlu1 %v2212_v40, %s2681_s16  ;;  %2267 = vrot.lane.b32.xlu0 %v2214_v8, %s2681_s16  ;;  %v1723_v40 = vld [vmem:[%s4957_s27 + $0x18] sm:$0xff]  ;;  %v1724_v8 = vld [vmem:[%s4957_s27 + $0x20] sm:$0xff] }
 0x2ca   : > { %v1918_v0 = vmul.f32 %v4760_v25, %v1724_v8  ;;  %v1920_v25 = vmul.f32 %v4768_v59, %v1726_v13  ;;  %v1731_v13 = vld [vmem:[%s4957_s27 + $0x58] sm:$0xff] }
 0x2d3   : > { %v2027_v18 = vpop.permute.xlu0 %2026  ;;  %v2025_v45 = vpop.permute.xlu1 %2024 }
 0x2d4   : > { %v2105_v19 = vadd.f32 %v2025_v45, %v1914_v11  ;;  %v2106_v45 = vadd.f32 %v2027_v18, %v1915_v53 }
 0x2d7   : > { %v2031_v9 = vpop.permute.xlu0 %2030  ;;  %v2029_v2 = vpop.permute.xlu1 %2028 }
 0x2d8   : > { %v2107_v15 = vadd.f32 %v2029_v2, %v1916_v26  ;;  %v1727_v26 = vld [vmem:[%s4957_s27 + $0x38] sm:$0xff] }
 0x2d9   : > { %v1921_v59 = vmul.f32 %v4781_v24, %v1727_v26 }
 0x2db   : > { %v4921_v14 = vpop.permute.xlu0 %2034  ;;  %v2033_v20 = vpop.permute.xlu1 %2032 }
 0x2dc   : > { %v2109_v2 = vadd.f32 %v2033_v20, %v1918_v0 }
 0x2df   : > { %v4923_v5 = vpop.permute.xlu0 %2038  ;;  %v2037_v31 = vpop.permute.xlu1 %2036 }
 0x2e3   : > { %v4925_v16 = vpop.permute.xlu0 %2042  ;;  %v4927_v55 = vpop.permute.xlu1 %2040 }
 0x2e7   : > { %v4929_v41 = vpop.permute.xlu0 %2046  ;;  %v4931_v47 = vpop.permute.xlu1 %2044 }
 0x2eb   : > { %v4933_v37 = vpop.permute.xlu0 %2050  ;;  %v4935_v54 = vpop.permute.xlu1 %2048 }
 0x2ef   : > { %v4937_v34 = vpop.permute.xlu0 %2054  ;;  %v4939_v48 = vpop.permute.xlu1 %2052 }
 0x2f3   : > { %v4941_v35 = vpop.permute.xlu0 %2058  ;;  %v4943_v38 = vpop.permute.xlu1 %2056 }
 0x2f7   : > { %v4945_v46 = vpop.permute.xlu0 %2062  ;;  %v4947_v6 = vpop.permute.xlu1 %2060 }
 0x2fb   : > { %v4949_v7 = vpop.permute.xlu0 %2066  ;;  %v4951_v58 = vpop.permute.xlu1 %2064 }
 0x2ff   : > { %v4959_v4 = vpop.permute.xlu0 %2070  ;;  %v4961_v44 = vpop.permute.xlu1 %2068 }
 0x303   : > { %v4964_v30 = vpop.permute.xlu0 %2074  ;;  %v4966_v42 = vpop.permute.xlu1 %2072 }
 0x304   : > { %5615 = vst [vmem:[#allocation36_spill] sm:$0xff] %v4964_v30 }
 0x307   : > { %v4977_v33 = vpop.permute.xlu1 %2076  ;;  %v2216_v49 = vpop.permute.xlu0 %2215 }
 0x308   : > { %5616 = vst [vmem:[#allocation37_spill] sm:$0xff] %v4977_v33  ;;  %v2297_v10 = vsel %vm2296_vm3, %v2105_v19, %v2216_v49  ;;  %v1917_v33 = vmul.f32 %v4756_v43, %v1723_v40  ;;  %v1919_v49 = vmul.f32 %v4764_v60, %v1725_v39 }
 0x309   : > { %2325 = vst.msk [vmem:[%s4975_s29] sm:$0xff] %vm2324_vm4, %v2297_v10  ;;  %v1728_v10 = vld [vmem:[%s4957_s27 + $0x40] sm:$0xff] }
 0x30a   : > { %v2108_v18 = vadd.f32 %v2031_v9, %v1917_v33  ;;  %v2110_v0 = vadd.f32 %v4921_v14, %v1919_v49  ;;  %v2111_v9 = vadd.f32 %v2037_v31, %v1920_v25  ;;  %v1922_v33 = vmul.f32 %v4789_v32, %v1728_v10  ;;  %v1733_v25 = vld [vmem:[%s4957_s27 + $0x68] sm:$0xff] }
 0x30b   : > { %v2218_v11 = vpop.permute.xlu1 %2217  ;;  %v2220_v30 = vpop.permute.xlu0 %2219  ;;  %v2112_v14 = vadd.f32 %v4923_v5, %v1921_v59 }
 0x30c   : > { %v2298_v28 = vsel %vm2296_vm3, %v2106_v45, %v2218_v11  ;;  %v2299_v52 = vsel %vm2296_vm3, %v2107_v15, %v2220_v30  ;;  %v1729_v45 = vld [vmem:[%s4957_s27 + $0x48] sm:$0xff]  ;;  %v1730_v15 = vld [vmem:[%s4957_s27 + $0x50] sm:$0xff]  ;;  %v2113_v24 = vadd.f32 %v4927_v55, %v1922_v33 }
 0x30d   : > { %2326 = vst.msk [vmem:[%s4975_s29 + $0x8] sm:$0xff] %vm2324_vm4, %v2298_v28  ;;  %2327 = vst.msk [vmem:[%s4975_s29 + $0x10] sm:$0xff] %vm2324_vm4, %v2299_v52  ;;  %v1923_v32 = vmul.f32 %v4793_v23, %v1729_v45  ;;  %v1924_v28 = vmul.f32 %v4797_v57, %v1730_v15  ;;  %v1925_v57 = vmul.f32 %v4802_v22, %v1731_v13  ;;  %v1738_v45 = vld [vmem:[%s4957_s27 + $0x90] sm:$0xff] }
 0x30f   : > { %v2222_v19 = vpop.permute.xlu1 %2221  ;;  %v2224_v43 = vpop.permute.xlu0 %2223  ;;  %v2114_v5 = vadd.f32 %v4925_v16, %v1923_v32  ;;  %v2115_v23 = vadd.f32 %v4931_v47, %v1924_v28  ;;  %v2116_v16 = vadd.f32 %v4929_v41, %v1925_v57  ;;  %v1740_v32 = vld [vmem:[%s4957_s27 + $0xa0] sm:$0xff] }
 0x310   : > { %v2300_v53 = vsel %vm2296_vm3, %v2108_v18, %v2222_v19  ;;  %v2301_v30 = vsel %vm2296_vm3, %v2109_v2, %v2224_v43  ;;  %v1732_v18 = vld [vmem:[%s4957_s27 + $0x60] sm:$0xff] }
 0x311   : > { %2328 = vst.msk [vmem:[%s4975_s29 + $0x18] sm:$0xff] %vm2324_vm4, %v2300_v53  ;;  %2329 = vst.msk [vmem:[%s4975_s29 + $0x20] sm:$0xff] %vm2324_vm4, %v2301_v30  ;;  %v1926_v19 = vmul.f32 %v4805_v56, %v1732_v18  ;;  %v1734_v53 = vld [vmem:[%s4957_s27 + $0x70] sm:$0xff]  ;;  %v1927_v56 = vmul.f32 %v4812_v63, %v1733_v25  ;;  %v1741_v18 = vld [vmem:[%s4957_s27 + $0xa8] sm:$0xff] }
 0x312   : > { %v1928_v26 = vmul.f32 %v4817_v27, %v1734_v53 }
 0x313   : > { %v2226_v60 = vpop.permute.xlu1 %2225  ;;  %v2228_v20 = vpop.permute.xlu0 %2227  ;;  %v2117_v22 = vadd.f32 %v4935_v54, %v1926_v19  ;;  %v2118_v41 = vadd.f32 %v4933_v37, %v1927_v56  ;;  %v1743_v19 = vld [vmem:[%s4957_s27 + $0xb8] sm:$0xff]  ;;  %v5617_v56 = vld [vmem:[#allocation35_spill] sm:$0xff] }
 0x314   : > { %v2302_v40 = vsel %vm2296_vm3, %v2110_v0, %v2226_v60  ;;  %v2303_v8 = vsel %vm2296_vm3, %v2111_v9, %v2228_v20  ;;  %v1735_v9 = vld [vmem:[%s4957_s27 + $0x78] sm:$0xff]  ;;  %v1736_v60 = vld [vmem:[%s4957_s27 + $0x80] sm:$0xff]  ;;  %v2119_v63 = vadd.f32 %v4939_v48, %v1928_v26 }
 0x315   : > { %2330 = vst.msk [vmem:[%s4975_s29 + $0x28] sm:$0xff] %vm2324_vm4, %v2302_v40  ;;  %2331 = vst.msk [vmem:[%s4975_s29 + $0x30] sm:$0xff] %vm2324_vm4, %v2303_v8  ;;  %v1929_v27 = vmul.f32 %v4822_v12, %v1735_v9  ;;  %v1930_v59 = vmul.f32 %v4825_v17, %v1736_v60  ;;  %v1737_v8 = vld [vmem:[%s4957_s27 + $0x88] sm:$0xff]  ;;  %v5618_v9 = vld [vmem:[#allocation36_spill] sm:$0xff] }
 0x316   : > { %v1931_v17 = vmul.f32 %v4830_v51, %v1737_v8  ;;  %v5619_v60 = vld [vmem:[#allocation37_spill] sm:$0xff] }
 0x317   : > { %v2230_v31 = vpop.permute.xlu1 %2229  ;;  %v2232_v11 = vpop.permute.xlu0 %2231  ;;  %v2120_v37 = vadd.f32 %v4937_v34, %v1929_v27  ;;  %v2121_v12 = vadd.f32 %v4943_v38, %v1930_v59 }
 0x318   : > { %v2304_v52 = vsel %vm2296_vm3, %v2112_v14, %v2230_v31  ;;  %v2305_v39 = vsel %vm2296_vm3, %v2113_v24, %v2232_v11  ;;  %v1932_v14 = vmul.f32 %v4835_v21, %v1738_v45  ;;  %v1739_v11 = vld [vmem:[%s4957_s27 + $0x98] sm:$0xff]  ;;  %v2122_v34 = vadd.f32 %v4941_v35, %v1931_v17 }
 0x319   : > { %2332 = vst.msk [vmem:[%s4975_s29 + $0x38] sm:$0xff] %vm2324_vm4, %v2304_v52  ;;  %2333 = vst.msk [vmem:[%s4975_s29 + $0x40] sm:$0xff] %vm2324_vm4, %v2305_v39  ;;  %v1933_v21 = vmul.f32 %v4840_v50, %v1739_v11  ;;  %v1934_v52 = vmul.f32 %v4843_v29, %v1740_v32  ;;  %v1935_v29 = vmul.f32 %v4848_v1, %v1741_v18 }
 0x31a   : > { %v2123_v51 = vadd.f32 %v4947_v6, %v1932_v14 }
 0x31b   : > { %v2234_v55 = vpop.permute.xlu1 %2233  ;;  %v2236_v2 = vpop.permute.xlu0 %2235  ;;  %v2124_v35 = vadd.f32 %v4945_v46, %v1933_v21  ;;  %v2125_v50 = vadd.f32 %v4951_v58, %v1934_v52  ;;  %v2126_v46 = vadd.f32 %v4949_v7, %v1935_v29 }
 0x31c   : > { %v2306_v43 = vsel %vm2296_vm3, %v2114_v5, %v2234_v55  ;;  %v2307_v49 = vsel %vm2296_vm3, %v2115_v23, %v2236_v2  ;;  %v1742_v5 = vld [vmem:[%s4957_s27 + $0xb0] sm:$0xff] }
 0x31d   : > { %2334 = vst.msk [vmem:[%s4975_s29 + $0x48] sm:$0xff] %vm2324_vm4, %v2306_v43  ;;  %2335 = vst.msk [vmem:[%s4975_s29 + $0x50] sm:$0xff] %vm2324_vm4, %v2307_v49  ;;  %v1936_v55 = vmul.f32 %v4853_v62, %v1742_v5  ;;  %v1744_v43 = vld [vmem:[%s4957_s27 + $0xc0] sm:$0xff]  ;;  %v1937_v62 = vmul.f32 %v4858_v61, %v1743_v19 }
 0x31e   : > { %v1938_v25 = vmul.f32 %v4861_v3, %v1744_v43 }
 0x31f   : > { %v2238_v47 = vpop.permute.xlu1 %2237  ;;  %v2240_v30 = vpop.permute.xlu0 %2239  ;;  %v2127_v1 = vadd.f32 %v4961_v44, %v1936_v55  ;;  %v2128_v7 = vadd.f32 %v4959_v4, %v1937_v62 }
 0x320   : > { %v2308_v10 = vsel %vm2296_vm3, %v2116_v16, %v2238_v47  ;;  %v2309_v0 = vsel %vm2296_vm3, %v2117_v22, %v2240_v30  ;;  %v1745_v22 = vld [vmem:[%s4957_s27 + $0xc8] sm:$0xff]  ;;  %v1746_v47 = vld [vmem:[%s4957_s27 + $0xd0] sm:$0xff]  ;;  %v2129_v44 = vadd.f32 %v4966_v42, %v1938_v25 }
 0x321   : > { %2336 = vst.msk [vmem:[%s4975_s29 + $0x58] sm:$0xff] %vm2324_vm4, %v2308_v10  ;;  %2337 = vst.msk [vmem:[%s4975_s29 + $0x60] sm:$0xff] %vm2324_vm4, %v2309_v0  ;;  %v1939_v3 = vmul.f32 %v4865_v36, %v1745_v22  ;;  %v1940_v26 = vmul.f32 %v5617_v56, %v1746_v47 }
 0x323   : > { %v2242_v54 = vpop.permute.xlu1 %2241  ;;  %v2244_v20 = vpop.permute.xlu0 %2243  ;;  %v2130_v4 = vadd.f32 %v5618_v9, %v1939_v3 }
 0x324   : > { %v2310_v33 = vsel %vm2296_vm3, %v2118_v41, %v2242_v54  ;;  %v2311_v40 = vsel %vm2296_vm3, %v2119_v63, %v2244_v20  ;;  %v2131_v41 = vadd.f32 %v5619_v60, %v1940_v26 }
 0x325   : > { %2338 = vst.msk [vmem:[%s4975_s29 + $0x68] sm:$0xff] %vm2324_vm4, %v2310_v33  ;;  %2339 = vst.msk [vmem:[%s4975_s29 + $0x70] sm:$0xff] %vm2324_vm4, %v2311_v40 }
 0x327   : > { %v2246_v48 = vpop.permute.xlu1 %2245  ;;  %v2248_v15 = vpop.permute.xlu0 %2247 }
 0x328   : > { %v2312_v24 = vsel %vm2296_vm3, %v2120_v37, %v2246_v48  ;;  %v2313_v31 = vsel %vm2296_vm3, %v2121_v12, %v2248_v15 }
 0x329   : > { %2340 = vst.msk [vmem:[%s4975_s29 + $0x78] sm:$0xff] %vm2324_vm4, %v2312_v24  ;;  %2341 = vst.msk [vmem:[%s4975_s29 + $0x80] sm:$0xff] %vm2324_vm4, %v2313_v31 }
 0x32b   : > { %v2250_v38 = vpop.permute.xlu1 %2249  ;;  %v2252_v28 = vpop.permute.xlu0 %2251 }
 0x32c   : > { %v2314_v39 = vsel %vm2296_vm3, %v2122_v34, %v2250_v38  ;;  %v2315_v13 = vsel %vm2296_vm3, %v2123_v51, %v2252_v28 }
 0x32d   : > { %2342 = vst.msk [vmem:[%s4975_s29 + $0x88] sm:$0xff] %vm2324_vm4, %v2314_v39  ;;  %2343 = vst.msk [vmem:[%s4975_s29 + $0x90] sm:$0xff] %vm2324_vm4, %v2315_v13 }
 0x32f   : > { %v2254_v6 = vpop.permute.xlu1 %2253  ;;  %v2256_v23 = vpop.permute.xlu0 %2255 }
 0x330   : > { %v2316_v2 = vsel %vm2296_vm3, %v2124_v35, %v2254_v6  ;;  %v2317_v57 = vsel %vm2296_vm3, %v2125_v50, %v2256_v23 }
 0x331   : > { %2344 = vst.msk [vmem:[%s4975_s29 + $0x98] sm:$0xff] %vm2324_vm4, %v2316_v2  ;;  %2345 = vst.msk [vmem:[%s4975_s29 + $0xa0] sm:$0xff] %vm2324_vm4, %v2317_v57 }
 0x333   : > { %v2258_v58 = vpop.permute.xlu1 %2257  ;;  %v2260_v49 = vpop.permute.xlu0 %2259 }
 0x334   : > { %v2318_v53 = vsel %vm2296_vm3, %v2126_v46, %v2258_v58  ;;  %v2319_v16 = vsel %vm2296_vm3, %v2127_v1, %v2260_v49 }
 0x335   : > { %2346 = vst.msk [vmem:[%s4975_s29 + $0xa8] sm:$0xff] %vm2324_vm4, %v2318_v53  ;;  %2347 = vst.msk [vmem:[%s4975_s29 + $0xb0] sm:$0xff] %vm2324_vm4, %v2319_v16 }
 0x337   : > { %v2262_v61 = vpop.permute.xlu1 %2261  ;;  %v2264_v30 = vpop.permute.xlu0 %2263 }
 0x338   : > { %v2320_v10 = vsel %vm2296_vm3, %v2128_v7, %v2262_v61  ;;  %v2321_v0 = vsel %vm2296_vm3, %v2129_v44, %v2264_v30 }
 0x339   : > { %2348 = vst.msk [vmem:[%s4975_s29 + $0xb8] sm:$0xff] %vm2324_vm4, %v2320_v10  ;;  %2349 = vst.msk [vmem:[%s4975_s29 + $0xc0] sm:$0xff] %vm2324_vm4, %v2321_v0 }
 0x33b   : > { %v2266_v42 = vpop.permute.xlu1 %2265  ;;  %v2268_v63 = vpop.permute.xlu0 %2267 }
 0x33c   : > { %v2322_v54 = vsel %vm2296_vm3, %v2130_v4, %v2266_v42  ;;  %v2323_v36 = vsel %vm2296_vm3, %v2131_v41, %v2268_v63 }
 0x33d   : > { %2350 = vst.msk [vmem:[%s4975_s29 + $0xc8] sm:$0xff] %vm2324_vm4, %v2322_v54  ;;  %2351 = vst.msk [vmem:[%s4975_s29 + $0xd0] sm:$0xff] %vm2324_vm4, %v2323_v36 }
 0x33e PF: > { %s18_s24 = sadd.s32 1, %s2670_s24  }
 0x33f   : > { %p15_p5 = scmp.ge.s32.totalorder %s18_s24, 6  }
 0x341   :  { %17 = sbr.rel (!%p15_p5) target bundleno = 1 (0x1), region = 92 }
 0x346   :  { %2374 = vsyncpa [#allocation3], 1 }
 0x347   :  { %2376 = vsyncpa [#allocation3 + $0x1], 1 }

</bundles_post_ra>
